<compile_context>
chip_gen: v7x
topology: tpu7x:2x2x1
jax: 0.10.0
libtpu: 0.0.40
codegen_flags: <defaults>
</compile_context>

<pallas_src>
import functools

import numpy as np
import jax
import jax.numpy as jnp
from jax import lax
from jax.experimental import pallas as pl
from jax.experimental.pallas import tpu as pltpu


def _round_up(x, m):
    return (x + m - 1) // m * m


def _vmem_cap_bytes():
    phys = 128 << 20
    try:
        info = pltpu.get_tpu_info()
        phys = int(getattr(info, "vmem_capacity_bytes", phys) or phys)
    except Exception:
        pass
    # Never request the full physical VMEM; leave headroom for compiler scratch.
    return (phys * 3) // 4


# ----------------------------- Pallas kernel ------------------------------ #

def _convsc_kernel(x_ref, w_ref, b_ref, g_ref, bt_ref, m_ref, o_ref, *,
                   stride, c_blk, c_pad, c_real, wq, n_out, n_valid, bt,
                   tap_groups, apply_mask):
    """3x3 conv (folded-tap bf16 MXU matmul) + GroupNorm(2) + LeakyReLU(0.2).

    x_ref : (bt, stride*stride*c_blk, Lin) bf16  phase-decomposed padded input
    w_ref : (G, c_pad, gk)               bf16    folded per-group conv weights
    b_ref, g_ref, bt_ref : (c_pad, 1)    f32     conv bias / GN gamma / GN beta
    m_ref : (1, n_out)                   f32     validity mask over output lanes
    o_ref : (bt, c_pad, n_out)           bf16    lane-dense output
    """
    mask = m_ref[...]                              # (1, n_out) f32
    bias = b_ref[...]                              # (c_pad, 1) f32
    gamma = g_ref[...]
    beta = bt_ref[...]
    half = c_real // 2
    cnt = jnp.float32(n_valid * half)
    cidx = lax.broadcasted_iota(jnp.int32, (c_pad, 1), 0)
    in_g0 = cidx < half

    for s in range(bt):
        x = x_ref[s]                               # (cp, Lin) bf16

        # ---- conv: in-kernel im2col, folded into one dot per tap group ----
        acc = None
        for gi, grp in enumerate(tap_groups):
            pieces = []
            for t in grp:
                dh, dw = t // 3, t % 3
                pi = (dh % stride) * stride + (dw % stride)   # phase plane
                off = (dh // stride) * wq + (dw // stride)    # static lane shift
                pieces.append(x[pi * c_blk:(pi + 1) * c_blk, off:off + n_out])
            slab = pieces[0] if len(pieces) == 1 else jnp.concatenate(pieces, 0)
            part = jnp.dot(w_ref[gi], slab, preferred_element_type=jnp.float32)
            acc = part if acc is None else acc + part
        y = acc + bias                             # (c_pad, n_out) f32

        # ---- GroupNorm(2): masked stats, scalar rsqrt, fused affine --------
        def _stats(yg):
            ym = yg * mask
            s1 = jnp.sum(ym)
            s2 = jnp.sum(ym * yg)
            mean = s1 / cnt
            var = jnp.maximum(s2 / cnt - mean * mean, 0.0)
            return mean, lax.rsqrt(var + 1e-5)

        mean0, inv0 = _stats(y[:half])
        mean1, inv1 = _stats(y[half:c_real])
        mean_c = jnp.where(in_g0, mean0, mean1)    # (c_pad, 1)
        inv_c = jnp.where(in_g0, inv0, inv1)
        scale = inv_c * gamma                      # padded rows: gamma==0 -> 0
        shift = beta - mean_c * scale
        yn = y * scale + shift

        act = jnp.maximum(yn, 0.2 * yn)            # LeakyReLU(0.2)
        if apply_mask:
            act = act * mask                       # zero halo lanes for chaining
        o_ref[s] = act.astype(o_ref.dtype)


# ------------------------------ JAX glue ---------------------------------- #

def _build_planes(x_nchw, stride, hq, wq, lin, lead, c_blk):
    """Zero-pad + phase-decompose (space-to-depth) + flatten to kernel layout.

    Returns (N, stride*stride*c_blk, lin) bf16; per-phase channel blocks are
    padded to c_blk (16-aligned) rows, and `lead` zero lanes are prepended so a
    chaining producer can write shifted output lanes with non-negative offsets.
    """
    x_nchw = x_nchw.astype(jnp.bfloat16)
    n, c, _, _ = x_nchw.shape
    xp = jnp.pad(x_nchw, ((0, 0), (0, 0), (1, 1), (1, 1)))
    planes = []
    for ph in range(stride):
        for pw in range(stride):
            pp = xp[:, :, ph::stride, pw::stride]
            hs, ws = pp.shape[2], pp.shape[3]
            pp = jnp.pad(pp, ((0, 0), (0, c_blk - c), (0, hq - hs), (0, wq - ws)))
            planes.append(pp.reshape(n, c_blk, hq * wq))
    flat = planes[0] if len(planes) == 1 else jnp.concatenate(planes, axis=1)
    room = lin - lead
    ln = hq * wq
    if ln > room:                                  # kernel never reads past lin
        flat = flat[:, :, :room]
        ln = room
    return jnp.pad(flat, ((0, 0), (0, 0), (lead, lin - lead - ln)))


def _valid_mask(ho, wo, wq, n_out, shift):
    q = np.arange(n_out) - shift
    m = (q >= 0) & (q < ho * wq) & ((q % wq) < wo)
    return jnp.asarray(m.astype(np.float32).reshape(1, n_out))


def _to_nchw(flat, c_out, ho, wo, wq, shift):
    n = flat.shape[0]
    y = flat[:, :c_out, shift:shift + ho * wq]
    return y.reshape(n, c_out, ho, wq)[:, :, :, :wo]


def _fold_weights(w, c_real, c_pad, c_in, c_blk, groups):
    """(c_out, c_in, 3, 3) -> (G, c_pad, len(group)*c_blk) bf16, tap-major."""
    wt = jnp.transpose(w, (0, 2, 3, 1))            # (c_out, 3, 3, c_in)
    wt = jnp.pad(wt, ((0, c_pad - c_real), (0, 0), (0, 0), (0, c_blk - c_in)))
    wt = wt.reshape(c_pad, 9, c_blk)
    wg = [wt[:, list(grp), :].reshape(c_pad, len(grp) * c_blk) for grp in groups]
    return jnp.stack(wg, axis=0).astype(jnp.bfloat16)


def _convsc_layer(planes, params, *, stride, c_in, c_out, ho, wo, wq,
                  n_out, lin, out_shift, chain, bt):
    """One ConvSC layer on pre-built planes; returns (N, c_pad, n_out) bf16."""
    w, b, gamma, beta = params
    c_blk = _round_up(c_in, 16)                    # 16-aligned per-tap channels
    c_pad = _round_up(c_out, 16)
    cp = stride * stride * c_blk
    n_pad = planes.shape[0]
    assert planes.shape == (n_pad, cp, lin), (planes.shape, (n_pad, cp, lin))

    # Layer-conditional tap folding: one dot if the contraction is shallow,
    # otherwise per-row (3) or per-tap (9) groups to cap K.
    if c_blk < 128:
        groups = (tuple(range(9)),)
    elif c_blk < 256:
        groups = ((0, 1, 2), (3, 4, 5), (6, 7, 8))
    else:
        groups = tuple((t,) for t in range(9))

    w_fold = _fold_weights(w, c_out, c_pad, c_in, c_blk, groups)
    pad_c = ((0, c_pad - c_out),)
    b_p = jnp.pad(b, pad_c).reshape(c_pad, 1)
    g_p = jnp.pad(gamma, pad_c).reshape(c_pad, 1)
    bt_p = jnp.pad(beta, pad_c).reshape(c_pad, 1)
    mask = _valid_mask(ho, wo, wq, n_out, out_shift)

    kernel = functools.partial(
        _convsc_kernel, stride=stride, c_blk=c_blk, c_pad=c_pad, c_real=c_out,
        wq=wq, n_out=n_out, n_valid=ho * wo, bt=bt, tap_groups=groups,
        apply_mask=chain)

    gk = len(groups[0]) * c_blk
    est = (2 * bt * cp * lin * 2                      # in blocks (bf16, 2x buf)
           + 2 * bt * c_pad * n_out * 2               # out blocks (bf16, 2x buf)
           + 2 * (len(groups) * c_pad * gk * 2 + 3 * c_pad * 4 + n_out * 4)
           + bt * (9 * c_blk * n_out * 2 + 3 * c_pad * n_out * 4))  # temporaries
    vmem_limit = int(min(_vmem_cap_bytes(), max(8 << 20, est + est // 4)))

    out = pl.pallas_call(
        kernel,
        out_shape=jax.ShapeDtypeStruct((n_pad, c_pad, n_out), jnp.bfloat16),
        grid=(n_pad // bt,),
        in_specs=[
            pl.BlockSpec((bt, cp, lin), lambda i: (i, 0, 0)),
            pl.BlockSpec(w_fold.shape, lambda i: (0, 0, 0)),
            pl.BlockSpec((c_pad, 1), lambda i: (0, 0)),
            pl.BlockSpec((c_pad, 1), lambda i: (0, 0)),
            pl.BlockSpec((c_pad, 1), lambda i: (0, 0)),
            pl.BlockSpec((1, n_out), lambda i: (0, 0)),
        ],
        out_specs=pl.BlockSpec((bt, c_pad, n_out), lambda i: (i, 0, 0)),
        compiler_params=pltpu.CompilerParams(
            dimension_semantics=("parallel",),
            vmem_limit_bytes=vmem_limit),
    )(planes, w_fold, b_p, g_p, bt_p, mask)
    return out


def init_encoder_params(key, c_in, c_hid):
    """Deterministic parameter init matching EncoderDeep layer shapes."""
    layer_defs = [
        (c_in,      c_hid,     1),
        (c_hid,     2 * c_hid, 1),
        (2 * c_hid, 4 * c_hid, 2),
        (4 * c_hid, 4 * c_hid, 1),
        (4 * c_hid, 8 * c_hid, 2),
        (8 * c_hid, 8 * c_hid, 1),
    ]
    params, strides = [], []
    for ci, co, s in layer_defs:
        key, kw, kb = jax.random.split(key, 3)
        bound = float(1.0 / np.sqrt(ci * 9))
        w = jax.random.uniform(kw, (co, ci, 3, 3), jnp.float32, -bound, bound)
        b = jax.random.uniform(kb, (co,), jnp.float32, -bound, bound)
        gamma = jnp.ones((co,), jnp.float32)
        beta = jnp.zeros((co,), jnp.float32)
        params.append((w, b, gamma, beta))
        strides.append(s)
    return params, strides


@functools.partial(jax.jit, static_argnums=(2,))
def encoder_deep_forward(x_nchw, params, strides):
    """EncoderDeep.forward; input/outputs are NCHW f32 (PyTorch convention)."""
    n, c0, h0, w0 = x_nchw.shape
    L = len(strides)

    # ---- static per-layer geometry ----------------------------------------
    geo = []
    h, wd, cin = h0, w0, c0
    for k in range(L):
        s = strides[k]
        cout = params[k][0].shape[0]
        ho = (h + 2 - 3) // s + 1
        wo = (wd + 2 - 3) // s + 1
        geo.append(dict(stride=s, c_in=cin, c_out=cout,
                        ho=ho, wo=wo, hq=ho + 2, wq=wo + 2))
        h, wd, cin = ho, wo, cout

    # Chaining: a layer whose consumer has stride 1 writes directly into that
    # consumer's padded flattened-plane layout (valid pixels at shifted lanes).
    chain = [k + 1 < L and strides[k + 1] == 1 for k in range(L)]
    shift = [0] * L
    n_outs = [0] * L
    lins = [0] * L
    for k in reversed(range(L)):
        g = geo[k]
        if chain[k]:
            assert geo[k + 1]["wq"] == g["wq"]
            shift[k] = shift[k + 1] + g["wq"] + 1
        max_off = (2 // g["stride"]) * (g["wq"] + 1)
        if chain[k]:
            n_outs[k] = lins[k + 1]                # output block IS next input
        else:
            n_outs[k] = _round_up(shift[k] + g["ho"] * g["wq"], 128)
        lins[k] = _round_up(n_outs[k] + max_off, 128)

    # ---- batch tiling: amortize per-step cost, keep >=2 steps for v7x TCs --
    bt = 1 if n < 4 else 2
    n_pad = _round_up(n, bt)
    x = x_nchw.astype(jnp.bfloat16)
    if n_pad > n:
        x = jnp.pad(x, ((0, n_pad - n), (0, 0), (0, 0), (0, 0)))

    outs = []
    planes = None
    cur = x
    for k in range(L):
        g = geo[k]
        if planes is None:
            planes = _build_planes(cur, g["stride"], g["hq"], g["wq"],
                                   lins[k], shift[k], _round_up(g["c_in"], 16))
        out_flat = _convsc_layer(
            planes, params[k], stride=g["stride"], c_in=g["c_in"],
            c_out=g["c_out"], ho=g["ho"], wo=g["wo"], wq=g["wq"],
            n_out=n_outs[k], lin=lins[k], out_shift=shift[k],
            chain=chain[k], bt=bt)
        outs.append(out_flat)
        if chain[k]:
            planes = out_flat                      # consumed directly, no repack
        else:
            planes = None
            if k + 1 < L:                          # stride-2 consumer: repack
                cur = _to_nchw(out_flat, g["c_out"], g["ho"], g["wo"],
                               g["wq"], shift[k])

    feats = []
    for k in range(L):
        g = geo[k]
        y = _to_nchw(outs[k], g["c_out"], g["ho"], g["wo"], g["wq"], shift[k])
        feats.append(y[:n].astype(jnp.float32))
    enc1, enc2, enc3, enc4, enc5, latent = feats
    return latent, [enc5, enc4, enc3, enc2, enc1]


# --------------------------------- main ------------------------------------ #

if __name__ == "__main__":
    key = jax.random.PRNGKey(0)
    k_x, k_p = jax.random.split(key)

    N, C_in, H, W = 2, 3, 16, 16
    C_hid = 4
    x = jax.random.normal(k_x, (N, C_in, H, W), jnp.float32)

    params, strides = init_encoder_params(k_p, C_in, C_hid)

    latent, skips = encoder_deep_forward(x, params, tuple(strides))
    jax.block_until_ready(latent)
    for s in skips:
        jax.block_until_ready(s)

    assert latent.shape == (N, 8 * C_hid, H // 4, W // 4), latent.shape
    assert skips[0].shape == (N, 8 * C_hid, H // 4, W // 4)   # enc5
    assert skips[1].shape == (N, 4 * C_hid, H // 2, W // 2)   # enc4
    assert skips[2].shape == (N, 4 * C_hid, H // 2, W // 2)   # enc3
    assert skips[3].shape == (N, 2 * C_hid, H, W)             # enc2
    assert skips[4].shape == (N, 1 * C_hid, H, W)             # enc1
    assert latent.dtype == jnp.float32

    print("KERNEL_OK")
</pallas_src>

<mosaic_0001>
module attributes {stable_mosaic.version = 11 : i64} {
  func.func @_convsc_kernel(%arg0: i32, %arg1: memref<1x16x640xbf16, #tpu.memory_space<vmem>>, %arg2: memref<1x16x144xbf16, #tpu.memory_space<vmem>>, %arg3: memref<16x1xf32, #tpu.memory_space<vmem>>, %arg4: memref<16x1xf32, #tpu.memory_space<vmem>>, %arg5: memref<16x1xf32, #tpu.memory_space<vmem>>, %arg6: memref<1x512xf32, #tpu.memory_space<vmem>>, %arg7: memref<1x16x512xbf16, #tpu.memory_space<vmem>>) attributes {dimension_semantics = [#tpu.dimension_semantics<parallel>], iteration_bounds = array<i64: 2>, scalar_prefetch = 0 : i64, scratch_operands = 0 : i64, tpu.core_type = #tpu.core_type<tc>, window_params = [{transform_indices = @transform_0, window_bounds = array<i64: 1, 16, 640>}, {pipeline_mode = #tpu.pipeline_mode<synchronous>, transform_indices = @transform_1, window_bounds = array<i64: 1, 16, 144>}, {pipeline_mode = #tpu.pipeline_mode<synchronous>, transform_indices = @transform_2, window_bounds = array<i64: 16, 1>}, {pipeline_mode = #tpu.pipeline_mode<synchronous>, transform_indices = @transform_3, window_bounds = array<i64: 16, 1>}, {pipeline_mode = #tpu.pipeline_mode<synchronous>, transform_indices = @transform_4, window_bounds = array<i64: 16, 1>}, {pipeline_mode = #tpu.pipeline_mode<synchronous>, transform_indices = @transform_5, window_bounds = array<i64: 1, 512>}, {transform_indices = @transform_6, window_bounds = array<i64: 1, 16, 512>}]} {
    %c0 = arith.constant 0 : index
    %c0_0 = arith.constant 0 : index
    %0 = vector.load %arg6[%c0, %c0_0] : memref<1x512xf32, #tpu.memory_space<vmem>>, vector<1x512xf32>
    %c0_1 = arith.constant 0 : index
    %c0_2 = arith.constant 0 : index
    %1 = vector.load %arg3[%c0_1, %c0_2] : memref<16x1xf32, #tpu.memory_space<vmem>>, vector<16x1xf32>
    %c0_3 = arith.constant 0 : index
    %c0_4 = arith.constant 0 : index
    %2 = vector.load %arg4[%c0_3, %c0_4] : memref<16x1xf32, #tpu.memory_space<vmem>>, vector<16x1xf32>
    %c0_5 = arith.constant 0 : index
    %c0_6 = arith.constant 0 : index
    %3 = vector.load %arg5[%c0_5, %c0_6] : memref<16x1xf32, #tpu.memory_space<vmem>>, vector<16x1xf32>
    %4 = tpu.iota {dimensions = array<i32: 0>} : vector<16x1xi32>
    %c2_i32 = arith.constant 2 : i32
    %5 = vector.broadcast %c2_i32 : i32 to vector<16x1xi32>
    %6 = arith.cmpi slt, %4, %5 : vector<16x1xi32>
    %c0_7 = arith.constant 0 : index
    %c0_8 = arith.constant 0 : index
    %c0_9 = arith.constant 0 : index
    %7 = vector.load %arg1[%c0_7, %c0_8, %c0_9] : memref<1x16x640xbf16, #tpu.memory_space<vmem>>, vector<1x16x640xbf16>
    %8 = vector.shape_cast %7 : vector<1x16x640xbf16> to vector<16x640xbf16>
    %9 = vector.extract_strided_slice %8 {offsets = [0, 0], sizes = [16, 512], strides = [1, 1]} : vector<16x640xbf16> to vector<16x512xbf16>
    %10 = vector.extract_strided_slice %8 {offsets = [0, 1], sizes = [16, 512], strides = [1, 1]} : vector<16x640xbf16> to vector<16x512xbf16>
    %11 = vector.extract_strided_slice %8 {offsets = [0, 2], sizes = [16, 512], strides = [1, 1]} : vector<16x640xbf16> to vector<16x512xbf16>
    %12 = vector.extract_strided_slice %8 {offsets = [0, 18], sizes = [16, 512], strides = [1, 1]} : vector<16x640xbf16> to vector<16x512xbf16>
    %13 = vector.extract_strided_slice %8 {offsets = [0, 19], sizes = [16, 512], strides = [1, 1]} : vector<16x640xbf16> to vector<16x512xbf16>
    %14 = vector.extract_strided_slice %8 {offsets = [0, 20], sizes = [16, 512], strides = [1, 1]} : vector<16x640xbf16> to vector<16x512xbf16>
    %15 = vector.extract_strided_slice %8 {offsets = [0, 36], sizes = [16, 512], strides = [1, 1]} : vector<16x640xbf16> to vector<16x512xbf16>
    %16 = vector.extract_strided_slice %8 {offsets = [0, 37], sizes = [16, 512], strides = [1, 1]} : vector<16x640xbf16> to vector<16x512xbf16>
    %17 = vector.extract_strided_slice %8 {offsets = [0, 38], sizes = [16, 512], strides = [1, 1]} : vector<16x640xbf16> to vector<16x512xbf16>
    %18 = tpu.concatenate %9, %10, %11, %12, %13, %14, %15, %16, %17 in 0 : vector<16x512xbf16>, vector<16x512xbf16>, vector<16x512xbf16>, vector<16x512xbf16>, vector<16x512xbf16>, vector<16x512xbf16>, vector<16x512xbf16>, vector<16x512xbf16>, vector<16x512xbf16> -> vector<144x512xbf16>
    %c0_10 = arith.constant 0 : index
    %c0_11 = arith.constant 0 : index
    %c0_12 = arith.constant 0 : index
    %19 = vector.load %arg2[%c0_10, %c0_11, %c0_12] : memref<1x16x144xbf16, #tpu.memory_space<vmem>>, vector<1x16x144xbf16>
    %20 = vector.shape_cast %19 : vector<1x16x144xbf16> to vector<16x144xbf16>
    %cst = arith.constant dense<0.000000e+00> : vector<16x512xf32>
    %21 = tpu.matmul %20, %18, %cst {dimension_numbers = #tpu.dot_dimension_numbers<[1], [0], [0], [1], [0, 0, 1, 1], [], []>} : vector<16x144xbf16>, vector<144x512xbf16>, vector<16x512xf32> -> vector<16x512xf32>
    %22 = vector.broadcast %1 : vector<16x1xf32> to vector<16x512xf32>
    %23 = arith.addf %21, %22 : vector<16x512xf32>
    %24 = vector.extract_strided_slice %23 {offsets = [0, 0], sizes = [2, 512], strides = [1, 1]} : vector<16x512xf32> to vector<2x512xf32>
    %25 = vector.broadcast %0 : vector<1x512xf32> to vector<2x512xf32>
    %26 = arith.mulf %24, %25 : vector<2x512xf32>
    %27 = vector.shape_cast %26 : vector<2x512xf32> to vector<1x2x512xf32>
    %cst_13 = arith.constant dense<0.000000e+00> : vector<1xf32>
    %28 = vector.multi_reduction <add>, %27, %cst_13 [1, 2] : vector<1x2x512xf32> to vector<1xf32>
    %29 = vector.shape_cast %28 : vector<1xf32> to vector<1x1x1xf32>
    %30 = vector.extract %29[0, 0, 0] : f32 from vector<1x1x1xf32>
    %31 = arith.mulf %26, %24 : vector<2x512xf32>
    %32 = vector.shape_cast %31 : vector<2x512xf32> to vector<1x2x512xf32>
    %cst_14 = arith.constant dense<0.000000e+00> : vector<1xf32>
    %33 = vector.multi_reduction <add>, %32, %cst_14 [1, 2] : vector<1x2x512xf32> to vector<1xf32>
    %34 = vector.shape_cast %33 : vector<1xf32> to vector<1x1x1xf32>
    %35 = vector.extract %34[0, 0, 0] : f32 from vector<1x1x1xf32>
    %cst_15 = arith.constant 5.120000e+02 : f32
    %36 = arith.divf %30, %cst_15 : f32
    %cst_16 = arith.constant 5.120000e+02 : f32
    %37 = arith.divf %35, %cst_16 : f32
    %38 = arith.mulf %36, %36 : f32
    %39 = arith.subf %37, %38 : f32
    %cst_17 = arith.constant 0.000000e+00 : f32
    %40 = arith.maximumf %39, %cst_17 : f32
    %cst_18 = arith.constant 9.99999974E-6 : f32
    %41 = arith.addf %40, %cst_18 : f32
    %42 = math.rsqrt %41 : f32
    %43 = vector.extract_strided_slice %23 {offsets = [2, 0], sizes = [2, 512], strides = [1, 1]} : vector<16x512xf32> to vector<2x512xf32>
    %44 = vector.broadcast %0 : vector<1x512xf32> to vector<2x512xf32>
    %45 = arith.mulf %43, %44 : vector<2x512xf32>
    %46 = vector.shape_cast %45 : vector<2x512xf32> to vector<1x2x512xf32>
    %cst_19 = arith.constant dense<0.000000e+00> : vector<1xf32>
    %47 = vector.multi_reduction <add>, %46, %cst_19 [1, 2] : vector<1x2x512xf32> to vector<1xf32>
    %48 = vector.shape_cast %47 : vector<1xf32> to vector<1x1x1xf32>
    %49 = vector.extract %48[0, 0, 0] : f32 from vector<1x1x1xf32>
    %50 = arith.mulf %45, %43 : vector<2x512xf32>
    %51 = vector.shape_cast %50 : vector<2x512xf32> to vector<1x2x512xf32>
    %cst_20 = arith.constant dense<0.000000e+00> : vector<1xf32>
    %52 = vector.multi_reduction <add>, %51, %cst_20 [1, 2] : vector<1x2x512xf32> to vector<1xf32>
    %53 = vector.shape_cast %52 : vector<1xf32> to vector<1x1x1xf32>
    %54 = vector.extract %53[0, 0, 0] : f32 from vector<1x1x1xf32>
    %cst_21 = arith.constant 5.120000e+02 : f32
    %55 = arith.divf %49, %cst_21 : f32
    %cst_22 = arith.constant 5.120000e+02 : f32
    %56 = arith.divf %54, %cst_22 : f32
    %57 = arith.mulf %55, %55 : f32
    %58 = arith.subf %56, %57 : f32
    %cst_23 = arith.constant 0.000000e+00 : f32
    %59 = arith.maximumf %58, %cst_23 : f32
    %cst_24 = arith.constant 9.99999974E-6 : f32
    %60 = arith.addf %59, %cst_24 : f32
    %61 = math.rsqrt %60 : f32
    %62 = vector.broadcast %36 : f32 to vector<16x1xf32>
    %63 = vector.broadcast %55 : f32 to vector<16x1xf32>
    %64 = arith.select %6, %62, %63 : vector<16x1xi1>, vector<16x1xf32>
    %65 = vector.broadcast %42 : f32 to vector<16x1xf32>
    %66 = vector.broadcast %61 : f32 to vector<16x1xf32>
    %67 = arith.select %6, %65, %66 : vector<16x1xi1>, vector<16x1xf32>
    %68 = arith.mulf %67, %2 : vector<16x1xf32>
    %69 = arith.mulf %64, %68 : vector<16x1xf32>
    %70 = arith.subf %3, %69 : vector<16x1xf32>
    %71 = vector.broadcast %68 : vector<16x1xf32> to vector<16x512xf32>
    %72 = arith.mulf %23, %71 : vector<16x512xf32>
    %73 = vector.broadcast %70 : vector<16x1xf32> to vector<16x512xf32>
    %74 = arith.addf %72, %73 : vector<16x512xf32>
    %cst_25 = arith.constant 2.000000e-01 : f32
    %75 = vector.broadcast %cst_25 : f32 to vector<16x512xf32>
    %76 = arith.mulf %75, %74 : vector<16x512xf32>
    %77 = arith.maximumf %74, %76 : vector<16x512xf32>
    %78 = vector.broadcast %0 : vector<1x512xf32> to vector<16x512xf32>
    %79 = arith.mulf %77, %78 : vector<16x512xf32>
    %80 = arith.truncf %79 : vector<16x512xf32> to vector<16x512xbf16>
    %c0_26 = arith.constant 0 : index
    %c0_27 = arith.constant 0 : index
    %c0_28 = arith.constant 0 : index
    %81 = vector.load %arg7[%c0_26, %c0_27, %c0_28] : memref<1x16x512xbf16, #tpu.memory_space<vmem>>, vector<1x16x512xbf16>
    %82 = vector.shape_cast %81 : vector<1x16x512xbf16> to vector<16x512xbf16>
    %83 = vector.shape_cast %80 : vector<16x512xbf16> to vector<1x16x512xbf16>
    tpu.vector_store %arg7[%c0_26, %c0_27, %c0_28], %83 {strides = array<i32>} : memref<1x16x512xbf16, #tpu.memory_space<vmem>>, vector<1x16x512xbf16>,
    return
  }
  func.func @transform_0(%arg0: i32) -> (i32, i32, i32) {
    %c0_i32 = arith.constant 0 : i32
    %c0_i32_0 = arith.constant 0 : i32
    %c0_i32_1 = arith.constant 0 : i32
    return %arg0, %c0_i32, %c0_i32_0 : i32, i32, i32
  }
  func.func @transform_1(%arg0: i32) -> (i32, i32, i32) {
    %c0_i32 = arith.constant 0 : i32
    %c0_i32_0 = arith.constant 0 : i32
    %c0_i32_1 = arith.constant 0 : i32
    %c0_i32_2 = arith.constant 0 : i32
    return %c0_i32, %c0_i32_0, %c0_i32_1 : i32, i32, i32
  }
  func.func @transform_2(%arg0: i32) -> (i32, i32) {
    %c0_i32 = arith.constant 0 : i32
    %c0_i32_0 = arith.constant 0 : i32
    %c0_i32_1 = arith.constant 0 : i32
    return %c0_i32, %c0_i32_0 : i32, i32
  }
  func.func @transform_3(%arg0: i32) -> (i32, i32) {
    %c0_i32 = arith.constant 0 : i32
    %c0_i32_0 = arith.constant 0 : i32
    %c0_i32_1 = arith.constant 0 : i32
    return %c0_i32, %c0_i32_0 : i32, i32
  }
  func.func @transform_4(%arg0: i32) -> (i32, i32) {
    %c0_i32 = arith.constant 0 : i32
    %c0_i32_0 = arith.constant 0 : i32
    %c0_i32_1 = arith.constant 0 : i32
    return %c0_i32, %c0_i32_0 : i32, i32
  }
  func.func @transform_5(%arg0: i32) -> (i32, i32) {
    %c0_i32 = arith.constant 0 : i32
    %c0_i32_0 = arith.constant 0 : i32
    %c0_i32_1 = arith.constant 0 : i32
    return %c0_i32, %c0_i32_0 : i32, i32
  }
  func.func @transform_6(%arg0: i32) -> (i32, i32, i32) {
    %c0_i32 = arith.constant 0 : i32
    %c0_i32_0 = arith.constant 0 : i32
    %c0_i32_1 = arith.constant 0 : i32
    return %arg0, %c0_i32, %c0_i32_0 : i32, i32, i32
  }
}

module attributes {stable_mosaic.version = 11 : i64} {
  func.func @_convsc_kernel(%arg0: i32, %arg1: memref<1x16x512xbf16, #tpu.memory_space<vmem>>, %arg2: memref<1x16x144xbf16, #tpu.memory_space<vmem>>, %arg3: memref<16x1xf32, #tpu.memory_space<vmem>>, %arg4: memref<16x1xf32, #tpu.memory_space<vmem>>, %arg5: memref<16x1xf32, #tpu.memory_space<vmem>>, %arg6: memref<1x384xf32, #tpu.memory_space<vmem>>, %arg7: memref<1x16x384xbf16, #tpu.memory_space<vmem>>) attributes {dimension_semantics = [#tpu.dimension_semantics<parallel>], iteration_bounds = array<i64: 2>, scalar_prefetch = 0 : i64, scratch_operands = 0 : i64, tpu.core_type = #tpu.core_type<tc>, window_params = [{transform_indices = @transform_0, window_bounds = array<i64: 1, 16, 512>}, {pipeline_mode = #tpu.pipeline_mode<synchronous>, transform_indices = @transform_1, window_bounds = array<i64: 1, 16, 144>}, {pipeline_mode = #tpu.pipeline_mode<synchronous>, transform_indices = @transform_2, window_bounds = array<i64: 16, 1>}, {pipeline_mode = #tpu.pipeline_mode<synchronous>, transform_indices = @transform_3, window_bounds = array<i64: 16, 1>}, {pipeline_mode = #tpu.pipeline_mode<synchronous>, transform_indices = @transform_4, window_bounds = array<i64: 16, 1>}, {pipeline_mode = #tpu.pipeline_mode<synchronous>, transform_indices = @transform_5, window_bounds = array<i64: 1, 384>}, {transform_indices = @transform_6, window_bounds = array<i64: 1, 16, 384>}]} {
    %c0 = arith.constant 0 : index
    %c0_0 = arith.constant 0 : index
    %0 = vector.load %arg6[%c0, %c0_0] : memref<1x384xf32, #tpu.memory_space<vmem>>, vector<1x384xf32>
    %c0_1 = arith.constant 0 : index
    %c0_2 = arith.constant 0 : index
    %1 = vector.load %arg3[%c0_1, %c0_2] : memref<16x1xf32, #tpu.memory_space<vmem>>, vector<16x1xf32>
    %c0_3 = arith.constant 0 : index
    %c0_4 = arith.constant 0 : index
    %2 = vector.load %arg4[%c0_3, %c0_4] : memref<16x1xf32, #tpu.memory_space<vmem>>, vector<16x1xf32>
    %c0_5 = arith.constant 0 : index
    %c0_6 = arith.constant 0 : index
    %3 = vector.load %arg5[%c0_5, %c0_6] : memref<16x1xf32, #tpu.memory_space<vmem>>, vector<16x1xf32>
    %4 = tpu.iota {dimensions = array<i32: 0>} : vector<16x1xi32>
    %c4_i32 = arith.constant 4 : i32
    %5 = vector.broadcast %c4_i32 : i32 to vector<16x1xi32>
    %6 = arith.cmpi slt, %4, %5 : vector<16x1xi32>
    %c0_7 = arith.constant 0 : index
    %c0_8 = arith.constant 0 : index
    %c0_9 = arith.constant 0 : index
    %7 = vector.load %arg1[%c0_7, %c0_8, %c0_9] : memref<1x16x512xbf16, #tpu.memory_space<vmem>>, vector<1x16x512xbf16>
    %8 = vector.shape_cast %7 : vector<1x16x512xbf16> to vector<16x512xbf16>
    %9 = vector.extract_strided_slice %8 {offsets = [0, 0], sizes = [16, 384], strides = [1, 1]} : vector<16x512xbf16> to vector<16x384xbf16>
    %10 = vector.extract_strided_slice %8 {offsets = [0, 1], sizes = [16, 384], strides = [1, 1]} : vector<16x512xbf16> to vector<16x384xbf16>
    %11 = vector.extract_strided_slice %8 {offsets = [0, 2], sizes = [16, 384], strides = [1, 1]} : vector<16x512xbf16> to vector<16x384xbf16>
    %12 = vector.extract_strided_slice %8 {offsets = [0, 18], sizes = [16, 384], strides = [1, 1]} : vector<16x512xbf16> to vector<16x384xbf16>
    %13 = vector.extract_strided_slice %8 {offsets = [0, 19], sizes = [16, 384], strides = [1, 1]} : vector<16x512xbf16> to vector<16x384xbf16>
    %14 = vector.extract_strided_slice %8 {offsets = [0, 20], sizes = [16, 384], strides = [1, 1]} : vector<16x512xbf16> to vector<16x384xbf16>
    %15 = vector.extract_strided_slice %8 {offsets = [0, 36], sizes = [16, 384], strides = [1, 1]} : vector<16x512xbf16> to vector<16x384xbf16>
    %16 = vector.extract_strided_slice %8 {offsets = [0, 37], sizes = [16, 384], strides = [1, 1]} : vector<16x512xbf16> to vector<16x384xbf16>
    %17 = vector.extract_strided_slice %8 {offsets = [0, 38], sizes = [16, 384], strides = [1, 1]} : vector<16x512xbf16> to vector<16x384xbf16>
    %18 = tpu.concatenate %9, %10, %11, %12, %13, %14, %15, %16, %17 in 0 : vector<16x384xbf16>, vector<16x384xbf16>, vector<16x384xbf16>, vector<16x384xbf16>, vector<16x384xbf16>, vector<16x384xbf16>, vector<16x384xbf16>, vector<16x384xbf16>, vector<16x384xbf16> -> vector<144x384xbf16>
    %c0_10 = arith.constant 0 : index
    %c0_11 = arith.constant 0 : index
    %c0_12 = arith.constant 0 : index
    %19 = vector.load %arg2[%c0_10, %c0_11, %c0_12] : memref<1x16x144xbf16, #tpu.memory_space<vmem>>, vector<1x16x144xbf16>
    %20 = vector.shape_cast %19 : vector<1x16x144xbf16> to vector<16x144xbf16>
    %cst = arith.constant dense<0.000000e+00> : vector<16x384xf32>
    %21 = tpu.matmul %20, %18, %cst {dimension_numbers = #tpu.dot_dimension_numbers<[1], [0], [0], [1], [0, 0, 1, 1], [], []>} : vector<16x144xbf16>, vector<144x384xbf16>, vector<16x384xf32> -> vector<16x384xf32>
    %22 = vector.broadcast %1 : vector<16x1xf32> to vector<16x384xf32>
    %23 = arith.addf %21, %22 : vector<16x384xf32>
    %24 = vector.extract_strided_slice %23 {offsets = [0, 0], sizes = [4, 384], strides = [1, 1]} : vector<16x384xf32> to vector<4x384xf32>
    %25 = vector.broadcast %0 : vector<1x384xf32> to vector<4x384xf32>
    %26 = arith.mulf %24, %25 : vector<4x384xf32>
    %27 = vector.shape_cast %26 : vector<4x384xf32> to vector<1x4x384xf32>
    %cst_13 = arith.constant dense<0.000000e+00> : vector<1xf32>
    %28 = vector.multi_reduction <add>, %27, %cst_13 [1, 2] : vector<1x4x384xf32> to vector<1xf32>
    %29 = vector.shape_cast %28 : vector<1xf32> to vector<1x1x1xf32>
    %30 = vector.extract %29[0, 0, 0] : f32 from vector<1x1x1xf32>
    %31 = arith.mulf %26, %24 : vector<4x384xf32>
    %32 = vector.shape_cast %31 : vector<4x384xf32> to vector<1x4x384xf32>
    %cst_14 = arith.constant dense<0.000000e+00> : vector<1xf32>
    %33 = vector.multi_reduction <add>, %32, %cst_14 [1, 2] : vector<1x4x384xf32> to vector<1xf32>
    %34 = vector.shape_cast %33 : vector<1xf32> to vector<1x1x1xf32>
    %35 = vector.extract %34[0, 0, 0] : f32 from vector<1x1x1xf32>
    %cst_15 = arith.constant 1.024000e+03 : f32
    %36 = arith.divf %30, %cst_15 : f32
    %cst_16 = arith.constant 1.024000e+03 : f32
    %37 = arith.divf %35, %cst_16 : f32
    %38 = arith.mulf %36, %36 : f32
    %39 = arith.subf %37, %38 : f32
    %cst_17 = arith.constant 0.000000e+00 : f32
    %40 = arith.maximumf %39, %cst_17 : f32
    %cst_18 = arith.constant 9.99999974E-6 : f32
    %41 = arith.addf %40, %cst_18 : f32
    %42 = math.rsqrt %41 : f32
    %43 = vector.extract_strided_slice %23 {offsets = [4, 0], sizes = [4, 384], strides = [1, 1]} : vector<16x384xf32> to vector<4x384xf32>
    %44 = vector.broadcast %0 : vector<1x384xf32> to vector<4x384xf32>
    %45 = arith.mulf %43, %44 : vector<4x384xf32>
    %46 = vector.shape_cast %45 : vector<4x384xf32> to vector<1x4x384xf32>
    %cst_19 = arith.constant dense<0.000000e+00> : vector<1xf32>
    %47 = vector.multi_reduction <add>, %46, %cst_19 [1, 2] : vector<1x4x384xf32> to vector<1xf32>
    %48 = vector.shape_cast %47 : vector<1xf32> to vector<1x1x1xf32>
    %49 = vector.extract %48[0, 0, 0] : f32 from vector<1x1x1xf32>
    %50 = arith.mulf %45, %43 : vector<4x384xf32>
    %51 = vector.shape_cast %50 : vector<4x384xf32> to vector<1x4x384xf32>
    %cst_20 = arith.constant dense<0.000000e+00> : vector<1xf32>
    %52 = vector.multi_reduction <add>, %51, %cst_20 [1, 2] : vector<1x4x384xf32> to vector<1xf32>
    %53 = vector.shape_cast %52 : vector<1xf32> to vector<1x1x1xf32>
    %54 = vector.extract %53[0, 0, 0] : f32 from vector<1x1x1xf32>
    %cst_21 = arith.constant 1.024000e+03 : f32
    %55 = arith.divf %49, %cst_21 : f32
    %cst_22 = arith.constant 1.024000e+03 : f32
    %56 = arith.divf %54, %cst_22 : f32
    %57 = arith.mulf %55, %55 : f32
    %58 = arith.subf %56, %57 : f32
    %cst_23 = arith.constant 0.000000e+00 : f32
    %59 = arith.maximumf %58, %cst_23 : f32
    %cst_24 = arith.constant 9.99999974E-6 : f32
    %60 = arith.addf %59, %cst_24 : f32
    %61 = math.rsqrt %60 : f32
    %62 = vector.broadcast %36 : f32 to vector<16x1xf32>
    %63 = vector.broadcast %55 : f32 to vector<16x1xf32>
    %64 = arith.select %6, %62, %63 : vector<16x1xi1>, vector<16x1xf32>
    %65 = vector.broadcast %42 : f32 to vector<16x1xf32>
    %66 = vector.broadcast %61 : f32 to vector<16x1xf32>
    %67 = arith.select %6, %65, %66 : vector<16x1xi1>, vector<16x1xf32>
    %68 = arith.mulf %67, %2 : vector<16x1xf32>
    %69 = arith.mulf %64, %68 : vector<16x1xf32>
    %70 = arith.subf %3, %69 : vector<16x1xf32>
    %71 = vector.broadcast %68 : vector<16x1xf32> to vector<16x384xf32>
    %72 = arith.mulf %23, %71 : vector<16x384xf32>
    %73 = vector.broadcast %70 : vector<16x1xf32> to vector<16x384xf32>
    %74 = arith.addf %72, %73 : vector<16x384xf32>
    %cst_25 = arith.constant 2.000000e-01 : f32
    %75 = vector.broadcast %cst_25 : f32 to vector<16x384xf32>
    %76 = arith.mulf %75, %74 : vector<16x384xf32>
    %77 = arith.maximumf %74, %76 : vector<16x384xf32>
    %78 = arith.truncf %77 : vector<16x384xf32> to vector<16x384xbf16>
    %c0_26 = arith.constant 0 : index
    %c0_27 = arith.constant 0 : index
    %c0_28 = arith.constant 0 : index
    %79 = vector.load %arg7[%c0_26, %c0_27, %c0_28] : memref<1x16x384xbf16, #tpu.memory_space<vmem>>, vector<1x16x384xbf16>
    %80 = vector.shape_cast %79 : vector<1x16x384xbf16> to vector<16x384xbf16>
    %81 = vector.shape_cast %78 : vector<16x384xbf16> to vector<1x16x384xbf16>
    tpu.vector_store %arg7[%c0_26, %c0_27, %c0_28], %81 {strides = array<i32>} : memref<1x16x384xbf16, #tpu.memory_space<vmem>>, vector<1x16x384xbf16>,
    return
  }
  func.func @transform_0(%arg0: i32) -> (i32, i32, i32) {
    %c0_i32 = arith.constant 0 : i32
    %c0_i32_0 = arith.constant 0 : i32
    %c0_i32_1 = arith.constant 0 : i32
    return %arg0, %c0_i32, %c0_i32_0 : i32, i32, i32
  }
  func.func @transform_1(%arg0: i32) -> (i32, i32, i32) {
    %c0_i32 = arith.constant 0 : i32
    %c0_i32_0 = arith.constant 0 : i32
    %c0_i32_1 = arith.constant 0 : i32
    %c0_i32_2 = arith.constant 0 : i32
    return %c0_i32, %c0_i32_0, %c0_i32_1 : i32, i32, i32
  }
  func.func @transform_2(%arg0: i32) -> (i32, i32) {
    %c0_i32 = arith.constant 0 : i32
    %c0_i32_0 = arith.constant 0 : i32
    %c0_i32_1 = arith.constant 0 : i32
    return %c0_i32, %c0_i32_0 : i32, i32
  }
  func.func @transform_3(%arg0: i32) -> (i32, i32) {
    %c0_i32 = arith.constant 0 : i32
    %c0_i32_0 = arith.constant 0 : i32
    %c0_i32_1 = arith.constant 0 : i32
    return %c0_i32, %c0_i32_0 : i32, i32
  }
  func.func @transform_4(%arg0: i32) -> (i32, i32) {
    %c0_i32 = arith.constant 0 : i32
    %c0_i32_0 = arith.constant 0 : i32
    %c0_i32_1 = arith.constant 0 : i32
    return %c0_i32, %c0_i32_0 : i32, i32
  }
  func.func @transform_5(%arg0: i32) -> (i32, i32) {
    %c0_i32 = arith.constant 0 : i32
    %c0_i32_0 = arith.constant 0 : i32
    %c0_i32_1 = arith.constant 0 : i32
    return %c0_i32, %c0_i32_0 : i32, i32
  }
  func.func @transform_6(%arg0: i32) -> (i32, i32, i32) {
    %c0_i32 = arith.constant 0 : i32
    %c0_i32_0 = arith.constant 0 : i32
    %c0_i32_1 = arith.constant 0 : i32
    return %arg0, %c0_i32, %c0_i32_0 : i32, i32, i32
  }
}

module attributes {stable_mosaic.version = 11 : i64} {
  func.func @_convsc_kernel(%arg0: i32, %arg1: memref<1x64x384xbf16, #tpu.memory_space<vmem>>, %arg2: memref<1x16x144xbf16, #tpu.memory_space<vmem>>, %arg3: memref<16x1xf32, #tpu.memory_space<vmem>>, %arg4: memref<16x1xf32, #tpu.memory_space<vmem>>, %arg5: memref<16x1xf32, #tpu.memory_space<vmem>>, %arg6: memref<1x256xf32, #tpu.memory_space<vmem>>, %arg7: memref<1x16x256xbf16, #tpu.memory_space<vmem>>) attributes {dimension_semantics = [#tpu.dimension_semantics<parallel>], iteration_bounds = array<i64: 2>, scalar_prefetch = 0 : i64, scratch_operands = 0 : i64, tpu.core_type = #tpu.core_type<tc>, window_params = [{transform_indices = @transform_0, window_bounds = array<i64: 1, 64, 384>}, {pipeline_mode = #tpu.pipeline_mode<synchronous>, transform_indices = @transform_1, window_bounds = array<i64: 1, 16, 144>}, {pipeline_mode = #tpu.pipeline_mode<synchronous>, transform_indices = @transform_2, window_bounds = array<i64: 16, 1>}, {pipeline_mode = #tpu.pipeline_mode<synchronous>, transform_indices = @transform_3, window_bounds = array<i64: 16, 1>}, {pipeline_mode = #tpu.pipeline_mode<synchronous>, transform_indices = @transform_4, window_bounds = array<i64: 16, 1>}, {pipeline_mode = #tpu.pipeline_mode<synchronous>, transform_indices = @transform_5, window_bounds = array<i64: 1, 256>}, {transform_indices = @transform_6, window_bounds = array<i64: 1, 16, 256>}]} {
    %c0 = arith.constant 0 : index
    %c0_0 = arith.constant 0 : index
    %0 = vector.load %arg6[%c0, %c0_0] : memref<1x256xf32, #tpu.memory_space<vmem>>, vector<1x256xf32>
    %c0_1 = arith.constant 0 : index
    %c0_2 = arith.constant 0 : index
    %1 = vector.load %arg3[%c0_1, %c0_2] : memref<16x1xf32, #tpu.memory_space<vmem>>, vector<16x1xf32>
    %c0_3 = arith.constant 0 : index
    %c0_4 = arith.constant 0 : index
    %2 = vector.load %arg4[%c0_3, %c0_4] : memref<16x1xf32, #tpu.memory_space<vmem>>, vector<16x1xf32>
    %c0_5 = arith.constant 0 : index
    %c0_6 = arith.constant 0 : index
    %3 = vector.load %arg5[%c0_5, %c0_6] : memref<16x1xf32, #tpu.memory_space<vmem>>, vector<16x1xf32>
    %4 = tpu.iota {dimensions = array<i32: 0>} : vector<16x1xi32>
    %c8_i32 = arith.constant 8 : i32
    %5 = vector.broadcast %c8_i32 : i32 to vector<16x1xi32>
    %6 = arith.cmpi slt, %4, %5 : vector<16x1xi32>
    %c0_7 = arith.constant 0 : index
    %c0_8 = arith.constant 0 : index
    %c0_9 = arith.constant 0 : index
    %7 = vector.load %arg1[%c0_7, %c0_8, %c0_9] : memref<1x64x384xbf16, #tpu.memory_space<vmem>>, vector<1x64x384xbf16>
    %8 = vector.shape_cast %7 : vector<1x64x384xbf16> to vector<64x384xbf16>
    %9 = vector.extract_strided_slice %8 {offsets = [0, 0], sizes = [16, 256], strides = [1, 1]} : vector<64x384xbf16> to vector<16x256xbf16>
    %10 = vector.extract_strided_slice %8 {offsets = [16, 0], sizes = [16, 256], strides = [1, 1]} : vector<64x384xbf16> to vector<16x256xbf16>
    %11 = vector.extract_strided_slice %8 {offsets = [0, 1], sizes = [16, 256], strides = [1, 1]} : vector<64x384xbf16> to vector<16x256xbf16>
    %12 = vector.extract_strided_slice %8 {offsets = [32, 0], sizes = [16, 256], strides = [1, 1]} : vector<64x384xbf16> to vector<16x256xbf16>
    %13 = vector.extract_strided_slice %8 {offsets = [48, 0], sizes = [16, 256], strides = [1, 1]} : vector<64x384xbf16> to vector<16x256xbf16>
    %14 = vector.extract_strided_slice %8 {offsets = [32, 1], sizes = [16, 256], strides = [1, 1]} : vector<64x384xbf16> to vector<16x256xbf16>
    %15 = vector.extract_strided_slice %8 {offsets = [0, 10], sizes = [16, 256], strides = [1, 1]} : vector<64x384xbf16> to vector<16x256xbf16>
    %16 = vector.extract_strided_slice %8 {offsets = [16, 10], sizes = [16, 256], strides = [1, 1]} : vector<64x384xbf16> to vector<16x256xbf16>
    %17 = vector.extract_strided_slice %8 {offsets = [0, 11], sizes = [16, 256], strides = [1, 1]} : vector<64x384xbf16> to vector<16x256xbf16>
    %18 = tpu.concatenate %9, %10, %11, %12, %13, %14, %15, %16, %17 in 0 : vector<16x256xbf16>, vector<16x256xbf16>, vector<16x256xbf16>, vector<16x256xbf16>, vector<16x256xbf16>, vector<16x256xbf16>, vector<16x256xbf16>, vector<16x256xbf16>, vector<16x256xbf16> -> vector<144x256xbf16>
    %c0_10 = arith.constant 0 : index
    %c0_11 = arith.constant 0 : index
    %c0_12 = arith.constant 0 : index
    %19 = vector.load %arg2[%c0_10, %c0_11, %c0_12] : memref<1x16x144xbf16, #tpu.memory_space<vmem>>, vector<1x16x144xbf16>
    %20 = vector.shape_cast %19 : vector<1x16x144xbf16> to vector<16x144xbf16>
    %cst = arith.constant dense<0.000000e+00> : vector<16x256xf32>
    %21 = tpu.matmul %20, %18, %cst {dimension_numbers = #tpu.dot_dimension_numbers<[1], [0], [0], [1], [0, 0, 1, 1], [], []>} : vector<16x144xbf16>, vector<144x256xbf16>, vector<16x256xf32> -> vector<16x256xf32>
    %22 = vector.broadcast %1 : vector<16x1xf32> to vector<16x256xf32>
    %23 = arith.addf %21, %22 : vector<16x256xf32>
    %24 = vector.extract_strided_slice %23 {offsets = [0, 0], sizes = [8, 256], strides = [1, 1]} : vector<16x256xf32> to vector<8x256xf32>
    %25 = vector.broadcast %0 : vector<1x256xf32> to vector<8x256xf32>
    %26 = arith.mulf %24, %25 : vector<8x256xf32>
    %27 = vector.shape_cast %26 : vector<8x256xf32> to vector<1x8x256xf32>
    %cst_13 = arith.constant dense<0.000000e+00> : vector<1xf32>
    %28 = vector.multi_reduction <add>, %27, %cst_13 [1, 2] : vector<1x8x256xf32> to vector<1xf32>
    %29 = vector.shape_cast %28 : vector<1xf32> to vector<1x1x1xf32>
    %30 = vector.extract %29[0, 0, 0] : f32 from vector<1x1x1xf32>
    %31 = arith.mulf %26, %24 : vector<8x256xf32>
    %32 = vector.shape_cast %31 : vector<8x256xf32> to vector<1x8x256xf32>
    %cst_14 = arith.constant dense<0.000000e+00> : vector<1xf32>
    %33 = vector.multi_reduction <add>, %32, %cst_14 [1, 2] : vector<1x8x256xf32> to vector<1xf32>
    %34 = vector.shape_cast %33 : vector<1xf32> to vector<1x1x1xf32>
    %35 = vector.extract %34[0, 0, 0] : f32 from vector<1x1x1xf32>
    %cst_15 = arith.constant 5.120000e+02 : f32
    %36 = arith.divf %30, %cst_15 : f32
    %cst_16 = arith.constant 5.120000e+02 : f32
    %37 = arith.divf %35, %cst_16 : f32
    %38 = arith.mulf %36, %36 : f32
    %39 = arith.subf %37, %38 : f32
    %cst_17 = arith.constant 0.000000e+00 : f32
    %40 = arith.maximumf %39, %cst_17 : f32
    %cst_18 = arith.constant 9.99999974E-6 : f32
    %41 = arith.addf %40, %cst_18 : f32
    %42 = math.rsqrt %41 : f32
    %43 = vector.extract_strided_slice %23 {offsets = [8, 0], sizes = [8, 256], strides = [1, 1]} : vector<16x256xf32> to vector<8x256xf32>
    %44 = vector.broadcast %0 : vector<1x256xf32> to vector<8x256xf32>
    %45 = arith.mulf %43, %44 : vector<8x256xf32>
    %46 = vector.shape_cast %45 : vector<8x256xf32> to vector<1x8x256xf32>
    %cst_19 = arith.constant dense<0.000000e+00> : vector<1xf32>
    %47 = vector.multi_reduction <add>, %46, %cst_19 [1, 2] : vector<1x8x256xf32> to vector<1xf32>
    %48 = vector.shape_cast %47 : vector<1xf32> to vector<1x1x1xf32>
    %49 = vector.extract %48[0, 0, 0] : f32 from vector<1x1x1xf32>
    %50 = arith.mulf %45, %43 : vector<8x256xf32>
    %51 = vector.shape_cast %50 : vector<8x256xf32> to vector<1x8x256xf32>
    %cst_20 = arith.constant dense<0.000000e+00> : vector<1xf32>
    %52 = vector.multi_reduction <add>, %51, %cst_20 [1, 2] : vector<1x8x256xf32> to vector<1xf32>
    %53 = vector.shape_cast %52 : vector<1xf32> to vector<1x1x1xf32>
    %54 = vector.extract %53[0, 0, 0] : f32 from vector<1x1x1xf32>
    %cst_21 = arith.constant 5.120000e+02 : f32
    %55 = arith.divf %49, %cst_21 : f32
    %cst_22 = arith.constant 5.120000e+02 : f32
    %56 = arith.divf %54, %cst_22 : f32
    %57 = arith.mulf %55, %55 : f32
    %58 = arith.subf %56, %57 : f32
    %cst_23 = arith.constant 0.000000e+00 : f32
    %59 = arith.maximumf %58, %cst_23 : f32
    %cst_24 = arith.constant 9.99999974E-6 : f32
    %60 = arith.addf %59, %cst_24 : f32
    %61 = math.rsqrt %60 : f32
    %62 = vector.broadcast %36 : f32 to vector<16x1xf32>
    %63 = vector.broadcast %55 : f32 to vector<16x1xf32>
    %64 = arith.select %6, %62, %63 : vector<16x1xi1>, vector<16x1xf32>
    %65 = vector.broadcast %42 : f32 to vector<16x1xf32>
    %66 = vector.broadcast %61 : f32 to vector<16x1xf32>
    %67 = arith.select %6, %65, %66 : vector<16x1xi1>, vector<16x1xf32>
    %68 = arith.mulf %67, %2 : vector<16x1xf32>
    %69 = arith.mulf %64, %68 : vector<16x1xf32>
    %70 = arith.subf %3, %69 : vector<16x1xf32>
    %71 = vector.broadcast %68 : vector<16x1xf32> to vector<16x256xf32>
    %72 = arith.mulf %23, %71 : vector<16x256xf32>
    %73 = vector.broadcast %70 : vector<16x1xf32> to vector<16x256xf32>
    %74 = arith.addf %72, %73 : vector<16x256xf32>
    %cst_25 = arith.constant 2.000000e-01 : f32
    %75 = vector.broadcast %cst_25 : f32 to vector<16x256xf32>
    %76 = arith.mulf %75, %74 : vector<16x256xf32>
    %77 = arith.maximumf %74, %76 : vector<16x256xf32>
    %78 = vector.broadcast %0 : vector<1x256xf32> to vector<16x256xf32>
    %79 = arith.mulf %77, %78 : vector<16x256xf32>
    %80 = arith.truncf %79 : vector<16x256xf32> to vector<16x256xbf16>
    %c0_26 = arith.constant 0 : index
    %c0_27 = arith.constant 0 : index
    %c0_28 = arith.constant 0 : index
    %81 = vector.load %arg7[%c0_26, %c0_27, %c0_28] : memref<1x16x256xbf16, #tpu.memory_space<vmem>>, vector<1x16x256xbf16>
    %82 = vector.shape_cast %81 : vector<1x16x256xbf16> to vector<16x256xbf16>
    %83 = vector.shape_cast %80 : vector<16x256xbf16> to vector<1x16x256xbf16>
    tpu.vector_store %arg7[%c0_26, %c0_27, %c0_28], %83 {strides = array<i32>} : memref<1x16x256xbf16, #tpu.memory_space<vmem>>, vector<1x16x256xbf16>,
    return
  }
  func.func @transform_0(%arg0: i32) -> (i32, i32, i32) {
    %c0_i32 = arith.constant 0 : i32
    %c0_i32_0 = arith.constant 0 : i32
    %c0_i32_1 = arith.constant 0 : i32
    return %arg0, %c0_i32, %c0_i32_0 : i32, i32, i32
  }
  func.func @transform_1(%arg0: i32) -> (i32, i32, i32) {
    %c0_i32 = arith.constant 0 : i32
    %c0_i32_0 = arith.constant 0 : i32
    %c0_i32_1 = arith.constant 0 : i32
    %c0_i32_2 = arith.constant 0 : i32
    return %c0_i32, %c0_i32_0, %c0_i32_1 : i32, i32, i32
  }
  func.func @transform_2(%arg0: i32) -> (i32, i32) {
    %c0_i32 = arith.constant 0 : i32
    %c0_i32_0 = arith.constant 0 : i32
    %c0_i32_1 = arith.constant 0 : i32
    return %c0_i32, %c0_i32_0 : i32, i32
  }
  func.func @transform_3(%arg0: i32) -> (i32, i32) {
    %c0_i32 = arith.constant 0 : i32
    %c0_i32_0 = arith.constant 0 : i32
    %c0_i32_1 = arith.constant 0 : i32
    return %c0_i32, %c0_i32_0 : i32, i32
  }
  func.func @transform_4(%arg0: i32) -> (i32, i32) {
    %c0_i32 = arith.constant 0 : i32
    %c0_i32_0 = arith.constant 0 : i32
    %c0_i32_1 = arith.constant 0 : i32
    return %c0_i32, %c0_i32_0 : i32, i32
  }
  func.func @transform_5(%arg0: i32) -> (i32, i32) {
    %c0_i32 = arith.constant 0 : i32
    %c0_i32_0 = arith.constant 0 : i32
    %c0_i32_1 = arith.constant 0 : i32
    return %c0_i32, %c0_i32_0 : i32, i32
  }
  func.func @transform_6(%arg0: i32) -> (i32, i32, i32) {
    %c0_i32 = arith.constant 0 : i32
    %c0_i32_0 = arith.constant 0 : i32
    %c0_i32_1 = arith.constant 0 : i32
    return %arg0, %c0_i32, %c0_i32_0 : i32, i32, i32
  }
}

module attributes {stable_mosaic.version = 11 : i64} {
  func.func @_convsc_kernel(%arg0: i32, %arg1: memref<1x16x256xbf16, #tpu.memory_space<vmem>>, %arg2: memref<1x16x144xbf16, #tpu.memory_space<vmem>>, %arg3: memref<16x1xf32, #tpu.memory_space<vmem>>, %arg4: memref<16x1xf32, #tpu.memory_space<vmem>>, %arg5: memref<16x1xf32, #tpu.memory_space<vmem>>, %arg6: memref<1x128xf32, #tpu.memory_space<vmem>>, %arg7: memref<1x16x128xbf16, #tpu.memory_space<vmem>>) attributes {dimension_semantics = [#tpu.dimension_semantics<parallel>], iteration_bounds = array<i64: 2>, scalar_prefetch = 0 : i64, scratch_operands = 0 : i64, tpu.core_type = #tpu.core_type<tc>, window_params = [{transform_indices = @transform_0, window_bounds = array<i64: 1, 16, 256>}, {pipeline_mode = #tpu.pipeline_mode<synchronous>, transform_indices = @transform_1, window_bounds = array<i64: 1, 16, 144>}, {pipeline_mode = #tpu.pipeline_mode<synchronous>, transform_indices = @transform_2, window_bounds = array<i64: 16, 1>}, {pipeline_mode = #tpu.pipeline_mode<synchronous>, transform_indices = @transform_3, window_bounds = array<i64: 16, 1>}, {pipeline_mode = #tpu.pipeline_mode<synchronous>, transform_indices = @transform_4, window_bounds = array<i64: 16, 1>}, {pipeline_mode = #tpu.pipeline_mode<synchronous>, transform_indices = @transform_5, window_bounds = array<i64: 1, 128>}, {transform_indices = @transform_6, window_bounds = array<i64: 1, 16, 128>}]} {
    %c0 = arith.constant 0 : index
    %c0_0 = arith.constant 0 : index
    %0 = vector.load %arg6[%c0, %c0_0] : memref<1x128xf32, #tpu.memory_space<vmem>>, vector<1x128xf32>
    %c0_1 = arith.constant 0 : index
    %c0_2 = arith.constant 0 : index
    %1 = vector.load %arg3[%c0_1, %c0_2] : memref<16x1xf32, #tpu.memory_space<vmem>>, vector<16x1xf32>
    %c0_3 = arith.constant 0 : index
    %c0_4 = arith.constant 0 : index
    %2 = vector.load %arg4[%c0_3, %c0_4] : memref<16x1xf32, #tpu.memory_space<vmem>>, vector<16x1xf32>
    %c0_5 = arith.constant 0 : index
    %c0_6 = arith.constant 0 : index
    %3 = vector.load %arg5[%c0_5, %c0_6] : memref<16x1xf32, #tpu.memory_space<vmem>>, vector<16x1xf32>
    %4 = tpu.iota {dimensions = array<i32: 0>} : vector<16x1xi32>
    %c8_i32 = arith.constant 8 : i32
    %5 = vector.broadcast %c8_i32 : i32 to vector<16x1xi32>
    %6 = arith.cmpi slt, %4, %5 : vector<16x1xi32>
    %c0_7 = arith.constant 0 : index
    %c0_8 = arith.constant 0 : index
    %c0_9 = arith.constant 0 : index
    %7 = vector.load %arg1[%c0_7, %c0_8, %c0_9] : memref<1x16x256xbf16, #tpu.memory_space<vmem>>, vector<1x16x256xbf16>
    %8 = vector.shape_cast %7 : vector<1x16x256xbf16> to vector<16x256xbf16>
    %9 = vector.extract_strided_slice %8 {offsets = [0, 0], sizes = [16, 128], strides = [1, 1]} : vector<16x256xbf16> to vector<16x128xbf16>
    %10 = vector.extract_strided_slice %8 {offsets = [0, 1], sizes = [16, 128], strides = [1, 1]} : vector<16x256xbf16> to vector<16x128xbf16>
    %11 = vector.extract_strided_slice %8 {offsets = [0, 2], sizes = [16, 128], strides = [1, 1]} : vector<16x256xbf16> to vector<16x128xbf16>
    %12 = vector.extract_strided_slice %8 {offsets = [0, 10], sizes = [16, 128], strides = [1, 1]} : vector<16x256xbf16> to vector<16x128xbf16>
    %13 = vector.extract_strided_slice %8 {offsets = [0, 11], sizes = [16, 128], strides = [1, 1]} : vector<16x256xbf16> to vector<16x128xbf16>
    %14 = vector.extract_strided_slice %8 {offsets = [0, 12], sizes = [16, 128], strides = [1, 1]} : vector<16x256xbf16> to vector<16x128xbf16>
    %15 = vector.extract_strided_slice %8 {offsets = [0, 20], sizes = [16, 128], strides = [1, 1]} : vector<16x256xbf16> to vector<16x128xbf16>
    %16 = vector.extract_strided_slice %8 {offsets = [0, 21], sizes = [16, 128], strides = [1, 1]} : vector<16x256xbf16> to vector<16x128xbf16>
    %17 = vector.extract_strided_slice %8 {offsets = [0, 22], sizes = [16, 128], strides = [1, 1]} : vector<16x256xbf16> to vector<16x128xbf16>
    %18 = tpu.concatenate %9, %10, %11, %12, %13, %14, %15, %16, %17 in 0 : vector<16x128xbf16>, vector<16x128xbf16>, vector<16x128xbf16>, vector<16x128xbf16>, vector<16x128xbf16>, vector<16x128xbf16>, vector<16x128xbf16>, vector<16x128xbf16>, vector<16x128xbf16> -> vector<144x128xbf16>
    %c0_10 = arith.constant 0 : index
    %c0_11 = arith.constant 0 : index
    %c0_12 = arith.constant 0 : index
    %19 = vector.load %arg2[%c0_10, %c0_11, %c0_12] : memref<1x16x144xbf16, #tpu.memory_space<vmem>>, vector<1x16x144xbf16>
    %20 = vector.shape_cast %19 : vector<1x16x144xbf16> to vector<16x144xbf16>
    %cst = arith.constant dense<0.000000e+00> : vector<16x128xf32>
    %21 = tpu.matmul %20, %18, %cst {dimension_numbers = #tpu.dot_dimension_numbers<[1], [0], [0], [1], [0, 0, 1, 1], [], []>} : vector<16x144xbf16>, vector<144x128xbf16>, vector<16x128xf32> -> vector<16x128xf32>
    %22 = vector.broadcast %1 : vector<16x1xf32> to vector<16x128xf32>
    %23 = arith.addf %21, %22 : vector<16x128xf32>
    %24 = vector.extract_strided_slice %23 {offsets = [0, 0], sizes = [8, 128], strides = [1, 1]} : vector<16x128xf32> to vector<8x128xf32>
    %25 = vector.broadcast %0 : vector<1x128xf32> to vector<8x128xf32>
    %26 = arith.mulf %24, %25 : vector<8x128xf32>
    %27 = vector.shape_cast %26 : vector<8x128xf32> to vector<1x8x128xf32>
    %cst_13 = arith.constant dense<0.000000e+00> : vector<1xf32>
    %28 = vector.multi_reduction <add>, %27, %cst_13 [1, 2] : vector<1x8x128xf32> to vector<1xf32>
    %29 = vector.shape_cast %28 : vector<1xf32> to vector<1x1x1xf32>
    %30 = vector.extract %29[0, 0, 0] : f32 from vector<1x1x1xf32>
    %31 = arith.mulf %26, %24 : vector<8x128xf32>
    %32 = vector.shape_cast %31 : vector<8x128xf32> to vector<1x8x128xf32>
    %cst_14 = arith.constant dense<0.000000e+00> : vector<1xf32>
    %33 = vector.multi_reduction <add>, %32, %cst_14 [1, 2] : vector<1x8x128xf32> to vector<1xf32>
    %34 = vector.shape_cast %33 : vector<1xf32> to vector<1x1x1xf32>
    %35 = vector.extract %34[0, 0, 0] : f32 from vector<1x1x1xf32>
    %cst_15 = arith.constant 5.120000e+02 : f32
    %36 = arith.divf %30, %cst_15 : f32
    %cst_16 = arith.constant 5.120000e+02 : f32
    %37 = arith.divf %35, %cst_16 : f32
    %38 = arith.mulf %36, %36 : f32
    %39 = arith.subf %37, %38 : f32
    %cst_17 = arith.constant 0.000000e+00 : f32
    %40 = arith.maximumf %39, %cst_17 : f32
    %cst_18 = arith.constant 9.99999974E-6 : f32
    %41 = arith.addf %40, %cst_18 : f32
    %42 = math.rsqrt %41 : f32
    %43 = vector.extract_strided_slice %23 {offsets = [8, 0], sizes = [8, 128], strides = [1, 1]} : vector<16x128xf32> to vector<8x128xf32>
    %44 = vector.broadcast %0 : vector<1x128xf32> to vector<8x128xf32>
    %45 = arith.mulf %43, %44 : vector<8x128xf32>
    %46 = vector.shape_cast %45 : vector<8x128xf32> to vector<1x8x128xf32>
    %cst_19 = arith.constant dense<0.000000e+00> : vector<1xf32>
    %47 = vector.multi_reduction <add>, %46, %cst_19 [1, 2] : vector<1x8x128xf32> to vector<1xf32>
    %48 = vector.shape_cast %47 : vector<1xf32> to vector<1x1x1xf32>
    %49 = vector.extract %48[0, 0, 0] : f32 from vector<1x1x1xf32>
    %50 = arith.mulf %45, %43 : vector<8x128xf32>
    %51 = vector.shape_cast %50 : vector<8x128xf32> to vector<1x8x128xf32>
    %cst_20 = arith.constant dense<0.000000e+00> : vector<1xf32>
    %52 = vector.multi_reduction <add>, %51, %cst_20 [1, 2] : vector<1x8x128xf32> to vector<1xf32>
    %53 = vector.shape_cast %52 : vector<1xf32> to vector<1x1x1xf32>
    %54 = vector.extract %53[0, 0, 0] : f32 from vector<1x1x1xf32>
    %cst_21 = arith.constant 5.120000e+02 : f32
    %55 = arith.divf %49, %cst_21 : f32
    %cst_22 = arith.constant 5.120000e+02 : f32
    %56 = arith.divf %54, %cst_22 : f32
    %57 = arith.mulf %55, %55 : f32
    %58 = arith.subf %56, %57 : f32
    %cst_23 = arith.constant 0.000000e+00 : f32
    %59 = arith.maximumf %58, %cst_23 : f32
    %cst_24 = arith.constant 9.99999974E-6 : f32
    %60 = arith.addf %59, %cst_24 : f32
    %61 = math.rsqrt %60 : f32
    %62 = vector.broadcast %36 : f32 to vector<16x1xf32>
    %63 = vector.broadcast %55 : f32 to vector<16x1xf32>
    %64 = arith.select %6, %62, %63 : vector<16x1xi1>, vector<16x1xf32>
    %65 = vector.broadcast %42 : f32 to vector<16x1xf32>
    %66 = vector.broadcast %61 : f32 to vector<16x1xf32>
    %67 = arith.select %6, %65, %66 : vector<16x1xi1>, vector<16x1xf32>
    %68 = arith.mulf %67, %2 : vector<16x1xf32>
    %69 = arith.mulf %64, %68 : vector<16x1xf32>
    %70 = arith.subf %3, %69 : vector<16x1xf32>
    %71 = vector.broadcast %68 : vector<16x1xf32> to vector<16x128xf32>
    %72 = arith.mulf %23, %71 : vector<16x128xf32>
    %73 = vector.broadcast %70 : vector<16x1xf32> to vector<16x128xf32>
    %74 = arith.addf %72, %73 : vector<16x128xf32>
    %cst_25 = arith.constant 2.000000e-01 : f32
    %75 = vector.broadcast %cst_25 : f32 to vector<16x128xf32>
    %76 = arith.mulf %75, %74 : vector<16x128xf32>
    %77 = arith.maximumf %74, %76 : vector<16x128xf32>
    %78 = arith.truncf %77 : vector<16x128xf32> to vector<16x128xbf16>
    %c0_26 = arith.constant 0 : index
    %c0_27 = arith.constant 0 : index
    %c0_28 = arith.constant 0 : index
    %79 = vector.load %arg7[%c0_26, %c0_27, %c0_28] : memref<1x16x128xbf16, #tpu.memory_space<vmem>>, vector<1x16x128xbf16>
    %80 = vector.shape_cast %79 : vector<1x16x128xbf16> to vector<16x128xbf16>
    %81 = vector.shape_cast %78 : vector<16x128xbf16> to vector<1x16x128xbf16>
    tpu.vector_store %arg7[%c0_26, %c0_27, %c0_28], %81 {strides = array<i32>} : memref<1x16x128xbf16, #tpu.memory_space<vmem>>, vector<1x16x128xbf16>,
    return
  }
  func.func @transform_0(%arg0: i32) -> (i32, i32, i32) {
    %c0_i32 = arith.constant 0 : i32
    %c0_i32_0 = arith.constant 0 : i32
    %c0_i32_1 = arith.constant 0 : i32
    return %arg0, %c0_i32, %c0_i32_0 : i32, i32, i32
  }
  func.func @transform_1(%arg0: i32) -> (i32, i32, i32) {
    %c0_i32 = arith.constant 0 : i32
    %c0_i32_0 = arith.constant 0 : i32
    %c0_i32_1 = arith.constant 0 : i32
    %c0_i32_2 = arith.constant 0 : i32
    return %c0_i32, %c0_i32_0, %c0_i32_1 : i32, i32, i32
  }
  func.func @transform_2(%arg0: i32) -> (i32, i32) {
    %c0_i32 = arith.constant 0 : i32
    %c0_i32_0 = arith.constant 0 : i32
    %c0_i32_1 = arith.constant 0 : i32
    return %c0_i32, %c0_i32_0 : i32, i32
  }
  func.func @transform_3(%arg0: i32) -> (i32, i32) {
    %c0_i32 = arith.constant 0 : i32
    %c0_i32_0 = arith.constant 0 : i32
    %c0_i32_1 = arith.constant 0 : i32
    return %c0_i32, %c0_i32_0 : i32, i32
  }
  func.func @transform_4(%arg0: i32) -> (i32, i32) {
    %c0_i32 = arith.constant 0 : i32
    %c0_i32_0 = arith.constant 0 : i32
    %c0_i32_1 = arith.constant 0 : i32
    return %c0_i32, %c0_i32_0 : i32, i32
  }
  func.func @transform_5(%arg0: i32) -> (i32, i32) {
    %c0_i32 = arith.constant 0 : i32
    %c0_i32_0 = arith.constant 0 : i32
    %c0_i32_1 = arith.constant 0 : i32
    return %c0_i32, %c0_i32_0 : i32, i32
  }
  func.func @transform_6(%arg0: i32) -> (i32, i32, i32) {
    %c0_i32 = arith.constant 0 : i32
    %c0_i32_0 = arith.constant 0 : i32
    %c0_i32_1 = arith.constant 0 : i32
    return %arg0, %c0_i32, %c0_i32_0 : i32, i32, i32
  }
}

module attributes {stable_mosaic.version = 11 : i64} {
  func.func @_convsc_kernel(%arg0: i32, %arg1: memref<1x64x384xbf16, #tpu.memory_space<vmem>>, %arg2: memref<1x32x144xbf16, #tpu.memory_space<vmem>>, %arg3: memref<32x1xf32, #tpu.memory_space<vmem>>, %arg4: memref<32x1xf32, #tpu.memory_space<vmem>>, %arg5: memref<32x1xf32, #tpu.memory_space<vmem>>, %arg6: memref<1x256xf32, #tpu.memory_space<vmem>>, %arg7: memref<1x32x256xbf16, #tpu.memory_space<vmem>>) attributes {dimension_semantics = [#tpu.dimension_semantics<parallel>], iteration_bounds = array<i64: 2>, scalar_prefetch = 0 : i64, scratch_operands = 0 : i64, tpu.core_type = #tpu.core_type<tc>, window_params = [{transform_indices = @transform_0, window_bounds = array<i64: 1, 64, 384>}, {pipeline_mode = #tpu.pipeline_mode<synchronous>, transform_indices = @transform_1, window_bounds = array<i64: 1, 32, 144>}, {pipeline_mode = #tpu.pipeline_mode<synchronous>, transform_indices = @transform_2, window_bounds = array<i64: 32, 1>}, {pipeline_mode = #tpu.pipeline_mode<synchronous>, transform_indices = @transform_3, window_bounds = array<i64: 32, 1>}, {pipeline_mode = #tpu.pipeline_mode<synchronous>, transform_indices = @transform_4, window_bounds = array<i64: 32, 1>}, {pipeline_mode = #tpu.pipeline_mode<synchronous>, transform_indices = @transform_5, window_bounds = array<i64: 1, 256>}, {transform_indices = @transform_6, window_bounds = array<i64: 1, 32, 256>}]} {
    %c0 = arith.constant 0 : index
    %c0_0 = arith.constant 0 : index
    %0 = vector.load %arg6[%c0, %c0_0] : memref<1x256xf32, #tpu.memory_space<vmem>>, vector<1x256xf32>
    %c0_1 = arith.constant 0 : index
    %c0_2 = arith.constant 0 : index
    %1 = vector.load %arg3[%c0_1, %c0_2] : memref<32x1xf32, #tpu.memory_space<vmem>>, vector<32x1xf32>
    %c0_3 = arith.constant 0 : index
    %c0_4 = arith.constant 0 : index
    %2 = vector.load %arg4[%c0_3, %c0_4] : memref<32x1xf32, #tpu.memory_space<vmem>>, vector<32x1xf32>
    %c0_5 = arith.constant 0 : index
    %c0_6 = arith.constant 0 : index
    %3 = vector.load %arg5[%c0_5, %c0_6] : memref<32x1xf32, #tpu.memory_space<vmem>>, vector<32x1xf32>
    %4 = tpu.iota {dimensions = array<i32: 0>} : vector<32x1xi32>
    %c16_i32 = arith.constant 16 : i32
    %5 = vector.broadcast %c16_i32 : i32 to vector<32x1xi32>
    %6 = arith.cmpi slt, %4, %5 : vector<32x1xi32>
    %c0_7 = arith.constant 0 : index
    %c0_8 = arith.constant 0 : index
    %c0_9 = arith.constant 0 : index
    %7 = vector.load %arg1[%c0_7, %c0_8, %c0_9] : memref<1x64x384xbf16, #tpu.memory_space<vmem>>, vector<1x64x384xbf16>
    %8 = vector.shape_cast %7 : vector<1x64x384xbf16> to vector<64x384xbf16>
    %9 = vector.extract_strided_slice %8 {offsets = [0, 0], sizes = [16, 256], strides = [1, 1]} : vector<64x384xbf16> to vector<16x256xbf16>
    %10 = vector.extract_strided_slice %8 {offsets = [16, 0], sizes = [16, 256], strides = [1, 1]} : vector<64x384xbf16> to vector<16x256xbf16>
    %11 = vector.extract_strided_slice %8 {offsets = [0, 1], sizes = [16, 256], strides = [1, 1]} : vector<64x384xbf16> to vector<16x256xbf16>
    %12 = vector.extract_strided_slice %8 {offsets = [32, 0], sizes = [16, 256], strides = [1, 1]} : vector<64x384xbf16> to vector<16x256xbf16>
    %13 = vector.extract_strided_slice %8 {offsets = [48, 0], sizes = [16, 256], strides = [1, 1]} : vector<64x384xbf16> to vector<16x256xbf16>
    %14 = vector.extract_strided_slice %8 {offsets = [32, 1], sizes = [16, 256], strides = [1, 1]} : vector<64x384xbf16> to vector<16x256xbf16>
    %15 = vector.extract_strided_slice %8 {offsets = [0, 6], sizes = [16, 256], strides = [1, 1]} : vector<64x384xbf16> to vector<16x256xbf16>
    %16 = vector.extract_strided_slice %8 {offsets = [16, 6], sizes = [16, 256], strides = [1, 1]} : vector<64x384xbf16> to vector<16x256xbf16>
    %17 = vector.extract_strided_slice %8 {offsets = [0, 7], sizes = [16, 256], strides = [1, 1]} : vector<64x384xbf16> to vector<16x256xbf16>
    %18 = tpu.concatenate %9, %10, %11, %12, %13, %14, %15, %16, %17 in 0 : vector<16x256xbf16>, vector<16x256xbf16>, vector<16x256xbf16>, vector<16x256xbf16>, vector<16x256xbf16>, vector<16x256xbf16>, vector<16x256xbf16>, vector<16x256xbf16>, vector<16x256xbf16> -> vector<144x256xbf16>
    %c0_10 = arith.constant 0 : index
    %c0_11 = arith.constant 0 : index
    %c0_12 = arith.constant 0 : index
    %19 = vector.load %arg2[%c0_10, %c0_11, %c0_12] : memref<1x32x144xbf16, #tpu.memory_space<vmem>>, vector<1x32x144xbf16>
    %20 = vector.shape_cast %19 : vector<1x32x144xbf16> to vector<32x144xbf16>
    %cst = arith.constant dense<0.000000e+00> : vector<32x256xf32>
    %21 = tpu.matmul %20, %18, %cst {dimension_numbers = #tpu.dot_dimension_numbers<[1], [0], [0], [1], [0, 0, 1, 1], [], []>} : vector<32x144xbf16>, vector<144x256xbf16>, vector<32x256xf32> -> vector<32x256xf32>
    %22 = vector.broadcast %1 : vector<32x1xf32> to vector<32x256xf32>
    %23 = arith.addf %21, %22 : vector<32x256xf32>
    %24 = vector.extract_strided_slice %23 {offsets = [0, 0], sizes = [16, 256], strides = [1, 1]} : vector<32x256xf32> to vector<16x256xf32>
    %25 = vector.broadcast %0 : vector<1x256xf32> to vector<16x256xf32>
    %26 = arith.mulf %24, %25 : vector<16x256xf32>
    %27 = vector.shape_cast %26 : vector<16x256xf32> to vector<1x16x256xf32>
    %cst_13 = arith.constant dense<0.000000e+00> : vector<1xf32>
    %28 = vector.multi_reduction <add>, %27, %cst_13 [1, 2] : vector<1x16x256xf32> to vector<1xf32>
    %29 = vector.shape_cast %28 : vector<1xf32> to vector<1x1x1xf32>
    %30 = vector.extract %29[0, 0, 0] : f32 from vector<1x1x1xf32>
    %31 = arith.mulf %26, %24 : vector<16x256xf32>
    %32 = vector.shape_cast %31 : vector<16x256xf32> to vector<1x16x256xf32>
    %cst_14 = arith.constant dense<0.000000e+00> : vector<1xf32>
    %33 = vector.multi_reduction <add>, %32, %cst_14 [1, 2] : vector<1x16x256xf32> to vector<1xf32>
    %34 = vector.shape_cast %33 : vector<1xf32> to vector<1x1x1xf32>
    %35 = vector.extract %34[0, 0, 0] : f32 from vector<1x1x1xf32>
    %cst_15 = arith.constant 2.560000e+02 : f32
    %36 = arith.divf %30, %cst_15 : f32
    %cst_16 = arith.constant 2.560000e+02 : f32
    %37 = arith.divf %35, %cst_16 : f32
    %38 = arith.mulf %36, %36 : f32
    %39 = arith.subf %37, %38 : f32
    %cst_17 = arith.constant 0.000000e+00 : f32
    %40 = arith.maximumf %39, %cst_17 : f32
    %cst_18 = arith.constant 9.99999974E-6 : f32
    %41 = arith.addf %40, %cst_18 : f32
    %42 = math.rsqrt %41 : f32
    %43 = vector.extract_strided_slice %23 {offsets = [16, 0], sizes = [16, 256], strides = [1, 1]} : vector<32x256xf32> to vector<16x256xf32>
    %44 = vector.broadcast %0 : vector<1x256xf32> to vector<16x256xf32>
    %45 = arith.mulf %43, %44 : vector<16x256xf32>
    %46 = vector.shape_cast %45 : vector<16x256xf32> to vector<1x16x256xf32>
    %cst_19 = arith.constant dense<0.000000e+00> : vector<1xf32>
    %47 = vector.multi_reduction <add>, %46, %cst_19 [1, 2] : vector<1x16x256xf32> to vector<1xf32>
    %48 = vector.shape_cast %47 : vector<1xf32> to vector<1x1x1xf32>
    %49 = vector.extract %48[0, 0, 0] : f32 from vector<1x1x1xf32>
    %50 = arith.mulf %45, %43 : vector<16x256xf32>
    %51 = vector.shape_cast %50 : vector<16x256xf32> to vector<1x16x256xf32>
    %cst_20 = arith.constant dense<0.000000e+00> : vector<1xf32>
    %52 = vector.multi_reduction <add>, %51, %cst_20 [1, 2] : vector<1x16x256xf32> to vector<1xf32>
    %53 = vector.shape_cast %52 : vector<1xf32> to vector<1x1x1xf32>
    %54 = vector.extract %53[0, 0, 0] : f32 from vector<1x1x1xf32>
    %cst_21 = arith.constant 2.560000e+02 : f32
    %55 = arith.divf %49, %cst_21 : f32
    %cst_22 = arith.constant 2.560000e+02 : f32
    %56 = arith.divf %54, %cst_22 : f32
    %57 = arith.mulf %55, %55 : f32
    %58 = arith.subf %56, %57 : f32
    %cst_23 = arith.constant 0.000000e+00 : f32
    %59 = arith.maximumf %58, %cst_23 : f32
    %cst_24 = arith.constant 9.99999974E-6 : f32
    %60 = arith.addf %59, %cst_24 : f32
    %61 = math.rsqrt %60 : f32
    %62 = vector.broadcast %36 : f32 to vector<32x1xf32>
    %63 = vector.broadcast %55 : f32 to vector<32x1xf32>
    %64 = arith.select %6, %62, %63 : vector<32x1xi1>, vector<32x1xf32>
    %65 = vector.broadcast %42 : f32 to vector<32x1xf32>
    %66 = vector.broadcast %61 : f32 to vector<32x1xf32>
    %67 = arith.select %6, %65, %66 : vector<32x1xi1>, vector<32x1xf32>
    %68 = arith.mulf %67, %2 : vector<32x1xf32>
    %69 = arith.mulf %64, %68 : vector<32x1xf32>
    %70 = arith.subf %3, %69 : vector<32x1xf32>
    %71 = vector.broadcast %68 : vector<32x1xf32> to vector<32x256xf32>
    %72 = arith.mulf %23, %71 : vector<32x256xf32>
    %73 = vector.broadcast %70 : vector<32x1xf32> to vector<32x256xf32>
    %74 = arith.addf %72, %73 : vector<32x256xf32>
    %cst_25 = arith.constant 2.000000e-01 : f32
    %75 = vector.broadcast %cst_25 : f32 to vector<32x256xf32>
    %76 = arith.mulf %75, %74 : vector<32x256xf32>
    %77 = arith.maximumf %74, %76 : vector<32x256xf32>
    %78 = vector.broadcast %0 : vector<1x256xf32> to vector<32x256xf32>
    %79 = arith.mulf %77, %78 : vector<32x256xf32>
    %80 = arith.truncf %79 : vector<32x256xf32> to vector<32x256xbf16>
    %c0_26 = arith.constant 0 : index
    %c0_27 = arith.constant 0 : index
    %c0_28 = arith.constant 0 : index
    %81 = vector.load %arg7[%c0_26, %c0_27, %c0_28] : memref<1x32x256xbf16, #tpu.memory_space<vmem>>, vector<1x32x256xbf16>
    %82 = vector.shape_cast %81 : vector<1x32x256xbf16> to vector<32x256xbf16>
    %83 = vector.shape_cast %80 : vector<32x256xbf16> to vector<1x32x256xbf16>
    tpu.vector_store %arg7[%c0_26, %c0_27, %c0_28], %83 {strides = array<i32>} : memref<1x32x256xbf16, #tpu.memory_space<vmem>>, vector<1x32x256xbf16>,
    return
  }
  func.func @transform_0(%arg0: i32) -> (i32, i32, i32) {
    %c0_i32 = arith.constant 0 : i32
    %c0_i32_0 = arith.constant 0 : i32
    %c0_i32_1 = arith.constant 0 : i32
    return %arg0, %c0_i32, %c0_i32_0 : i32, i32, i32
  }
  func.func @transform_1(%arg0: i32) -> (i32, i32, i32) {
    %c0_i32 = arith.constant 0 : i32
    %c0_i32_0 = arith.constant 0 : i32
    %c0_i32_1 = arith.constant 0 : i32
    %c0_i32_2 = arith.constant 0 : i32
    return %c0_i32, %c0_i32_0, %c0_i32_1 : i32, i32, i32
  }
  func.func @transform_2(%arg0: i32) -> (i32, i32) {
    %c0_i32 = arith.constant 0 : i32
    %c0_i32_0 = arith.constant 0 : i32
    %c0_i32_1 = arith.constant 0 : i32
    return %c0_i32, %c0_i32_0 : i32, i32
  }
  func.func @transform_3(%arg0: i32) -> (i32, i32) {
    %c0_i32 = arith.constant 0 : i32
    %c0_i32_0 = arith.constant 0 : i32
    %c0_i32_1 = arith.constant 0 : i32
    return %c0_i32, %c0_i32_0 : i32, i32
  }
  func.func @transform_4(%arg0: i32) -> (i32, i32) {
    %c0_i32 = arith.constant 0 : i32
    %c0_i32_0 = arith.constant 0 : i32
    %c0_i32_1 = arith.constant 0 : i32
    return %c0_i32, %c0_i32_0 : i32, i32
  }
  func.func @transform_5(%arg0: i32) -> (i32, i32) {
    %c0_i32 = arith.constant 0 : i32
    %c0_i32_0 = arith.constant 0 : i32
    %c0_i32_1 = arith.constant 0 : i32
    return %c0_i32, %c0_i32_0 : i32, i32
  }
  func.func @transform_6(%arg0: i32) -> (i32, i32, i32) {
    %c0_i32 = arith.constant 0 : i32
    %c0_i32_0 = arith.constant 0 : i32
    %c0_i32_1 = arith.constant 0 : i32
    return %arg0, %c0_i32, %c0_i32_0 : i32, i32, i32
  }
}

module attributes {stable_mosaic.version = 11 : i64} {
  func.func @_convsc_kernel(%arg0: i32, %arg1: memref<1x32x256xbf16, #tpu.memory_space<vmem>>, %arg2: memref<1x32x288xbf16, #tpu.memory_space<vmem>>, %arg3: memref<32x1xf32, #tpu.memory_space<vmem>>, %arg4: memref<32x1xf32, #tpu.memory_space<vmem>>, %arg5: memref<32x1xf32, #tpu.memory_space<vmem>>, %arg6: memref<1x128xf32, #tpu.memory_space<vmem>>, %arg7: memref<1x32x128xbf16, #tpu.memory_space<vmem>>) attributes {dimension_semantics = [#tpu.dimension_semantics<parallel>], iteration_bounds = array<i64: 2>, scalar_prefetch = 0 : i64, scratch_operands = 0 : i64, tpu.core_type = #tpu.core_type<tc>, window_params = [{transform_indices = @transform_0, window_bounds = array<i64: 1, 32, 256>}, {pipeline_mode = #tpu.pipeline_mode<synchronous>, transform_indices = @transform_1, window_bounds = array<i64: 1, 32, 288>}, {pipeline_mode = #tpu.pipeline_mode<synchronous>, transform_indices = @transform_2, window_bounds = array<i64: 32, 1>}, {pipeline_mode = #tpu.pipeline_mode<synchronous>, transform_indices = @transform_3, window_bounds = array<i64: 32, 1>}, {pipeline_mode = #tpu.pipeline_mode<synchronous>, transform_indices = @transform_4, window_bounds = array<i64: 32, 1>}, {pipeline_mode = #tpu.pipeline_mode<synchronous>, transform_indices = @transform_5, window_bounds = array<i64: 1, 128>}, {transform_indices = @transform_6, window_bounds = array<i64: 1, 32, 128>}]} {
    %c0 = arith.constant 0 : index
    %c0_0 = arith.constant 0 : index
    %0 = vector.load %arg6[%c0, %c0_0] : memref<1x128xf32, #tpu.memory_space<vmem>>, vector<1x128xf32>
    %c0_1 = arith.constant 0 : index
    %c0_2 = arith.constant 0 : index
    %1 = vector.load %arg3[%c0_1, %c0_2] : memref<32x1xf32, #tpu.memory_space<vmem>>, vector<32x1xf32>
    %c0_3 = arith.constant 0 : index
    %c0_4 = arith.constant 0 : index
    %2 = vector.load %arg4[%c0_3, %c0_4] : memref<32x1xf32, #tpu.memory_space<vmem>>, vector<32x1xf32>
    %c0_5 = arith.constant 0 : index
    %c0_6 = arith.constant 0 : index
    %3 = vector.load %arg5[%c0_5, %c0_6] : memref<32x1xf32, #tpu.memory_space<vmem>>, vector<32x1xf32>
    %4 = tpu.iota {dimensions = array<i32: 0>} : vector<32x1xi32>
    %c16_i32 = arith.constant 16 : i32
    %5 = vector.broadcast %c16_i32 : i32 to vector<32x1xi32>
    %6 = arith.cmpi slt, %4, %5 : vector<32x1xi32>
    %c0_7 = arith.constant 0 : index
    %c0_8 = arith.constant 0 : index
    %c0_9 = arith.constant 0 : index
    %7 = vector.load %arg1[%c0_7, %c0_8, %c0_9] : memref<1x32x256xbf16, #tpu.memory_space<vmem>>, vector<1x32x256xbf16>
    %8 = vector.shape_cast %7 : vector<1x32x256xbf16> to vector<32x256xbf16>
    %9 = vector.extract_strided_slice %8 {offsets = [0, 0], sizes = [32, 128], strides = [1, 1]} : vector<32x256xbf16> to vector<32x128xbf16>
    %10 = vector.extract_strided_slice %8 {offsets = [0, 1], sizes = [32, 128], strides = [1, 1]} : vector<32x256xbf16> to vector<32x128xbf16>
    %11 = vector.extract_strided_slice %8 {offsets = [0, 2], sizes = [32, 128], strides = [1, 1]} : vector<32x256xbf16> to vector<32x128xbf16>
    %12 = vector.extract_strided_slice %8 {offsets = [0, 6], sizes = [32, 128], strides = [1, 1]} : vector<32x256xbf16> to vector<32x128xbf16>
    %13 = vector.extract_strided_slice %8 {offsets = [0, 7], sizes = [32, 128], strides = [1, 1]} : vector<32x256xbf16> to vector<32x128xbf16>
    %14 = vector.extract_strided_slice %8 {offsets = [0, 8], sizes = [32, 128], strides = [1, 1]} : vector<32x256xbf16> to vector<32x128xbf16>
    %15 = vector.extract_strided_slice %8 {offsets = [0, 12], sizes = [32, 128], strides = [1, 1]} : vector<32x256xbf16> to vector<32x128xbf16>
    %16 = vector.extract_strided_slice %8 {offsets = [0, 13], sizes = [32, 128], strides = [1, 1]} : vector<32x256xbf16> to vector<32x128xbf16>
    %17 = vector.extract_strided_slice %8 {offsets = [0, 14], sizes = [32, 128], strides = [1, 1]} : vector<32x256xbf16> to vector<32x128xbf16>
    %18 = tpu.concatenate %9, %10, %11, %12, %13, %14, %15, %16, %17 in 0 : vector<32x128xbf16>, vector<32x128xbf16>, vector<32x128xbf16>, vector<32x128xbf16>, vector<32x128xbf16>, vector<32x128xbf16>, vector<32x128xbf16>, vector<32x128xbf16>, vector<32x128xbf16> -> vector<288x128xbf16>
    %c0_10 = arith.constant 0 : index
    %c0_11 = arith.constant 0 : index
    %c0_12 = arith.constant 0 : index
    %19 = vector.load %arg2[%c0_10, %c0_11, %c0_12] : memref<1x32x288xbf16, #tpu.memory_space<vmem>>, vector<1x32x288xbf16>
    %20 = vector.shape_cast %19 : vector<1x32x288xbf16> to vector<32x288xbf16>
    %cst = arith.constant dense<0.000000e+00> : vector<32x128xf32>
    %21 = tpu.matmul %20, %18, %cst {dimension_numbers = #tpu.dot_dimension_numbers<[1], [0], [0], [1], [0, 0, 1, 1], [], []>} : vector<32x288xbf16>, vector<288x128xbf16>, vector<32x128xf32> -> vector<32x128xf32>
    %22 = vector.broadcast %1 : vector<32x1xf32> to vector<32x128xf32>
    %23 = arith.addf %21, %22 : vector<32x128xf32>
    %24 = vector.extract_strided_slice %23 {offsets = [0, 0], sizes = [16, 128], strides = [1, 1]} : vector<32x128xf32> to vector<16x128xf32>
    %25 = vector.broadcast %0 : vector<1x128xf32> to vector<16x128xf32>
    %26 = arith.mulf %24, %25 : vector<16x128xf32>
    %27 = vector.shape_cast %26 : vector<16x128xf32> to vector<1x16x128xf32>
    %cst_13 = arith.constant dense<0.000000e+00> : vector<1xf32>
    %28 = vector.multi_reduction <add>, %27, %cst_13 [1, 2] : vector<1x16x128xf32> to vector<1xf32>
    %29 = vector.shape_cast %28 : vector<1xf32> to vector<1x1x1xf32>
    %30 = vector.extract %29[0, 0, 0] : f32 from vector<1x1x1xf32>
    %31 = arith.mulf %26, %24 : vector<16x128xf32>
    %32 = vector.shape_cast %31 : vector<16x128xf32> to vector<1x16x128xf32>
    %cst_14 = arith.constant dense<0.000000e+00> : vector<1xf32>
    %33 = vector.multi_reduction <add>, %32, %cst_14 [1, 2] : vector<1x16x128xf32> to vector<1xf32>
    %34 = vector.shape_cast %33 : vector<1xf32> to vector<1x1x1xf32>
    %35 = vector.extract %34[0, 0, 0] : f32 from vector<1x1x1xf32>
    %cst_15 = arith.constant 2.560000e+02 : f32
    %36 = arith.divf %30, %cst_15 : f32
    %cst_16 = arith.constant 2.560000e+02 : f32
    %37 = arith.divf %35, %cst_16 : f32
    %38 = arith.mulf %36, %36 : f32
    %39 = arith.subf %37, %38 : f32
    %cst_17 = arith.constant 0.000000e+00 : f32
    %40 = arith.maximumf %39, %cst_17 : f32
    %cst_18 = arith.constant 9.99999974E-6 : f32
    %41 = arith.addf %40, %cst_18 : f32
    %42 = math.rsqrt %41 : f32
    %43 = vector.extract_strided_slice %23 {offsets = [16, 0], sizes = [16, 128], strides = [1, 1]} : vector<32x128xf32> to vector<16x128xf32>
    %44 = vector.broadcast %0 : vector<1x128xf32> to vector<16x128xf32>
    %45 = arith.mulf %43, %44 : vector<16x128xf32>
    %46 = vector.shape_cast %45 : vector<16x128xf32> to vector<1x16x128xf32>
    %cst_19 = arith.constant dense<0.000000e+00> : vector<1xf32>
    %47 = vector.multi_reduction <add>, %46, %cst_19 [1, 2] : vector<1x16x128xf32> to vector<1xf32>
    %48 = vector.shape_cast %47 : vector<1xf32> to vector<1x1x1xf32>
    %49 = vector.extract %48[0, 0, 0] : f32 from vector<1x1x1xf32>
    %50 = arith.mulf %45, %43 : vector<16x128xf32>
    %51 = vector.shape_cast %50 : vector<16x128xf32> to vector<1x16x128xf32>
    %cst_20 = arith.constant dense<0.000000e+00> : vector<1xf32>
    %52 = vector.multi_reduction <add>, %51, %cst_20 [1, 2] : vector<1x16x128xf32> to vector<1xf32>
    %53 = vector.shape_cast %52 : vector<1xf32> to vector<1x1x1xf32>
    %54 = vector.extract %53[0, 0, 0] : f32 from vector<1x1x1xf32>
    %cst_21 = arith.constant 2.560000e+02 : f32
    %55 = arith.divf %49, %cst_21 : f32
    %cst_22 = arith.constant 2.560000e+02 : f32
    %56 = arith.divf %54, %cst_22 : f32
    %57 = arith.mulf %55, %55 : f32
    %58 = arith.subf %56, %57 : f32
    %cst_23 = arith.constant 0.000000e+00 : f32
    %59 = arith.maximumf %58, %cst_23 : f32
    %cst_24 = arith.constant 9.99999974E-6 : f32
    %60 = arith.addf %59, %cst_24 : f32
    %61 = math.rsqrt %60 : f32
    %62 = vector.broadcast %36 : f32 to vector<32x1xf32>
    %63 = vector.broadcast %55 : f32 to vector<32x1xf32>
    %64 = arith.select %6, %62, %63 : vector<32x1xi1>, vector<32x1xf32>
    %65 = vector.broadcast %42 : f32 to vector<32x1xf32>
    %66 = vector.broadcast %61 : f32 to vector<32x1xf32>
    %67 = arith.select %6, %65, %66 : vector<32x1xi1>, vector<32x1xf32>
    %68 = arith.mulf %67, %2 : vector<32x1xf32>
    %69 = arith.mulf %64, %68 : vector<32x1xf32>
    %70 = arith.subf %3, %69 : vector<32x1xf32>
    %71 = vector.broadcast %68 : vector<32x1xf32> to vector<32x128xf32>
    %72 = arith.mulf %23, %71 : vector<32x128xf32>
    %73 = vector.broadcast %70 : vector<32x1xf32> to vector<32x128xf32>
    %74 = arith.addf %72, %73 : vector<32x128xf32>
    %cst_25 = arith.constant 2.000000e-01 : f32
    %75 = vector.broadcast %cst_25 : f32 to vector<32x128xf32>
    %76 = arith.mulf %75, %74 : vector<32x128xf32>
    %77 = arith.maximumf %74, %76 : vector<32x128xf32>
    %78 = arith.truncf %77 : vector<32x128xf32> to vector<32x128xbf16>
    %c0_26 = arith.constant 0 : index
    %c0_27 = arith.constant 0 : index
    %c0_28 = arith.constant 0 : index
    %79 = vector.load %arg7[%c0_26, %c0_27, %c0_28] : memref<1x32x128xbf16, #tpu.memory_space<vmem>>, vector<1x32x128xbf16>
    %80 = vector.shape_cast %79 : vector<1x32x128xbf16> to vector<32x128xbf16>
    %81 = vector.shape_cast %78 : vector<32x128xbf16> to vector<1x32x128xbf16>
    tpu.vector_store %arg7[%c0_26, %c0_27, %c0_28], %81 {strides = array<i32>} : memref<1x32x128xbf16, #tpu.memory_space<vmem>>, vector<1x32x128xbf16>,
    return
  }
  func.func @transform_0(%arg0: i32) -> (i32, i32, i32) {
    %c0_i32 = arith.constant 0 : i32
    %c0_i32_0 = arith.constant 0 : i32
    %c0_i32_1 = arith.constant 0 : i32
    return %arg0, %c0_i32, %c0_i32_0 : i32, i32, i32
  }
  func.func @transform_1(%arg0: i32) -> (i32, i32, i32) {
    %c0_i32 = arith.constant 0 : i32
    %c0_i32_0 = arith.constant 0 : i32
    %c0_i32_1 = arith.constant 0 : i32
    %c0_i32_2 = arith.constant 0 : i32
    return %c0_i32, %c0_i32_0, %c0_i32_1 : i32, i32, i32
  }
  func.func @transform_2(%arg0: i32) -> (i32, i32) {
    %c0_i32 = arith.constant 0 : i32
    %c0_i32_0 = arith.constant 0 : i32
    %c0_i32_1 = arith.constant 0 : i32
    return %c0_i32, %c0_i32_0 : i32, i32
  }
  func.func @transform_3(%arg0: i32) -> (i32, i32) {
    %c0_i32 = arith.constant 0 : i32
    %c0_i32_0 = arith.constant 0 : i32
    %c0_i32_1 = arith.constant 0 : i32
    return %c0_i32, %c0_i32_0 : i32, i32
  }
  func.func @transform_4(%arg0: i32) -> (i32, i32) {
    %c0_i32 = arith.constant 0 : i32
    %c0_i32_0 = arith.constant 0 : i32
    %c0_i32_1 = arith.constant 0 : i32
    return %c0_i32, %c0_i32_0 : i32, i32
  }
  func.func @transform_5(%arg0: i32) -> (i32, i32) {
    %c0_i32 = arith.constant 0 : i32
    %c0_i32_0 = arith.constant 0 : i32
    %c0_i32_1 = arith.constant 0 : i32
    return %c0_i32, %c0_i32_0 : i32, i32
  }
  func.func @transform_6(%arg0: i32) -> (i32, i32, i32) {
    %c0_i32 = arith.constant 0 : i32
    %c0_i32_0 = arith.constant 0 : i32
    %c0_i32_1 = arith.constant 0 : i32
    return %arg0, %c0_i32, %c0_i32_0 : i32, i32, i32
  }
}

</mosaic_0001>

<bundles_post_ra>
// kernel: encoder_deep_forward.6
= control target key start
LH: loop header
LB: loop body
LE: loop exit
PB: predicated region body
PF: predicated region fallthrough
CT: control target
= control target key end

     0   :  { %s988_s21 = smov 0   ;;  %s1120_s0 = inlined_call_operand.vmem [shape: bf16[2,16,640], index: 0, kind: input, shape index: {}]   ;;  %s1121_s1 = inlined_call_operand.vmem [shape: bf16[1,16,144], index: 1, kind: input, shape index: {}]   ;;  %s1122_s2 = inlined_call_operand.vmem [shape: f32[16,1], index: 2, kind: input, shape index: {}]   ;;  %s1123_s3 = inlined_call_operand.vmem [shape: f32[16,1], index: 3, kind: input, shape index: {}]   ;;  %s1124_s4 = inlined_call_operand.vmem [shape: f32[16,1], index: 4, kind: input, shape index: {}]   ;;  %s1125_s5 = inlined_call_operand.vmem [shape: f32[1,512], index: 5, kind: input, shape index: {}]   ;;  %s1126_s6 = inlined_call_operand.vmem [shape: bf16[2,16,512], index: 6, kind: output, shape index: {}]  }
   0x1 LB: > { %s860_s22 = sadd.s32 4294967295, %s941_s21   ;;  %p864_p0 = scmp.ge.s32.totalorder %s941_s21, 1  ;;  %s941_s21 = sphi %s988_s21, %s16_s21  }
   0x2   : > { %p212_p1 = scmp.lt.s32.totalorder %s941_s21, 3 }
   0x4   : > { %p213_p2 = pnand %p864_p0, %p212_p1 }
   0x5   : > { %p242_p3 = scmp.lt.s32.totalorder (!%p213_p2), %s860_s22, 1  ;;  %s943_s27 = smov (!%p213_p2), 127   ;;  %v930_v5 = vld [vmem:[%s1121_s1 + $0x4] ss:$8 sps:$4 sm:$0xff] (!%p213_p2)   ;;  %vm469_vm0 = vcmask (!%p213_p2), 130048   ;;  %v951_v6 = vmov (!%p213_p2), 0  }
   0x6   : > { %216 = sbr.rel (%p213_p2) target bundleno = 934 (0x3a6), region = 44  ;;  %s944_s28 = smov (!%p213_p2), 126   ;;  %875 = vmatprep.mubr.msk.bf16.mxu0 (!%p213_p2), %vm469_vm0, %v930_v5  ;;  %876 = vmatprep.mubr.msk.bf16.mxu1 (!%p213_p2), %vm469_vm0, %v930_v5  ;;  %v254_v7 = vld [vmem:[%s1122_s2] sm:$0xff] (!%p213_p2)  ;;  %vm306_vm1 = vcmask (!%p213_p2), 1039360   ;;  %vm325_vm2 = vcmask (!%p213_p2), 1031168   ;;  %vm344_vm3 = vcmask (!%p213_p2), 900096  }
   0x7   : > { %s945_s29 = smov (!%p213_p2), 110   ;;  %s946_s30 = smov (!%p213_p2), 109   ;;  %919 = vset.pattern.permute.xlu0 (!%p213_p2), %v951_v6  ;;  %920 = vset.pattern.permute.xlu1 (!%p213_p2), %v951_v6  ;;  %vm363_vm4 = vcmask (!%p213_p2), 891904   ;;  %vm382_vm5 = vcmask (!%p213_p2), 883712   ;;  %vm401_vm6 = vcmask (!%p213_p2), 752640   ;;  %vm420_vm7 = vcmask (!%p213_p2), 744448  }
   0x8   : > { %s947_s7 = smov (!%p213_p2), 108   ;;  %s948_s8 = smov (!%p213_p2), 92   ;;  %vm439_vm8 = vcmask (!%p213_p2), 736256   ;;  %vm584_vm9 = vcmask (!%p213_p2), 1041408  }
   0x9   : > { %s949_s9 = smov (!%p213_p2), 91   ;;  %s950_s12 = smov (!%p213_p2), 90  }
   0xd   : > { %s1128_s22 = smov (!%p242_p3, %s860_s22), 1 }
   0xe   : > { %s888_s23 = smul.u32 40, %s1128_s22 }
  0x10   : > { %s246_s26 = scalar_lea.vmem %s1120_s0, %s888_s23 }
  0x11   : > { %v921_v0 = vld [vmem:[%s246_s26 + $0x4] ss:$20 sps:$4 sm:$0xff]   ;;  %v923_v1 = vld [vmem:[%s246_s26] ss:$20 sps:$4 sm:$0xff]   ;;  %v924_v2 = vld [vmem:[%s246_s26 + $0x8] ss:$20 sps:$4 sm:$0xff]  }
  0x12   : > { %298 = vrot.lane.b32.xlu0 %v921_v0, %s943_s27  ;;  %v926_v3 = vld [vmem:[%s246_s26 + $0xc] ss:$20 sps:$4 sm:$0xff]   ;;  %473 = vmatprep.subr.bf16.mxu0 %v921_v0  ;;  %v927_v4 = vld [vmem:[%s246_s26 + $0x10] ss:$20 sps:$4 sm:$0xff]  }
  0x13   : > { %296 = vrot.lane.b32.xlu1 %v923_v1, %s943_s27  ;;  %474 = vmatpush1.bf16.msra.mxu0 %v923_v1 }
  0x14   : > { %516 = vmatprep.subr.bf16.mxu1 %v926_v3 }
  0x15   : > { %517 = vmatpush1.bf16.msra.mxu1 %v924_v2 }
  0x16   : > { %300 = vrot.lane.b32.xlu0 %v924_v2, %s943_s27 }
  0x17   : > { %302 = vrot.lane.b32.xlu1 %v926_v3, %s943_s27 }
  0x1a   : > { %304 = vrot.lane.b32.xlu0 %v927_v4, %s943_s27 }
  0x1b   : > { %317 = vrot.lane.b32.xlu1 %v921_v0, %s944_s28 }
  0x1e   : > { %319 = vrot.lane.b32.xlu0 %v924_v2, %s944_s28 }
  0x1f   : > { %315 = vrot.lane.b32.xlu1 %v923_v1, %s944_s28 }
  0x22   : > { %321 = vrot.lane.b32.xlu0 %v926_v3, %s944_s28 }
  0x23   : > { %323 = vrot.lane.b32.xlu1 %v927_v4, %s944_s28 }
  0x26   : > { %336 = vrot.lane.b32.xlu0 %v921_v0, %s945_s29 }
  0x27   : > { %338 = vrot.lane.b32.xlu1 %v924_v2, %s945_s29 }
  0x2a   : > { %334 = vrot.lane.b32.xlu0 %v923_v1, %s945_s29 }
  0x2b   : > { %340 = vrot.lane.b32.xlu1 %v926_v3, %s945_s29 }
  0x2e   : > { %342 = vrot.lane.b32.xlu0 %v927_v4, %s945_s29  ;;  %s952_s29 = smov 0.0  }
  0x2f   : > { %355 = vrot.lane.b32.xlu1 %v921_v0, %s946_s30 }
  0x32   : > { %357 = vrot.lane.b32.xlu0 %v924_v2, %s946_s30 }
  0x33   : > { %353 = vrot.lane.b32.xlu1 %v923_v1, %s946_s30 }
  0x36   : > { %359 = vrot.lane.b32.xlu0 %v926_v3, %s946_s30 }
  0x37   : > { %361 = vrot.lane.b32.xlu1 %v927_v4, %s946_s30 }
  0x3a   : > { %374 = vrot.lane.b32.xlu0 %v921_v0, %s947_s7 }
  0x3b   : > { %376 = vrot.lane.b32.xlu1 %v924_v2, %s947_s7 }
  0x3e   : > { %372 = vrot.lane.b32.xlu0 %v923_v1, %s947_s7 }
  0x3f   : > { %378 = vrot.lane.b32.xlu1 %v926_v3, %s947_s7 }
  0x42   : > { %380 = vrot.lane.b32.xlu0 %v927_v4, %s947_s7 }
  0x43   : > { %393 = vrot.lane.b32.xlu1 %v921_v0, %s948_s8 }
  0x46   : > { %395 = vrot.lane.b32.xlu0 %v924_v2, %s948_s8 }
  0x47   : > { %391 = vrot.lane.b32.xlu1 %v923_v1, %s948_s8 }
  0x4a   : > { %397 = vrot.lane.b32.xlu0 %v926_v3, %s948_s8 }
  0x4b   : > { %399 = vrot.lane.b32.xlu1 %v927_v4, %s948_s8 }
  0x4e   : > { %412 = vrot.lane.b32.xlu0 %v921_v0, %s949_s9 }
  0x4f   : > { %414 = vrot.lane.b32.xlu1 %v924_v2, %s949_s9 }
  0x52   : > { %410 = vrot.lane.b32.xlu0 %v923_v1, %s949_s9 }
  0x53   : > { %416 = vrot.lane.b32.xlu1 %v926_v3, %s949_s9 }
  0x56   : > { %418 = vrot.lane.b32.xlu0 %v927_v4, %s949_s9 }
  0x57   : > { %431 = vrot.lane.b32.xlu1 %v921_v0, %s950_s12 }
  0x5a   : > { %433 = vrot.lane.b32.xlu0 %v924_v2, %s950_s12 }
  0x5b   : > { %429 = vrot.lane.b32.xlu1 %v923_v1, %s950_s12 }
  0x5e   : > { %435 = vrot.lane.b32.xlu0 %v926_v3, %s950_s12 }
  0x5f   : > { %437 = vrot.lane.b32.xlu1 %v927_v4, %s950_s12 }
  0x62   : > { %452 = vperm.xlu0 %919, %v254_v7  }
  0x84   : > { %v299_v8 = vpop.permute.xlu0 %298 }
  0x85   : > { %v297_v9 = vpop.permute.xlu1 %296 }
  0x86   : > { %v307_v13 = vsel %vm306_vm1, %v297_v9, %v299_v8 }
  0x88   : > { %v301_v10 = vpop.permute.xlu0 %300 }
  0x89   : > { %v303_v11 = vpop.permute.xlu1 %302  ;;  %v308_v12 = vsel %vm306_vm1, %v299_v8, %v301_v10 }
  0x8a   : > { %475 = vmatprep.subr.bf16.mxu0 %v308_v12  ;;  %v309_v17 = vsel %vm306_vm1, %v301_v10, %v303_v11  ;;  %v928_v12 = vld [vmem:[%s1121_s1] ss:$8 sps:$4 sm:$0xff]  }
  0x8b   : > { %476 = vmatpush1.bf16.msra.mxu0 %v307_v13 }
  0x8c   : > { %v305_v14 = vpop.permute.xlu0 %304 }
  0x8d   : > { %v318_v15 = vpop.permute.xlu1 %317  ;;  %v310_v16 = vsel %vm306_vm1, %v303_v11, %v305_v14 }
  0x8e   : > { %518 = vmatprep.subr.bf16.mxu1 %v310_v16 }
  0x8f   : > { %519 = vmatpush1.bf16.msra.mxu1 %v309_v17  ;;  %v260_v17 = vlaneseq }
  0x90   : > { %v320_v18 = vpop.permute.xlu0 %319 }
  0x91   : > { %v316_v19 = vpop.permute.xlu1 %315  ;;  %v327_v20 = vsel %vm325_vm2, %v318_v15, %v320_v18 }
  0x92   : > { %477 = vmatprep.subr.bf16.mxu0 %v327_v20  ;;  %v326_v21 = vsel %vm325_vm2, %v316_v19, %v318_v15  ;;  %v253_v20 = vld [vmem:[%s1125_s5] sm:$0xf] }
  0x93   : > { %478 = vmatpush1.bf16.msra.mxu0 %v326_v21 }
  0x94   : > { %v322_v22 = vpop.permute.xlu0 %321 }
  0x95   : > { %v324_v23 = vpop.permute.xlu1 %323  ;;  %v328_v24 = vsel %vm325_vm2, %v320_v18, %v322_v22  ;;  %v1011_v18 = vshrl.u32 %v260_v17, 7 }
  0x96   : > { %v329_v25 = vsel %vm325_vm2, %v322_v22, %v324_v23 }
  0x97   : > { %520 = vmatprep.subr.bf16.mxu1 %v329_v25  ;;  %v562_v19 = vsub.s32 0, %v1011_v18  ;;  %v566_v21 = vsub.s32 1, %v1011_v18  ;;  %vm263_vm10 = vcmp.lt.s32.totalorder %v1011_v18, 2 }
  0x98   : > { %521 = vmatpush1.bf16.msra.mxu1 %v328_v24  ;;  %v337_v26 = vpop.permute.xlu0 %336 }
  0x99   : > { %v339_v27 = vpop.permute.xlu1 %338  ;;  %v1018_v23 = vrot.slane %v253_v20, %v562_v19  ;;  %v1020_v25 = vrot.slane %v253_v20, %v566_v21 }
  0x9a   : > { %v346_v28 = vsel %vm344_vm3, %v337_v26, %v339_v27 }
  0x9b   : > { %479 = vmatprep.subr.bf16.mxu0 %v346_v28 }
  0x9c   : > { %v335_v29 = vpop.permute.xlu0 %334 }
  0x9d   : > { %v341_v30 = vpop.permute.xlu1 %340  ;;  %v345_v31 = vsel %vm344_vm3, %v335_v29, %v337_v26  ;;  %v570_v26 = vsub.s32 2, %v1011_v18  ;;  %v574_v29 = vsub.s32 3, %v1011_v18 }
  0x9e   : > { %480 = vmatpush1.bf16.msra.mxu0 %v345_v31  ;;  %v347_v35 = vsel %vm344_vm3, %v339_v27, %v341_v30 }
  0xa0   : > { %v343_v32 = vpop.permute.xlu0 %342 }
  0xa1   : > { %v356_v33 = vpop.permute.xlu1 %355  ;;  %v348_v34 = vsel %vm344_vm3, %v341_v30, %v343_v32 }
  0xa2   : > { %522 = vmatprep.subr.bf16.mxu1 %v348_v34 }
  0xa3   : > { %523 = vmatpush1.bf16.msra.mxu1 %v347_v35  ;;  %v1036_v35 = vrot.slane %v253_v20, %v570_v26 }
  0xa4   : > { %v358_v36 = vpop.permute.xlu0 %357 }
  0xa5   : > { %v354_v37 = vpop.permute.xlu1 %353  ;;  %v365_v38 = vsel %vm363_vm4, %v356_v33, %v358_v36 }
  0xa6   : > { %481 = vmatprep.subr.bf16.mxu0 %v365_v38  ;;  %v364_v39 = vsel %vm363_vm4, %v354_v37, %v356_v33  ;;  %v1039_v38 = vrot.slane %v253_v20, %v574_v29 }
  0xa7   : > { %482 = vmatpush1.bf16.msra.mxu0 %v364_v39 }
  0xa8   : > { %v360_v40 = vpop.permute.xlu0 %359 }
  0xa9   : > { %v362_v41 = vpop.permute.xlu1 %361  ;;  %v366_v42 = vsel %vm363_vm4, %v358_v36, %v360_v40 }
  0xaa   : > { %v367_v43 = vsel %vm363_vm4, %v360_v40, %v362_v41 }
  0xab   : > { %524 = vmatprep.subr.bf16.mxu1 %v367_v43 }
  0xac   : > { %525 = vmatpush1.bf16.msra.mxu1 %v366_v42  ;;  %v375_v44 = vpop.permute.xlu0 %374 }
  0xad   : > { %v377_v45 = vpop.permute.xlu1 %376 }
  0xae   : > { %v384_v46 = vsel %vm382_vm5, %v375_v44, %v377_v45 }
  0xaf   : > { %483 = vmatprep.subr.bf16.mxu0 %v384_v46 }
  0xb0   : > { %v373_v47 = vpop.permute.xlu0 %372 }
  0xb1   : > { %v379_v48 = vpop.permute.xlu1 %378  ;;  %v383_v49 = vsel %vm382_vm5, %v373_v47, %v375_v44 }
  0xb2   : > { %484 = vmatpush1.bf16.msra.mxu0 %v383_v49  ;;  %v385_v53 = vsel %vm382_vm5, %v377_v45, %v379_v48 }
  0xb4   : > { %v381_v50 = vpop.permute.xlu0 %380 }
  0xb5   : > { %v394_v51 = vpop.permute.xlu1 %393  ;;  %v386_v52 = vsel %vm382_vm5, %v379_v48, %v381_v50 }
  0xb6   : > { %526 = vmatprep.subr.bf16.mxu1 %v386_v52 }
  0xb7   : > { %527 = vmatpush1.bf16.msra.mxu1 %v385_v53 }
  0xb8   : > { %v396_v54 = vpop.permute.xlu0 %395 }
  0xb9   : > { %v392_v55 = vpop.permute.xlu1 %391  ;;  %v403_v56 = vsel %vm401_vm6, %v394_v51, %v396_v54 }
  0xba   : > { %485 = vmatprep.subr.bf16.mxu0 %v403_v56  ;;  %v402_v57 = vsel %vm401_vm6, %v392_v55, %v394_v51 }
  0xbb   : > { %486 = vmatpush1.bf16.msra.mxu0 %v402_v57 }
  0xbc   : > { %v398_v58 = vpop.permute.xlu0 %397 }
  0xbd   : > { %v400_v59 = vpop.permute.xlu1 %399  ;;  %v404_v60 = vsel %vm401_vm6, %v396_v54, %v398_v58 }
  0xbe   : > { %v405_v61 = vsel %vm401_vm6, %v398_v58, %v400_v59 }
  0xbf   : > { %528 = vmatprep.subr.bf16.mxu1 %v405_v61 }
  0xc0   : > { %529 = vmatpush1.bf16.msra.mxu1 %v404_v60  ;;  %v413_v62 = vpop.permute.xlu0 %412 }
  0xc1   : > { %v415_v63 = vpop.permute.xlu1 %414 }
  0xc2   : > { %v422_v0 = vsel %vm420_vm7, %v413_v62, %v415_v63 }
  0xc3   : > { %487 = vmatprep.subr.bf16.mxu0 %v422_v0 }
  0xc4   : > { %v411_v1 = vpop.permute.xlu0 %410 }
  0xc5   : > { %v417_v2 = vpop.permute.xlu1 %416  ;;  %v421_v3 = vsel %vm420_vm7, %v411_v1, %v413_v62 }
  0xc6   : > { %488 = vmatpush1.bf16.msra.mxu0 %v421_v3  ;;  %v423_v7 = vsel %vm420_vm7, %v415_v63, %v417_v2 }
  0xc8   : > { %v419_v4 = vpop.permute.xlu0 %418 }
  0xc9   : > { %v432_v5 = vpop.permute.xlu1 %431  ;;  %v424_v6 = vsel %vm420_vm7, %v417_v2, %v419_v4 }
  0xca   : > { %530 = vmatprep.subr.bf16.mxu1 %v424_v6 }
  0xcb   : > { %531 = vmatpush1.bf16.msra.mxu1 %v423_v7 }
  0xcc   : > { %v434_v8 = vpop.permute.xlu0 %433 }
  0xcd   : > { %v430_v9 = vpop.permute.xlu1 %429  ;;  %v441_v10 = vsel %vm439_vm8, %v432_v5, %v434_v8 }
  0xce   : > { %489 = vmatprep.subr.bf16.mxu0 %v441_v10  ;;  %v440_v11 = vsel %vm439_vm8, %v430_v9, %v432_v5 }
  0xcf   : > { %490 = vmatpush1.bf16.msra.mxu0 %v440_v11 }
  0xd0   : > { %v436_v13 = vpop.permute.xlu0 %435 }
  0xd1   : > { %v438_v14 = vpop.permute.xlu1 %437  ;;  %v442_v15 = vsel %vm439_vm8, %v434_v8, %v436_v13 }
  0xd2   : > { %506 = vmatmul.mubr.bf16.vlgmr.msra.gmra.mrb[0].mxu0 %v928_v12  ;;  %v443_v16 = vsel %vm439_vm8, %v436_v13, %v438_v14 }
  0xd3   : > { %532 = vmatprep.subr.bf16.mxu1 %v443_v16 }
  0xd4   : > { %533 = vmatpush1.bf16.msra.mxu1 %v442_v15 }
  0xd7   : > { %549 = vmatmul.mubr.bf16.vlgmr.msra.gmra.mrb[0].mxu1 %v928_v12 }
  0xe1   : > { %v453_v22 = vpop.permute.xlu0 %452 }
 0x1a5   : > { %v507_v24 = vpop.f32.mrb[0].mxu0 }
 0x1a6   : > { %v1023_v27 = vadd.f32 %v507_v24, %v453_v22  ;;  %v509_v28 = vpop.f32.mrb[1].mxu0 }
 0x1a7   : > { %v1026_v30 = vadd.f32 %v509_v28, %v453_v22  ;;  %v1028_v31 = vpop.f32.mrb[2].mxu0 }
 0x1a8   : > { %v580_v32 = vmul.f32 %v1018_v23, %v1023_v27  ;;  %v1032_v33 = vpop.f32.mrb[3].mxu0 }
 0x1a9   : > { %v581_v34 = vmul.f32 %v1020_v25, %v1026_v30 }
 0x1aa   : > { %v601_v36 = vmul.f32 %v580_v32, %v1023_v27  ;;  %v550_v37 = vpop.f32.mrb[0].mxu1  ;;  %v585_v39 = vsel %vm584_vm9, %v580_v32, 0.0  ;;  %v638_v40 = vrot.slane %v580_v32, 2 }
 0x1ab   : > { %v602_v41 = vmul.f32 %v581_v34, %v1026_v30  ;;  %v1043_v42 = vadd.f32 %v550_v37, %v453_v22  ;;  %v552_v43 = vpop.f32.mrb[1].mxu1  ;;  %v586_v44 = vsel %vm584_vm9, %v581_v34, 0.0  ;;  %v639_v45 = vrot.slane %v581_v34, 2 }
 0x1ac   : > { %v666_v46 = vrot.slane %v601_v36, 2  ;;  %v1046_v47 = vadd.f32 %v552_v43, %v453_v22  ;;  %v1048_v48 = vpop.f32.mrb[2].mxu1  ;;  %v587_v49 = vadd.f32 %v586_v44, %v585_v39  ;;  %v605_v50 = vsel %vm584_vm9, %v601_v36, 0.0  ;;  %v255_v22 = vld [vmem:[%s1122_s2 + $0x8] sm:$0xff] }
 0x1ad   : > { %v667_v51 = vrot.slane %v602_v41, 2  ;;  %v582_v52 = vmul.f32 %v1036_v35, %v1043_v42  ;;  %v1053_v53 = vpop.f32.mrb[3].mxu1  ;;  %v606_v54 = vsel %vm584_vm9, %v602_v41, 0.0  ;;  %v646_v55 = vsel %vm584_vm9, %v638_v40, 0.0 }
 0x1ae   : > { %v583_v56 = vmul.f32 %v1039_v38, %v1046_v47  ;;  %v607_v57 = vadd.f32 %v606_v54, %v605_v50  ;;  %v647_v58 = vsel %vm584_vm9, %v639_v45, 0.0  ;;  %v674_v59 = vsel %vm584_vm9, %v666_v46, 0.0 }
 0x1af   : > { %v603_v60 = vmul.f32 %v582_v52, %v1043_v42  ;;  %v588_v61 = vsel %vm584_vm9, %v582_v52, 0.0  ;;  %v640_v62 = vrot.slane %v582_v52, 2  ;;  %v648_v63 = vadd.f32 %v647_v58, %v646_v55 }
 0x1b0   : > { %v589_v0 = vadd.f32 %v588_v61, %v587_v49  ;;  %v590_v1 = vsel %vm584_vm9, %v583_v56, 0.0  ;;  %v604_v2 = vmul.f32 %v583_v56, %v1046_v47  ;;  %v641_v3 = vrot.slane %v583_v56, 2 }
 0x1b1   : > { %v608_v4 = vsel %vm584_vm9, %v603_v60, 0.0  ;;  %v649_v5 = vsel %vm584_vm9, %v640_v62, 0.0  ;;  %v668_v6 = vrot.slane %v603_v60, 2  ;;  %v675_v7 = vsel %vm584_vm9, %v667_v51, 0.0 }
 0x1b2   : > { %v591_v8 = vadd.f32 %v590_v1, %v589_v0  ;;  %v609_v9 = vadd.f32 %v608_v4, %v607_v57  ;;  %v610_v10 = vsel %vm584_vm9, %v604_v2, 0.0  ;;  %v650_v11 = vadd.f32 %v649_v5, %v648_v63 }
 0x1b3   : > { %v651_v12 = vsel %vm584_vm9, %v641_v3, 0.0  ;;  %v669_v13 = vrot.slane %v604_v2, 2  ;;  %v676_v14 = vadd.f32 %v675_v7, %v674_v59  ;;  %v677_v15 = vsel %vm584_vm9, %v668_v6, 0.0  ;;  %v257_v6 = vld [vmem:[%s1123_s3 + $0x8] sm:$0xff]  ;;  %v256_v7 = vld [vmem:[%s1123_s3] sm:$0xff] }
 0x1b4   : > { %592 = vadd.xlane.f32.xlu1 %v591_v8  ;;  %v611_v16 = vadd.f32 %v610_v10, %v609_v9  ;;  %v652_v20 = vadd.f32 %v651_v12, %v650_v11 }
 0x1b5   : > { %v678_v17 = vadd.f32 %v677_v15, %v676_v14  ;;  %v679_v19 = vsel %vm584_vm9, %v669_v13, 0.0  ;;  %v259_v13 = vld [vmem:[%s1124_s4 + $0x8] sm:$0xff]  ;;  %v258_v15 = vld [vmem:[%s1124_s4] sm:$0xff] }
 0x1b6   : > { %612 = vadd.xlane.f32.xlu0 %v611_v16 }
 0x1b7   : > { %v680_v21 = vadd.f32 %v679_v19, %v678_v17 }
 0x1b8   : > { %653 = vadd.xlane.f32.xlu1 %v652_v20 }
 0x1ba   : > { %681 = vadd.xlane.f32.xlu0 %v680_v21 }
 0x1c9   : > { %457 = vperm.xlu1 %920, %v255_v22  }
 0x241   : > { %v593_v24 = vpop.xlane.xlu1 %592 }
 0x242   : > { %v594_v26 = vrot.slane %v593_v24, 4 }
 0x243   : > { %v613_v28 = vpop.xlane.xlu0 %612 }
 0x244   : > { %v595_v29 = vadd.f32 %v594_v26, %v593_v24  ;;  %v614_v32 = vrot.slane %v613_v28, 4 }
 0x245   : > { %v654_v46 = vpop.xlane.xlu1 %653 }
 0x246   : > { %v596_v34 = vrot.slane %v595_v29, 2  ;;  %v615_v36 = vadd.f32 %v614_v32, %v613_v28  ;;  %v655_v50 = vrot.slane %v654_v46, 4 }
 0x247   : > { %v682_v49 = vpop.xlane.xlu0 %681 }
 0x248   : > { %v616_v37 = vrot.slane %v615_v36, 2  ;;  %v597_v39 = vadd.f32 %v596_v34, %v595_v29  ;;  %v683_v51 = vrot.slane %v682_v49, 4  ;;  %v656_v52 = vadd.f32 %v655_v50, %v654_v46 }
 0x249   : > { %v458_v18 = vpop.permute.xlu1 %457 }
 0x24a   : > { %v598_v40 = vrot.slane %v597_v39, 1  ;;  %v617_v41 = vadd.f32 %v616_v37, %v615_v36  ;;  %v684_v54 = vadd.f32 %v683_v51, %v682_v49  ;;  %v657_v55 = vrot.slane %v656_v52, 2 }
 0x24b   : > { %v512_v22 = vadd.f32 %v1028_v31, %v458_v18  ;;  %v514_v24 = vadd.f32 %v1032_v33, %v458_v18  ;;  %v555_v26 = vadd.f32 %v1048_v48, %v458_v18  ;;  %v557_v28 = vadd.f32 %v1053_v53, %v458_v18 }
 0x24c   : > { %v599_v43 = vadd.f32 %v598_v40, %v597_v39  ;;  %v618_v44 = vrot.slane %v617_v41, 1  ;;  %v685_v56 = vrot.slane %v684_v54, 2  ;;  %v658_v58 = vadd.f32 %v657_v55, %v656_v52 }
 0x24e   : > { %889 = vpush %v599_v43  ;;  %v619_v45 = vadd.f32 %v618_v44, %v617_v41  ;;  %v686_v59 = vadd.f32 %v685_v56, %v684_v54  ;;  %v659_v60 = vrot.slane %v658_v58, 1 }
 0x250   : > { %891 = vpush %v619_v45  ;;  %v687_v61 = vrot.slane %v686_v59, 1  ;;  %v660_v63 = vadd.f32 %v659_v60, %v658_v58 }
 0x252   : > { %v688_v0 = vadd.f32 %v687_v61, %v686_v59 }
 0x27f   : > { %s890_s23 = spop %889 }
 0x280   : > { %s1075_s24 = smul.f32 0.001953125, %s890_s23 }
 0x281   : > { %s892_s25 = spop %891 }
 0x282   : > { %s627_s26 = smul.f32 %s1075_s24, %s1075_s24  ;;  %v703_v1 = vstv %s1075_s24 }
 0x283   : > { %s626_s27 = smul.f32 0.001953125, %s892_s25 }
 0x285   : > { %s628_s28 = ssub.f32 %s626_s27, %s627_s26 }
 0x287   : > { %s629_s30 = smax.f32 %s952_s29, %s628_s28  ;;  %s883_s28 = sshll.u32 %s1128_s22, 5 }
 0x288   : > { %s630_s7 = sadd.f32 1e-05, %s629_s30 }
 0x28a   : > { %v631_v57 = vstv %s630_s7  ;;  %s251_s7 = scalar_lea.vmem %s1126_s6, %s883_s28 }
 0x28b   : > { %931 = vrsqrt.f32 %v631_v57 }
 0x295   : > { %v932_v62 = vpop.eup %931 }
 0x296   : > { %893 = vpush %v932_v62 }
 0x297   : > { %895 = vpush %v660_v63 }
 0x298   : > { %897 = vpush %v688_v0 }
 0x2c7   : > { %s894_s8 = spop %893 }
 0x2c8   : > { %s896_s9 = spop %895  ;;  %v707_v8 = vstv %s894_s8 }
 0x2c9   : > { %s692_s10 = smul.f32 0.001953125, %s896_s9  ;;  %s898_s11 = spop %897 }
 0x2ca   : > { %s695_s12 = smul.f32 0.001953125, %s898_s11 }
 0x2cb   : > { %s696_s13 = smul.f32 %s692_s10, %s692_s10  ;;  %v704_v2 = vstv %s692_s10 }
 0x2cc   : > { %v705_v3 = vsel %vm263_vm10, %v703_v1, %v704_v2 }
 0x2cd   : > { %s697_s14 = ssub.f32 %s695_s12, %s696_s13 }
 0x2cf   : > { %s698_s15 = smax.f32 %s952_s29, %s697_s14 }
 0x2d0   : > { %s699_s16 = sadd.f32 1e-05, %s698_s15 }
 0x2d2   : > { %v700_v4 = vstv %s699_s16 }
 0x2d3   : > { %933 = vrsqrt.f32 %v700_v4 }
 0x2dd   : > { %v934_v5 = vpop.eup %933 }
 0x2de   : > { %899 = vpush %v934_v5 }
 0x30f   : > { %s900_s23 = spop %899 }
 0x310   : > { %v708_v9 = vstv %s900_s23 }
 0x311   : > { %v709_v10 = vsel %vm263_vm10, %v707_v8, %v708_v9  ;;  %v712_v11 = vmul.f32 %v708_v9, %v257_v6 }
 0x312   : > { %v711_v12 = vmul.f32 %v709_v10, %v256_v7 }
 0x313   : > { %v714_v14 = vmul.f32 %v712_v11, %v704_v2  ;;  %724 = vperm.xlu1 %920, %v712_v11  }
 0x314   : > { %v713_v16 = vmul.f32 %v711_v12, %v705_v3  ;;  %719 = vperm.xlu0 %919, %v711_v12  }
 0x315   : > { %v716_v17 = vsub.f32 %v259_v13, %v714_v14 }
 0x316   : > { %v715_v19 = vsub.f32 %v258_v15, %v713_v16 }
 0x318   : > { %742 = vperm.xlu0 %919, %v716_v17   ;;  %737 = vperm.xlu1 %920, %v715_v19  }
 0x392   : > { %v725_v20 = vpop.permute.xlu1 %724 }
 0x393   : > { %v720_v21 = vpop.permute.xlu0 %719  ;;  %v731_v29 = vmul.f32 %v725_v20, %v512_v22  ;;  %v732_v32 = vmul.f32 %v725_v20, %v514_v24  ;;  %v733_v34 = vmul.f32 %v725_v20, %v555_v26  ;;  %v734_v36 = vmul.f32 %v725_v20, %v557_v28 }
 0x394   : > { %v727_v39 = vmul.f32 %v720_v21, %v1023_v27  ;;  %v728_v40 = vmul.f32 %v720_v21, %v1026_v30  ;;  %v729_v41 = vmul.f32 %v720_v21, %v1043_v42  ;;  %v730_v43 = vmul.f32 %v720_v21, %v1046_v47 }
 0x397   : > { %v743_v37 = vpop.permute.xlu0 %742  ;;  %v738_v31 = vpop.permute.xlu1 %737 }
 0x398   : > { %v749_v33 = vadd.f32 %v743_v37, %v731_v29  ;;  %v750_v44 = vadd.f32 %v743_v37, %v732_v32  ;;  %v751_v48 = vadd.f32 %v743_v37, %v733_v34  ;;  %v752_v45 = vadd.f32 %v743_v37, %v734_v36 }
 0x399   : > { %v745_v53 = vadd.f32 %v738_v31, %v727_v39  ;;  %v746_v46 = vadd.f32 %v738_v31, %v728_v40  ;;  %v747_v49 = vadd.f32 %v738_v31, %v729_v41  ;;  %v748_v50 = vadd.f32 %v738_v31, %v730_v43 }
 0x39a   : > { %v757_v51 = vmul.f32 0.2, %v749_v33  ;;  %v758_v52 = vmul.f32 0.2, %v750_v44  ;;  %v759_v54 = vmul.f32 0.2, %v751_v48 }
 0x39b   : > { %v760_v27 = vmul.f32 0.2, %v752_v45  ;;  %v753_v55 = vmul.f32 0.2, %v745_v53  ;;  %v754_v30 = vmul.f32 0.2, %v746_v46 }
 0x39c   : > { %v765_v42 = vmax.f32 %v749_v33, %v757_v51  ;;  %v766_v56 = vmax.f32 %v750_v44, %v758_v52  ;;  %v767_v47 = vmax.f32 %v751_v48, %v759_v54  ;;  %v755_v57 = vmul.f32 0.2, %v747_v49 }
 0x39d   : > { %v768_v58 = vmax.f32 %v752_v45, %v760_v27  ;;  %v756_v59 = vmul.f32 0.2, %v748_v50  ;;  %v761_v60 = vmax.f32 %v745_v53, %v753_v55  ;;  %v762_v61 = vmax.f32 %v746_v46, %v754_v30 }
 0x39e   : > { %v773_v62 = vmul.f32 %v765_v42, %v1018_v23  ;;  %v774_v63 = vmul.f32 %v766_v56, %v1020_v25  ;;  %v775_v0 = vmul.f32 %v767_v47, %v1036_v35  ;;  %v763_v1 = vmax.f32 %v747_v49, %v755_v57 }
 0x39f   : > { %v776_v2 = vmul.f32 %v768_v58, %v1039_v38  ;;  %v764_v3 = vmax.f32 %v748_v50, %v756_v59  ;;  %v769_v4 = vmul.f32 %v761_v60, %v1018_v23  ;;  %v770_v5 = vmul.f32 %v762_v61, %v1020_v25 }
 0x3a0   : > { %v886_v6 = vpack.c.bf16 %v774_v63, %v773_v62  ;;  %v771_v7 = vmul.f32 %v763_v1, %v1036_v35 }
 0x3a1   : > { %v887_v8 = vpack.c.bf16 %v776_v2, %v775_v0  ;;  %v772_v9 = vmul.f32 %v764_v3, %v1039_v38  ;;  %v884_v10 = vpack.c.bf16 %v770_v5, %v769_v4 }
 0x3a2   : > { %803 = vst [vmem:[%s251_s7 + $0x10] sm:$0xff] %v886_v6 }
 0x3a3   : > { %804 = vst [vmem:[%s251_s7 + $0x18] sm:$0xff] %v887_v8  ;;  %v885_v11 = vpack.c.bf16 %v772_v9, %v771_v7  ;;  %801 = vst [vmem:[%s251_s7] sm:$0xff] %v884_v10 }
 0x3a5   : > { %802 = vst [vmem:[%s251_s7 + $0x8] sm:$0xff] %v885_v11 }
 0x3a6 PF: > { %s16_s21 = sadd.s32 1, %s941_s21  }
 0x3a7   : > { %p13_p4 = scmp.ge.s32.totalorder %s16_s21, 4  }
 0x3a9   :  { %15 = sbr.rel (!%p13_p4) target bundleno = 1 (0x1), region = 74 }

// kernel: encoder_deep_forward.7
= control target key start
LH: loop header
LB: loop body
LE: loop exit
PB: predicated region body
PF: predicated region fallthrough
CT: control target
= control target key end

     0   :  { %s903_s21 = smov 0   ;;  %s1013_s0 = inlined_call_operand.vmem [shape: bf16[2,16,512], index: 0, kind: input, shape index: {}]   ;;  %s1014_s1 = inlined_call_operand.vmem [shape: bf16[1,16,144], index: 1, kind: input, shape index: {}]   ;;  %s1015_s2 = inlined_call_operand.vmem [shape: f32[16,1], index: 2, kind: input, shape index: {}]   ;;  %s1016_s3 = inlined_call_operand.vmem [shape: f32[16,1], index: 3, kind: input, shape index: {}]   ;;  %s1017_s4 = inlined_call_operand.vmem [shape: f32[16,1], index: 4, kind: input, shape index: {}]   ;;  %s1018_s5 = inlined_call_operand.vmem [shape: f32[1,384], index: 5, kind: input, shape index: {}]   ;;  %s1019_s6 = inlined_call_operand.vmem [shape: bf16[2,16,384], index: 6, kind: output, shape index: {}]  }
   0x1 LB: > { %s777_s22 = sadd.s32 4294967295, %s856_s21   ;;  %p781_p0 = scmp.ge.s32.totalorder %s856_s21, 1  ;;  %s856_s21 = sphi %s903_s21, %s16_s21  }
   0x2   : > { %p212_p1 = scmp.lt.s32.totalorder %s856_s21, 3 }
   0x4   : > { %p213_p2 = pnand %p781_p0, %p212_p1 }
   0x5   : > { %p242_p3 = scmp.lt.s32.totalorder (!%p213_p2), %s777_s22, 1  ;;  %v858_v0 = vmov (!%p213_p2), 0   ;;  %s859_s27 = smov (!%p213_p2), 127   ;;  %v845_v5 = vld [vmem:[%s1014_s1 + $0x4] ss:$8 sps:$4 sm:$0xff] (!%p213_p2)   ;;  %vm429_vm0 = vcmask (!%p213_p2), 130048  }
   0x6   : > { %216 = sbr.rel (%p213_p2) target bundleno = 912 (0x390), region = 44  ;;  %476 = vmatprep.subr.bf16.mxu1 (!%p213_p2), %v858_v0  ;;  %835 = vset.pattern.permute.xlu0 (!%p213_p2), %v858_v0  ;;  %s860_s28 = smov (!%p213_p2), 126   ;;  %v254_v6 = vld [vmem:[%s1015_s2] sm:$0xff] (!%p213_p2)  ;;  %vm296_vm1 = vcmask (!%p213_p2), 1039360   ;;  %vm311_vm2 = vcmask (!%p213_p2), 1031168   ;;  %vm326_vm3 = vcmask (!%p213_p2), 900096  }
   0x7   : > { %836 = vset.pattern.permute.xlu1 (!%p213_p2), %v858_v0  ;;  %s861_s29 = smov (!%p213_p2), 110   ;;  %s862_s30 = smov (!%p213_p2), 109   ;;  %791 = vmatprep.mubr.msk.bf16.mxu0 (!%p213_p2), %vm429_vm0, %v845_v5  ;;  %vm341_vm4 = vcmask (!%p213_p2), 891904   ;;  %vm356_vm5 = vcmask (!%p213_p2), 883712   ;;  %vm371_vm6 = vcmask (!%p213_p2), 752640   ;;  %vm386_vm7 = vcmask (!%p213_p2), 744448  }
   0x8   : > { %s863_s7 = smov (!%p213_p2), 108   ;;  %s864_s8 = smov (!%p213_p2), 92   ;;  %792 = vmatprep.mubr.msk.bf16.mxu1 (!%p213_p2), %vm429_vm0, %v845_v5  ;;  %vm401_vm8 = vcmask (!%p213_p2), 736256   ;;  %v843_v62 = vld [vmem:[%s1014_s1] ss:$8 sps:$4 sm:$0xff] (!%p213_p2)   ;;  %vm536_vm9 = vcmask (!%p213_p2), 1043456  }
   0x9   : > { %s865_s9 = smov (!%p213_p2), 91   ;;  %s866_s12 = smov (!%p213_p2), 90  }
   0xd   : > { %s1021_s22 = smov (!%p242_p3, %s777_s22), 1 }
   0xe   : > { %s799_s23 = sshll.u32 %s1021_s22, 5 }
   0xf   : > { %s246_s26 = scalar_lea.vmem %s1013_s0, %s799_s23 }
  0x10   : > { %v837_v1 = vld [vmem:[%s246_s26 + $0x4] ss:$16 sps:$4 sm:$0xff]   ;;  %v839_v2 = vld [vmem:[%s246_s26] ss:$16 sps:$4 sm:$0xff]   ;;  %v840_v3 = vld [vmem:[%s246_s26 + $0x8] ss:$16 sps:$4 sm:$0xff]  }
  0x11   : > { %290 = vrot.lane.b32.xlu0 %v837_v1, %s859_s27  ;;  %433 = vmatprep.subr.bf16.mxu0 %v837_v1  ;;  %v842_v4 = vld [vmem:[%s246_s26 + $0xc] ss:$16 sps:$4 sm:$0xff]  }
  0x12   : > { %288 = vrot.lane.b32.xlu1 %v839_v2, %s859_s27  ;;  %434 = vmatpush1.bf16.msra.mxu0 %v839_v2 }
  0x13   : > { %477 = vmatpush1.bf16.msra.mxu1 %v840_v3 }
  0x14   : > { %478 = vmatprep.subr.bf16.mxu1 %v858_v0 }
  0x15   : > { %292 = vrot.lane.b32.xlu0 %v840_v3, %s859_s27 }
  0x16   : > { %294 = vrot.lane.b32.xlu1 %v842_v4, %s859_s27 }
  0x19   : > { %305 = vrot.lane.b32.xlu0 %v837_v1, %s860_s28 }
  0x1a   : > { %307 = vrot.lane.b32.xlu1 %v840_v3, %s860_s28 }
  0x1d   : > { %303 = vrot.lane.b32.xlu0 %v839_v2, %s860_s28 }
  0x1e   : > { %309 = vrot.lane.b32.xlu1 %v842_v4, %s860_s28 }
  0x21   : > { %320 = vrot.lane.b32.xlu0 %v837_v1, %s861_s29 }
  0x22   : > { %322 = vrot.lane.b32.xlu1 %v840_v3, %s861_s29 }
  0x25   : > { %318 = vrot.lane.b32.xlu0 %v839_v2, %s861_s29 }
  0x26   : > { %324 = vrot.lane.b32.xlu1 %v842_v4, %s861_s29  ;;  %s867_s29 = smov 0.0  }
  0x29   : > { %335 = vrot.lane.b32.xlu0 %v837_v1, %s862_s30 }
  0x2a   : > { %337 = vrot.lane.b32.xlu1 %v840_v3, %s862_s30 }
  0x2d   : > { %333 = vrot.lane.b32.xlu0 %v839_v2, %s862_s30 }
  0x2e   : > { %339 = vrot.lane.b32.xlu1 %v842_v4, %s862_s30 }
  0x31   : > { %350 = vrot.lane.b32.xlu0 %v837_v1, %s863_s7 }
  0x32   : > { %352 = vrot.lane.b32.xlu1 %v840_v3, %s863_s7 }
  0x35   : > { %348 = vrot.lane.b32.xlu0 %v839_v2, %s863_s7 }
  0x36   : > { %354 = vrot.lane.b32.xlu1 %v842_v4, %s863_s7 }
  0x39   : > { %365 = vrot.lane.b32.xlu0 %v837_v1, %s864_s8 }
  0x3a   : > { %367 = vrot.lane.b32.xlu1 %v840_v3, %s864_s8 }
  0x3d   : > { %363 = vrot.lane.b32.xlu0 %v839_v2, %s864_s8 }
  0x3e   : > { %369 = vrot.lane.b32.xlu1 %v842_v4, %s864_s8 }
  0x41   : > { %380 = vrot.lane.b32.xlu0 %v837_v1, %s865_s9 }
  0x42   : > { %382 = vrot.lane.b32.xlu1 %v840_v3, %s865_s9 }
  0x45   : > { %378 = vrot.lane.b32.xlu0 %v839_v2, %s865_s9 }
  0x46   : > { %384 = vrot.lane.b32.xlu1 %v842_v4, %s865_s9 }
  0x49   : > { %395 = vrot.lane.b32.xlu0 %v837_v1, %s866_s12  ;;  %v260_v1 = vlaneseq }
  0x4a   : > { %397 = vrot.lane.b32.xlu1 %v840_v3, %s866_s12  ;;  %v253_v3 = vld [vmem:[%s1018_s5] sm:$0x7] }
  0x4d   : > { %393 = vrot.lane.b32.xlu0 %v839_v2, %s866_s12  ;;  %v937_v2 = vshrl.u32 %v260_v1, 7 }
  0x4e   : > { %399 = vrot.lane.b32.xlu1 %v842_v4, %s866_s12 }
  0x4f   : > { %v528_v4 = vsub.s32 2, %v937_v2  ;;  %v524_v5 = vsub.s32 1, %v937_v2  ;;  %vm263_vm10 = vcmp.lt.s32.totalorder %v937_v2, 4 }
  0x51   : > { %412 = vperm.xlu0 %835, %v254_v6  }
  0x83   : > { %v291_v7 = vpop.permute.xlu0 %290 }
  0x84   : > { %v289_v8 = vpop.permute.xlu1 %288 }
  0x85   : > { %v297_v13 = vsel %vm296_vm1, %v289_v8, %v291_v7 }
  0x87   : > { %v293_v9 = vpop.permute.xlu0 %292 }
  0x88   : > { %v295_v10 = vpop.permute.xlu1 %294  ;;  %v298_v11 = vsel %vm296_vm1, %v291_v7, %v293_v9 }
  0x89   : > { %435 = vmatprep.subr.bf16.mxu0 %v298_v11  ;;  %v299_v12 = vsel %vm296_vm1, %v293_v9, %v295_v10  ;;  %v529_v9 = vrot.slane %v253_v3, %v528_v4  ;;  %v525_v10 = vrot.slane %v253_v3, %v524_v5 }
  0x8a   : > { %479 = vmatpush1.bf16.msra.mxu1 %v299_v12  ;;  %436 = vmatpush1.bf16.msra.mxu0 %v297_v13 }
  0x8b   : > { %v306_v14 = vpop.permute.xlu0 %305  ;;  %480 = vmatprep.subr.bf16.mxu1 %v858_v0 }
  0x8c   : > { %v308_v15 = vpop.permute.xlu1 %307 }
  0x8d   : > { %v313_v16 = vsel %vm311_vm2, %v306_v14, %v308_v15 }
  0x8e   : > { %437 = vmatprep.subr.bf16.mxu0 %v313_v16 }
  0x8f   : > { %v304_v17 = vpop.permute.xlu0 %303 }
  0x90   : > { %v310_v18 = vpop.permute.xlu1 %309  ;;  %v312_v19 = vsel %vm311_vm2, %v304_v17, %v306_v14 }
  0x91   : > { %438 = vmatpush1.bf16.msra.mxu0 %v312_v19  ;;  %v314_v20 = vsel %vm311_vm2, %v308_v15, %v310_v18 }
  0x92   : > { %481 = vmatpush1.bf16.msra.mxu1 %v314_v20 }
  0x93   : > { %v321_v21 = vpop.permute.xlu0 %320  ;;  %482 = vmatprep.subr.bf16.mxu1 %v858_v0 }
  0x94   : > { %v323_v22 = vpop.permute.xlu1 %322 }
  0x95   : > { %v328_v23 = vsel %vm326_vm3, %v321_v21, %v323_v22 }
  0x96   : > { %439 = vmatprep.subr.bf16.mxu0 %v328_v23 }
  0x97   : > { %v319_v24 = vpop.permute.xlu0 %318 }
  0x98   : > { %v325_v25 = vpop.permute.xlu1 %324  ;;  %v327_v26 = vsel %vm326_vm3, %v319_v24, %v321_v21 }
  0x99   : > { %440 = vmatpush1.bf16.msra.mxu0 %v327_v26  ;;  %v329_v27 = vsel %vm326_vm3, %v323_v22, %v325_v25 }
  0x9a   : > { %483 = vmatpush1.bf16.msra.mxu1 %v329_v27 }
  0x9b   : > { %v336_v28 = vpop.permute.xlu0 %335  ;;  %484 = vmatprep.subr.bf16.mxu1 %v858_v0 }
  0x9c   : > { %v338_v29 = vpop.permute.xlu1 %337 }
  0x9d   : > { %v343_v30 = vsel %vm341_vm4, %v336_v28, %v338_v29 }
  0x9e   : > { %441 = vmatprep.subr.bf16.mxu0 %v343_v30 }
  0x9f   : > { %v334_v31 = vpop.permute.xlu0 %333 }
  0xa0   : > { %v340_v32 = vpop.permute.xlu1 %339  ;;  %v342_v33 = vsel %vm341_vm4, %v334_v31, %v336_v28 }
  0xa1   : > { %442 = vmatpush1.bf16.msra.mxu0 %v342_v33  ;;  %v344_v34 = vsel %vm341_vm4, %v338_v29, %v340_v32 }
  0xa2   : > { %485 = vmatpush1.bf16.msra.mxu1 %v344_v34 }
  0xa3   : > { %v351_v35 = vpop.permute.xlu0 %350  ;;  %486 = vmatprep.subr.bf16.mxu1 %v858_v0 }
  0xa4   : > { %v353_v36 = vpop.permute.xlu1 %352 }
  0xa5   : > { %v358_v37 = vsel %vm356_vm5, %v351_v35, %v353_v36 }
  0xa6   : > { %443 = vmatprep.subr.bf16.mxu0 %v358_v37 }
  0xa7   : > { %v349_v38 = vpop.permute.xlu0 %348 }
  0xa8   : > { %v355_v39 = vpop.permute.xlu1 %354  ;;  %v357_v40 = vsel %vm356_vm5, %v349_v38, %v351_v35 }
  0xa9   : > { %444 = vmatpush1.bf16.msra.mxu0 %v357_v40  ;;  %v359_v41 = vsel %vm356_vm5, %v353_v36, %v355_v39 }
  0xaa   : > { %487 = vmatpush1.bf16.msra.mxu1 %v359_v41 }
  0xab   : > { %v366_v42 = vpop.permute.xlu0 %365  ;;  %488 = vmatprep.subr.bf16.mxu1 %v858_v0 }
  0xac   : > { %v368_v43 = vpop.permute.xlu1 %367 }
  0xad   : > { %v373_v44 = vsel %vm371_vm6, %v366_v42, %v368_v43 }
  0xae   : > { %445 = vmatprep.subr.bf16.mxu0 %v373_v44 }
  0xaf   : > { %v364_v45 = vpop.permute.xlu0 %363 }
  0xb0   : > { %v370_v46 = vpop.permute.xlu1 %369  ;;  %v372_v47 = vsel %vm371_vm6, %v364_v45, %v366_v42 }
  0xb1   : > { %446 = vmatpush1.bf16.msra.mxu0 %v372_v47  ;;  %v374_v48 = vsel %vm371_vm6, %v368_v43, %v370_v46 }
  0xb2   : > { %489 = vmatpush1.bf16.msra.mxu1 %v374_v48 }
  0xb3   : > { %v381_v49 = vpop.permute.xlu0 %380  ;;  %490 = vmatprep.subr.bf16.mxu1 %v858_v0 }
  0xb4   : > { %v383_v50 = vpop.permute.xlu1 %382 }
  0xb5   : > { %v388_v51 = vsel %vm386_vm7, %v381_v49, %v383_v50 }
  0xb6   : > { %447 = vmatprep.subr.bf16.mxu0 %v388_v51 }
  0xb7   : > { %v379_v52 = vpop.permute.xlu0 %378 }
  0xb8   : > { %v385_v53 = vpop.permute.xlu1 %384  ;;  %v387_v54 = vsel %vm386_vm7, %v379_v52, %v381_v49 }
  0xb9   : > { %448 = vmatpush1.bf16.msra.mxu0 %v387_v54  ;;  %v389_v55 = vsel %vm386_vm7, %v383_v50, %v385_v53  ;;  %v255_v53 = vld [vmem:[%s1015_s2 + $0x8] sm:$0xff] }
  0xba   : > { %491 = vmatpush1.bf16.msra.mxu1 %v389_v55 }
  0xbb   : > { %v396_v56 = vpop.permute.xlu0 %395  ;;  %492 = vmatprep.subr.bf16.mxu1 %v858_v0  ;;  %v520_v0 = vsub.s32 0, %v937_v2 }
  0xbc   : > { %v398_v57 = vpop.permute.xlu1 %397 }
  0xbd   : > { %v403_v58 = vsel %vm401_vm8, %v396_v56, %v398_v57  ;;  %v521_v7 = vrot.slane %v253_v3, %v520_v0 }
  0xbe   : > { %449 = vmatprep.subr.bf16.mxu0 %v403_v58 }
  0xbf   : > { %v394_v59 = vpop.permute.xlu0 %393 }
  0xc0   : > { %v400_v60 = vpop.permute.xlu1 %399  ;;  %v402_v61 = vsel %vm401_vm8, %v394_v59, %v396_v56 }
  0xc1   : > { %450 = vmatpush1.bf16.msra.mxu0 %v402_v61  ;;  %v404_v63 = vsel %vm401_vm8, %v398_v57, %v400_v60 }
  0xc2   : > { %493 = vmatpush1.bf16.msra.mxu1 %v404_v63 }
  0xc4   : > { %466 = vmatmul.mubr.bf16.vlgmr.msra.gmra.mrb[0].mxu0 %v843_v62 }
  0xc5   : > { %509 = vmatmul.mubr.bf16.vlgmr.msra.gmra.mrb[0].mxu1 %v843_v62 }
  0xd0   : > { %v413_v6 = vpop.permute.xlu0 %412 }
 0x197   : > { %v467_v8 = vpop.f32.mrb[0].mxu0 }
 0x198   : > { %v945_v11 = vadd.f32 %v467_v8, %v413_v6  ;;  %v510_v12 = vpop.f32.mrb[0].mxu1  ;;  %v469_v13 = vpop.f32.mrb[1].mxu0 }
 0x199   : > { %v947_v14 = vadd.f32 %v510_v12, %v413_v6  ;;  %v949_v15 = vadd.f32 %v469_v13, %v413_v6  ;;  %v512_v16 = vpop.f32.mrb[1].mxu1  ;;  %v951_v17 = vpop.f32.mrb[2].mxu0 }
 0x19a   : > { %v533_v18 = vmul.f32 %v521_v7, %v945_v11  ;;  %v954_v19 = vpop.f32.mrb[2].mxu1  ;;  %v956_v20 = vpop.f32.mrb[3].mxu0 }
 0x19b   : > { %v535_v21 = vmul.f32 %v529_v9, %v947_v14  ;;  %v534_v22 = vmul.f32 %v525_v10, %v949_v15  ;;  %v515_v23 = vpop.f32.mrb[3].mxu1 }
 0x19c   : > { %v551_v24 = vmul.f32 %v533_v18, %v945_v11  ;;  %v537_v25 = vsel %vm536_vm9, %v533_v18, 0.0  ;;  %v584_v26 = vrot.slane %v533_v18, 4 }
 0x19d   : > { %v552_v27 = vmul.f32 %v534_v22, %v949_v15  ;;  %v538_v28 = vsel %vm536_vm9, %v534_v22, 0.0  ;;  %v553_v29 = vmul.f32 %v535_v21, %v947_v14  ;;  %v540_v31 = vsel %vm536_vm9, %v535_v21, 0.0 }
 0x19e   : > { %v539_v30 = vadd.f32 %v538_v28, %v537_v25  ;;  %v554_v32 = vsel %vm536_vm9, %v551_v24, 0.0  ;;  %v585_v33 = vrot.slane %v534_v22, 4  ;;  %v586_v35 = vrot.slane %v535_v21, 4 }
 0x19f   : > { %v555_v34 = vsel %vm536_vm9, %v552_v27, 0.0  ;;  %v590_v36 = vsel %vm536_vm9, %v584_v26, 0.0  ;;  %v607_v37 = vrot.slane %v551_v24, 4  ;;  %v557_v40 = vsel %vm536_vm9, %v553_v29, 0.0 }
 0x1a0   : > { %v541_v38 = vadd.f32 %v540_v31, %v539_v30  ;;  %v556_v39 = vadd.f32 %v555_v34, %v554_v32  ;;  %v591_v41 = vsel %vm536_vm9, %v585_v33, 0.0  ;;  %v608_v43 = vrot.slane %v552_v27, 4  ;;  %v257_v32 = vld [vmem:[%s1016_s3 + $0x8] sm:$0xff]  ;;  %v256_v33 = vld [vmem:[%s1016_s3] sm:$0xff] }
 0x1a1   : > { %v592_v42 = vadd.f32 %v591_v41, %v590_v36  ;;  %v609_v44 = vrot.slane %v553_v29, 4  ;;  %v613_v45 = vsel %vm536_vm9, %v607_v37, 0.0  ;;  %v593_v47 = vsel %vm536_vm9, %v586_v35, 0.0  ;;  %v258_v41 = vld [vmem:[%s1017_s4] sm:$0xff] }
 0x1a2   : > { %542 = vadd.xlane.f32.xlu1 %v541_v38  ;;  %v558_v46 = vadd.f32 %v557_v40, %v556_v39  ;;  %v614_v48 = vsel %vm536_vm9, %v608_v43, 0.0  ;;  %v259_v39 = vld [vmem:[%s1017_s4 + $0x8] sm:$0xff] }
 0x1a3   : > { %v594_v49 = vadd.f32 %v593_v47, %v592_v42  ;;  %v615_v50 = vadd.f32 %v614_v48, %v613_v45  ;;  %v616_v51 = vsel %vm536_vm9, %v609_v44, 0.0 }
 0x1a4   : > { %559 = vadd.xlane.f32.xlu0 %v558_v46 }
 0x1a5   : > { %v617_v52 = vadd.f32 %v616_v51, %v615_v50 }
 0x1a6   : > { %595 = vadd.xlane.f32.xlu1 %v594_v49 }
 0x1a8   : > { %618 = vadd.xlane.f32.xlu0 %v617_v52 }
 0x1b7   : > { %417 = vperm.xlu1 %836, %v255_v53  }
 0x22f   : > { %v543_v54 = vpop.xlane.xlu1 %542 }
 0x230   : > { %v544_v55 = vrot.slane %v543_v54, 4 }
 0x231   : > { %v560_v56 = vpop.xlane.xlu0 %559 }
 0x232   : > { %v545_v57 = vadd.f32 %v544_v55, %v543_v54  ;;  %v561_v58 = vrot.slane %v560_v56, 4 }
 0x233   : > { %v596_v5 = vpop.xlane.xlu1 %595 }
 0x234   : > { %v546_v59 = vrot.slane %v545_v57, 2  ;;  %v562_v60 = vadd.f32 %v561_v58, %v560_v56  ;;  %v597_v7 = vrot.slane %v596_v5, 4 }
 0x235   : > { %v619_v6 = vpop.xlane.xlu0 %618 }
 0x236   : > { %v563_v61 = vrot.slane %v562_v60, 2  ;;  %v547_v62 = vadd.f32 %v546_v59, %v545_v57  ;;  %v620_v8 = vrot.slane %v619_v6, 4  ;;  %v598_v9 = vadd.f32 %v597_v7, %v596_v5 }
 0x237   : > { %v418_v2 = vpop.permute.xlu1 %417 }
 0x238   : > { %v548_v63 = vrot.slane %v547_v62, 1  ;;  %v564_v1 = vadd.f32 %v563_v61, %v562_v60  ;;  %v621_v10 = vadd.f32 %v620_v8, %v619_v6  ;;  %v599_v12 = vrot.slane %v598_v9, 2 }
 0x239   : > { %v472_v47 = vadd.f32 %v951_v17, %v418_v2  ;;  %v474_v48 = vadd.f32 %v956_v20, %v418_v2  ;;  %v514_v49 = vadd.f32 %v954_v19, %v418_v2 }
 0x23a   : > { %v549_v0 = vadd.f32 %v548_v63, %v547_v62  ;;  %v565_v3 = vrot.slane %v564_v1, 1  ;;  %v622_v13 = vrot.slane %v621_v10, 2  ;;  %v600_v18 = vadd.f32 %v599_v12, %v598_v9 }
 0x23c   : > { %805 = vpush %v549_v0  ;;  %v566_v4 = vadd.f32 %v565_v3, %v564_v1  ;;  %v623_v21 = vadd.f32 %v622_v13, %v621_v10  ;;  %v601_v22 = vrot.slane %v600_v18, 1 }
 0x23e   : > { %807 = vpush %v566_v4  ;;  %v624_v23 = vrot.slane %v623_v21, 1  ;;  %v602_v25 = vadd.f32 %v601_v22, %v600_v18 }
 0x240   : > { %v625_v26 = vadd.f32 %v624_v23, %v623_v21 }
 0x26d   : > { %s806_s23 = spop %805 }
 0x26e   : > { %s978_s24 = smul.f32 0.0009765625, %s806_s23 }
 0x26f   : > { %s808_s25 = spop %807 }
 0x270   : > { %s574_s26 = smul.f32 %s978_s24, %s978_s24  ;;  %v640_v27 = vstv %s978_s24 }
 0x271   : > { %s573_s27 = smul.f32 0.0009765625, %s808_s25 }
 0x273   : > { %s575_s28 = ssub.f32 %s573_s27, %s574_s26 }
 0x275   : > { %s576_s30 = smax.f32 %s867_s29, %s575_s28  ;;  %s804_s28 = smul.u32 24, %s1021_s22 }
 0x276   : > { %s577_s7 = sadd.f32 1e-05, %s576_s30 }
 0x278   : > { %v578_v16 = vstv %s577_s7  ;;  %s251_s7 = scalar_lea.vmem %s1019_s6, %s804_s28 }
 0x279   : > { %846 = vrsqrt.f32 %v578_v16 }
 0x283   : > { %v847_v24 = vpop.eup %846 }
 0x284   : > { %809 = vpush %v847_v24 }
 0x285   : > { %811 = vpush %v602_v25 }
 0x286   : > { %813 = vpush %v625_v26 }
 0x2b5   : > { %s810_s8 = spop %809 }
 0x2b6   : > { %s812_s9 = spop %811  ;;  %v644_v34 = vstv %s810_s8 }
 0x2b7   : > { %s629_s10 = smul.f32 0.0009765625, %s812_s9  ;;  %s814_s11 = spop %813 }
 0x2b8   : > { %s632_s12 = smul.f32 0.0009765625, %s814_s11 }
 0x2b9   : > { %s633_s13 = smul.f32 %s629_s10, %s629_s10  ;;  %v641_v28 = vstv %s629_s10 }
 0x2ba   : > { %v642_v29 = vsel %vm263_vm10, %v640_v27, %v641_v28 }
 0x2bb   : > { %s634_s14 = ssub.f32 %s632_s12, %s633_s13 }
 0x2bd   : > { %s635_s15 = smax.f32 %s867_s29, %s634_s14 }
 0x2be   : > { %s636_s16 = sadd.f32 1e-05, %s635_s15 }
 0x2c0   : > { %v637_v30 = vstv %s636_s16 }
 0x2c1   : > { %848 = vrsqrt.f32 %v637_v30 }
 0x2cb   : > { %v849_v31 = vpop.eup %848 }
 0x2cc   : > { %815 = vpush %v849_v31 }
 0x2fd   : > { %s816_s23 = spop %815 }
 0x2fe   : > { %v645_v35 = vstv %s816_s23 }
 0x2ff   : > { %v646_v36 = vsel %vm263_vm10, %v644_v34, %v645_v35  ;;  %v649_v37 = vmul.f32 %v645_v35, %v257_v32 }
 0x300   : > { %v648_v38 = vmul.f32 %v646_v36, %v256_v33 }
 0x301   : > { %v651_v40 = vmul.f32 %v649_v37, %v641_v28  ;;  %661 = vperm.xlu1 %836, %v649_v37  }
 0x302   : > { %v650_v42 = vmul.f32 %v648_v38, %v642_v29  ;;  %656 = vperm.xlu0 %835, %v648_v38  }
 0x303   : > { %v653_v43 = vsub.f32 %v259_v39, %v651_v40 }
 0x304   : > { %v652_v44 = vsub.f32 %v258_v41, %v650_v42 }
 0x306   : > { %677 = vperm.xlu0 %835, %v653_v43   ;;  %672 = vperm.xlu1 %836, %v652_v44  }
 0x380   : > { %v662_v45 = vpop.permute.xlu1 %661 }
 0x381   : > { %v657_v46 = vpop.permute.xlu0 %656  ;;  %v667_v50 = vmul.f32 %v662_v45, %v472_v47  ;;  %v668_v51 = vmul.f32 %v662_v45, %v474_v48  ;;  %v669_v52 = vmul.f32 %v662_v45, %v514_v49 }
 0x382   : > { %v664_v53 = vmul.f32 %v657_v46, %v945_v11  ;;  %v665_v54 = vmul.f32 %v657_v46, %v949_v15  ;;  %v666_v55 = vmul.f32 %v657_v46, %v947_v14 }
 0x385   : > { %v678_v56 = vpop.permute.xlu0 %677  ;;  %v673_v57 = vpop.permute.xlu1 %672 }
 0x386   : > { %v683_v58 = vadd.f32 %v678_v56, %v667_v50  ;;  %v684_v59 = vadd.f32 %v678_v56, %v668_v51  ;;  %v685_v60 = vadd.f32 %v678_v56, %v669_v52  ;;  %v680_v61 = vadd.f32 %v673_v57, %v664_v53 }
 0x387   : > { %v681_v17 = vadd.f32 %v673_v57, %v665_v54  ;;  %v682_v20 = vadd.f32 %v673_v57, %v666_v55 }
 0x388   : > { %v689_v62 = vmul.f32 0.2, %v683_v58  ;;  %v690_v19 = vmul.f32 0.2, %v684_v59  ;;  %v691_v63 = vmul.f32 0.2, %v685_v60 }
 0x389   : > { %v686_v1 = vmul.f32 0.2, %v680_v61  ;;  %v687_v0 = vmul.f32 0.2, %v681_v17  ;;  %v688_v3 = vmul.f32 0.2, %v682_v20 }
 0x38a   : > { %v695_v11 = vmax.f32 %v683_v58, %v689_v62  ;;  %v696_v4 = vmax.f32 %v684_v59, %v690_v19  ;;  %v697_v15 = vmax.f32 %v685_v60, %v691_v63 }
 0x38b   : > { %v692_v14 = vmax.f32 %v680_v61, %v686_v1  ;;  %v693_v5 = vmax.f32 %v681_v17, %v687_v0  ;;  %v694_v6 = vmax.f32 %v682_v20, %v688_v3 }
 0x38c   : > { %v802_v7 = vpack.c.bf16 %v696_v4, %v695_v11  ;;  %v803_v8 = vpack.c.bf16 %v697_v15, %v697_v15 }
 0x38d   : > { %v800_v9 = vpack.c.bf16 %v693_v5, %v692_v14  ;;  %v801_v10 = vpack.c.bf16 %v694_v6, %v694_v6 }
 0x38e   : > { %720 = vst [vmem:[%s251_s7 + $0xc] sm:$0xff] %v802_v7  ;;  %721 = vst [vmem:[%s251_s7 + $0x14] sm:$0xf] %v803_v8 }
 0x38f   : > { %718 = vst [vmem:[%s251_s7] sm:$0xff] %v800_v9  ;;  %719 = vst [vmem:[%s251_s7 + $0x8] sm:$0xf] %v801_v10 }
 0x390 PF: > { %s16_s21 = sadd.s32 1, %s856_s21  }
 0x391   : > { %p13_p4 = scmp.ge.s32.totalorder %s16_s21, 4  }
 0x393   :  { %15 = sbr.rel (!%p13_p4) target bundleno = 1 (0x1), region = 74 }

// kernel: encoder_deep_forward.8
= control target key start
LH: loop header
LB: loop body
LE: loop exit
PB: predicated region body
PF: predicated region fallthrough
CT: control target
= control target key end

     0   :  { %s790_s21 = smov 0   ;;  %s894_s0 = inlined_call_operand.vmem [shape: bf16[2,64,384], index: 0, kind: input, shape index: {}]   ;;  %s895_s1 = inlined_call_operand.vmem [shape: bf16[1,16,144], index: 1, kind: input, shape index: {}]   ;;  %s896_s2 = inlined_call_operand.vmem [shape: f32[16,1], index: 2, kind: input, shape index: {}]   ;;  %s897_s3 = inlined_call_operand.vmem [shape: f32[16,1], index: 3, kind: input, shape index: {}]   ;;  %s898_s4 = inlined_call_operand.vmem [shape: f32[16,1], index: 4, kind: input, shape index: {}]   ;;  %s899_s5 = inlined_call_operand.vmem [shape: f32[1,256], index: 5, kind: input, shape index: {}]   ;;  %s900_s6 = inlined_call_operand.vmem [shape: bf16[2,16,256], index: 6, kind: output, shape index: {}]  }
   0x1 LB: > { %s663_s22 = sadd.s32 4294967295, %s748_s21   ;;  %p667_p0 = scmp.ge.s32.totalorder %s748_s21, 1  ;;  %s748_s21 = sphi %s790_s21, %s16_s21  }
   0x2   : > { %p212_p1 = scmp.lt.s32.totalorder %s748_s21, 3 }
   0x4   : > { %p213_p2 = pnand %p667_p0, %p212_p1 }
   0x5   : > { %p242_p3 = scmp.lt.s32.totalorder (!%p213_p2), %s663_s22, 1  ;;  %s750_s27 = smov (!%p213_p2), 127   ;;  %v737_v9 = vld [vmem:[%s895_s1 + $0x4] ss:$8 sps:$4 sm:$0xff] (!%p213_p2)   ;;  %vm408_vm0 = vcmask (!%p213_p2), 130048   ;;  %v752_v10 = vmov (!%p213_p2), 0   ;;  %v456_v41 = vlaneseq (!%p213_p2) }
   0x6   : > { %216 = sbr.rel (%p213_p2) target bundleno = 879 (0x36f), region = 44  ;;  %s751_s28 = smov (!%p213_p2), 118   ;;  %684 = vmatprep.mubr.msk.bf16.mxu0 (!%p213_p2), %vm408_vm0, %v737_v9  ;;  %719 = vset.pattern.permute.xlu0 (!%p213_p2), %v752_v10  ;;  %v254_v11 = vld [vmem:[%s896_s2] sm:$0xff] (!%p213_p2)  ;;  %v255_v12 = vld [vmem:[%s896_s2 + $0x8] sm:$0xff] (!%p213_p2)  ;;  %vm310_vm1 = vcmask (!%p213_p2), 1039360   ;;  %vm356_vm2 = vcmask (!%p213_p2), 965632  }
   0x7   : > { %718 = vset.pattern.permute.xlu1 (!%p213_p2), %v752_v10  ;;  %s753_s7 = smov (!%p213_p2), 117   ;;  %vm382_vm3 = vcmask (!%p213_p2), 957440   ;;  %v735_v40 = vld [vmem:[%s895_s1] ss:$8 sps:$4 sm:$0xff] (!%p213_p2)   ;;  %v457_v42 = vshrl.u32 (!%p213_p2), %v456_v41, 7  ;;  %s754_s24 = smov (!%p213_p2), 0.0  }
   0x8   : > { %v253_v44 = vld [vmem:[%s899_s5] sm:$0x3] (!%p213_p2) }
   0x9   : > { %v458_v43 = vsub.s32 (!%p213_p2), 0, %v457_v42  ;;  %v462_v45 = vsub.s32 (!%p213_p2), 1, %v457_v42 }
   0xb   : > { %v836_v47 = vrot.slane (!%p213_p2), %v253_v44, %v458_v43  ;;  %v838_v50 = vrot.slane (!%p213_p2), %v253_v44, %v462_v45  ;;  %v257_v45 = vld [vmem:[%s897_s3 + $0x8] sm:$0xff] (!%p213_p2) }
   0xd   : > { %s902_s22 = smov (!%p242_p3, %s663_s22), 1 }
   0xe   : > { %s692_s23 = smul.u32 96, %s902_s22 }
  0x10   : > { %s804_s26 = scalar_lea.vmem %s894_s0, %s692_s23 }
  0x11   : > { %v720_v0 = vld [vmem:[%s804_s26 + $0x4] ss:$12 sps:$4 sm:$0xff]   ;;  %v722_v1 = vld [vmem:[%s804_s26] ss:$12 sps:$4 sm:$0xff]   ;;  %v723_v2 = vld [vmem:[%s804_s26 + $0x8] ss:$12 sps:$4 sm:$0xff]  }
  0x12   : > { %306 = vrot.lane.b32.xlu0 %v720_v0, %s750_s27  ;;  %412 = vmatprep.subr.bf16.mxu0 %v720_v0  ;;  %v724_v3 = vld [vmem:[%s804_s26 + $0x34] ss:$12 sps:$4 sm:$0xff]   ;;  %v728_v4 = vld [vmem:[%s804_s26 + $0x1c] ss:$12 sps:$4 sm:$0xff]   ;;  %v726_v5 = vld [vmem:[%s804_s26 + $0x38] ss:$12 sps:$4 sm:$0xff]  }
  0x13   : > { %304 = vrot.lane.b32.xlu1 %v722_v1, %s750_s27  ;;  %413 = vmatpush1.bf16.msra.mxu0 %v722_v1  ;;  %v731_v6 = vld [vmem:[%s804_s26 + $0x18] ss:$12 sps:$4 sm:$0xff]   ;;  %v727_v7 = vld [vmem:[%s804_s26 + $0x30] ss:$12 sps:$4 sm:$0xff]   ;;  %v730_v8 = vld [vmem:[%s804_s26 + $0x20] ss:$12 sps:$4 sm:$0xff]  }
  0x14   : > { %414 = vmatprep.subr.bf16.mxu0 %v728_v4  ;;  %v732_v20 = vld [vmem:[%s804_s26 + $0x4c] ss:$12 sps:$4 sm:$0xff]   ;;  %v734_v22 = vld [vmem:[%s804_s26 + $0x48] ss:$12 sps:$4 sm:$0xff]  }
  0x16   : > { %308 = vrot.lane.b32.xlu0 %v723_v2, %s750_s27 }
  0x17   : > { %342 = vrot.lane.b32.xlu1 %v724_v3, %s750_s27  ;;  %415 = vmatpush1.bf16.msra.mxu0 %v731_v6 }
  0x1a   : > { %344 = vrot.lane.b32.xlu0 %v726_v5, %s750_s27 }
  0x1b   : > { %340 = vrot.lane.b32.xlu1 %v727_v7, %s750_s27 }
  0x1e   : > { %352 = vrot.lane.b32.xlu0 %v720_v0, %s751_s28 }
  0x1f   : > { %354 = vrot.lane.b32.xlu1 %v723_v2, %s751_s28 }
  0x22   : > { %350 = vrot.lane.b32.xlu0 %v722_v1, %s751_s28 }
  0x23   : > { %368 = vrot.lane.b32.xlu1 %v728_v4, %s751_s28 }
  0x26   : > { %370 = vrot.lane.b32.xlu0 %v730_v8, %s751_s28 }
  0x27   : > { %366 = vrot.lane.b32.xlu1 %v731_v6, %s751_s28 }
  0x2a   : > { %378 = vrot.lane.b32.xlu0 %v720_v0, %s753_s7 }
  0x2b   : > { %380 = vrot.lane.b32.xlu1 %v723_v2, %s753_s7 }
  0x2e   : > { %376 = vrot.lane.b32.xlu0 %v722_v1, %s753_s7 }
  0x2f   : > { %391 = vperm.xlu1 %718, %v254_v11  }
  0x32   : > { %396 = vperm.xlu0 %719, %v255_v12  }
  0x84   : > { %v307_v13 = vpop.permute.xlu0 %306 }
  0x85   : > { %v305_v14 = vpop.permute.xlu1 %304 }
  0x86   : > { %v311_v18 = vsel %vm310_vm1, %v305_v14, %v307_v13 }
  0x88   : > { %v309_v15 = vpop.permute.xlu0 %308 }
  0x89   : > { %v343_v16 = vpop.permute.xlu1 %342  ;;  %v312_v17 = vsel %vm310_vm1, %v307_v13, %v309_v15 }
  0x8a   : > { %416 = vmatprep.subr.bf16.mxu0 %v312_v17 }
  0x8b   : > { %417 = vmatpush1.bf16.msra.mxu0 %v311_v18 }
  0x8c   : > { %v345_v19 = vpop.permute.xlu0 %344  ;;  %418 = vmatprep.subr.bf16.mxu0 %v724_v3 }
  0x8d   : > { %v341_v21 = vpop.permute.xlu1 %340  ;;  %v347_v25 = vsel %vm310_vm1, %v343_v16, %v345_v19 }
  0x8e   : > { %v346_v28 = vsel %vm310_vm1, %v341_v21, %v343_v16 }
  0x8f   : > { %419 = vmatpush1.bf16.msra.mxu0 %v727_v7 }
  0x90   : > { %v353_v23 = vpop.permute.xlu0 %352  ;;  %420 = vmatprep.subr.bf16.mxu0 %v732_v20 }
  0x91   : > { %v355_v24 = vpop.permute.xlu1 %354 }
  0x92   : > { %v358_v29 = vsel %vm356_vm2, %v353_v23, %v355_v24 }
  0x93   : > { %421 = vmatpush1.bf16.msra.mxu0 %v734_v22 }
  0x94   : > { %v351_v26 = vpop.permute.xlu0 %350  ;;  %422 = vmatprep.subr.bf16.mxu0 %v347_v25 }
  0x95   : > { %v369_v27 = vpop.permute.xlu1 %368  ;;  %v357_v32 = vsel %vm356_vm2, %v351_v26, %v353_v23 }
  0x97   : > { %423 = vmatpush1.bf16.msra.mxu0 %v346_v28 }
  0x98   : > { %v371_v30 = vpop.permute.xlu0 %370  ;;  %424 = vmatprep.subr.bf16.mxu0 %v358_v29 }
  0x99   : > { %v367_v31 = vpop.permute.xlu1 %366  ;;  %v373_v33 = vsel %vm356_vm2, %v369_v27, %v371_v30 }
  0x9a   : > { %v372_v36 = vsel %vm356_vm2, %v367_v31, %v369_v27 }
  0x9b   : > { %425 = vmatpush1.bf16.msra.mxu0 %v357_v32 }
  0x9c   : > { %v379_v34 = vpop.permute.xlu0 %378  ;;  %426 = vmatprep.subr.bf16.mxu0 %v373_v33 }
  0x9d   : > { %v381_v35 = vpop.permute.xlu1 %380 }
  0x9e   : > { %v384_v37 = vsel %vm382_vm3, %v379_v34, %v381_v35 }
  0x9f   : > { %427 = vmatpush1.bf16.msra.mxu0 %v372_v36  ;;  %v256_v36 = vld [vmem:[%s897_s3] sm:$0xff] }
  0xa0   : > { %v377_v38 = vpop.permute.xlu0 %376  ;;  %428 = vmatprep.subr.bf16.mxu0 %v384_v37 }
  0xa1   : > { %v383_v39 = vsel %vm382_vm3, %v377_v38, %v379_v34 }
  0xa3   : > { %429 = vmatpush1.bf16.msra.mxu0 %v383_v39 }
  0xa6   : > { %445 = vmatmul.mubr.bf16.vlgmr.msra.gmra.mrb[0].mxu0 %v735_v40  ;;  %v258_v40 = vld [vmem:[%s898_s4] sm:$0xff] }
  0xae   : > { %v392_v46 = vpop.permute.xlu1 %391 }
  0xb1   : > { %v397_v49 = vpop.permute.xlu0 %396 }
 0x179   : > { %v446_v48 = vpop.f32.mrb[0].mxu0 }
 0x17a   : > { %v840_v51 = vadd.f32 %v446_v48, %v392_v46  ;;  %v448_v52 = vpop.f32.mrb[1].mxu0 }
 0x17b   : > { %v842_v53 = vadd.f32 %v448_v52, %v392_v46  ;;  %v450_v54 = vpop.f32.mrb[2].mxu0  ;;  %v259_v52 = vld [vmem:[%s898_s4 + $0x8] sm:$0xff] }
 0x17c   : > { %v844_v55 = vadd.f32 %v450_v54, %v397_v49  ;;  %v452_v56 = vpop.f32.mrb[3].mxu0  ;;  %v466_v57 = vmul.f32 %v836_v47, %v840_v51 }
 0x17d   : > { %v848_v58 = vadd.f32 %v452_v56, %v397_v49  ;;  %v467_v59 = vmul.f32 %v838_v50, %v842_v53 }
 0x17e   : > { %v478_v60 = vmul.f32 %v466_v57, %v840_v51  ;;  %v503_v61 = vmul.f32 %v836_v47, %v844_v55 }
 0x17f   : > { %v468_v62 = vadd.f32 %v467_v59, %v466_v57  ;;  %v479_v63 = vmul.f32 %v467_v59, %v842_v53  ;;  %v504_v0 = vmul.f32 %v838_v50, %v848_v58 }
 0x180   : > { %v515_v2 = vmul.f32 %v503_v61, %v844_v55 }
 0x181   : > { %469 = vadd.xlane.f32.xlu1 %v468_v62  ;;  %v480_v1 = vadd.f32 %v479_v63, %v478_v60  ;;  %v516_v3 = vmul.f32 %v504_v0, %v848_v58  ;;  %v505_v4 = vadd.f32 %v504_v0, %v503_v61 }
 0x183   : > { %481 = vadd.xlane.f32.xlu0 %v480_v1  ;;  %v517_v5 = vadd.f32 %v516_v3, %v515_v2 }
 0x185   : > { %506 = vadd.xlane.f32.xlu1 %v505_v4 }
 0x187   : > { %518 = vadd.xlane.f32.xlu0 %v517_v5 }
 0x20e   : > { %v470_v6 = vpop.xlane.xlu1 %469 }
 0x20f   : > { %v471_v7 = vrot.slane %v470_v6, 4 }
 0x210   : > { %v482_v8 = vpop.xlane.xlu0 %481 }
 0x211   : > { %v472_v9 = vadd.f32 %v471_v7, %v470_v6  ;;  %v483_v10 = vrot.slane %v482_v8, 4 }
 0x212   : > { %v507_v20 = vpop.xlane.xlu1 %506 }
 0x213   : > { %v473_v11 = vrot.slane %v472_v9, 2  ;;  %v484_v12 = vadd.f32 %v483_v10, %v482_v8  ;;  %v508_v22 = vrot.slane %v507_v20, 4 }
 0x214   : > { %v519_v21 = vpop.xlane.xlu0 %518 }
 0x215   : > { %v485_v13 = vrot.slane %v484_v12, 2  ;;  %v474_v14 = vadd.f32 %v473_v11, %v472_v9  ;;  %v520_v23 = vrot.slane %v519_v21, 4  ;;  %v509_v24 = vadd.f32 %v508_v22, %v507_v20 }
 0x217   : > { %v475_v15 = vrot.slane %v474_v14, 1  ;;  %v486_v16 = vadd.f32 %v485_v13, %v484_v12  ;;  %v521_v25 = vadd.f32 %v520_v23, %v519_v21  ;;  %v510_v26 = vrot.slane %v509_v24, 2 }
 0x219   : > { %v476_v17 = vadd.f32 %v475_v15, %v474_v14  ;;  %v487_v18 = vrot.slane %v486_v16, 1  ;;  %v522_v27 = vrot.slane %v521_v25, 2  ;;  %v511_v29 = vadd.f32 %v510_v26, %v509_v24 }
 0x21b   : > { %693 = vpush %v476_v17  ;;  %v488_v19 = vadd.f32 %v487_v18, %v486_v16  ;;  %v523_v30 = vadd.f32 %v522_v27, %v521_v25  ;;  %v512_v31 = vrot.slane %v511_v29, 1 }
 0x21d   : > { %695 = vpush %v488_v19  ;;  %v524_v32 = vrot.slane %v523_v30, 1  ;;  %v513_v34 = vadd.f32 %v512_v31, %v511_v29 }
 0x21f   : > { %v525_v35 = vadd.f32 %v524_v32, %v523_v30 }
 0x24c   : > { %s694_s16 = spop %693 }
 0x24d   : > { %s860_s17 = smul.f32 0.001953125, %s694_s16 }
 0x24e   : > { %s696_s18 = spop %695 }
 0x24f   : > { %s496_s19 = smul.f32 %s860_s17, %s860_s17  ;;  %v540_v39 = vstv %s860_s17 }
 0x250   : > { %s495_s20 = smul.f32 0.001953125, %s696_s18 }
 0x252   : > { %s497_s23 = ssub.f32 %s495_s20, %s496_s19 }
 0x254   : > { %s498_s25 = smax.f32 %s754_s24, %s497_s23  ;;  %s689_s23 = sshll.u32 %s902_s22, 4 }
 0x255   : > { %s499_s26 = sadd.f32 1e-05, %s498_s25 }
 0x257   : > { %v500_v28 = vstv %s499_s26  ;;  %s251_s26 = scalar_lea.vmem %s900_s6, %s689_s23 }
 0x258   : > { %738 = vrsqrt.f32 %v500_v28 }
 0x262   : > { %v739_v33 = vpop.eup %738 }
 0x263   : > { %697 = vpush %v739_v33 }
 0x264   : > { %699 = vpush %v513_v34 }
 0x265   : > { %701 = vpush %v525_v35 }
 0x294   : > { %s698_s29 = spop %697 }
 0x295   : > { %v544_v37 = vstv %s698_s29  ;;  %s700_s30 = spop %699 }
 0x296   : > { %v548_v38 = vmul.f32 %v544_v37, %v256_v36  ;;  %s529_s7 = smul.f32 0.001953125, %s700_s30  ;;  %s702_s8 = spop %701 }
 0x297   : > { %s532_s9 = smul.f32 0.001953125, %s702_s8 }
 0x298   : > { %v550_v41 = vmul.f32 %v548_v38, %v540_v39  ;;  %s533_s12 = smul.f32 %s529_s7, %s529_s7  ;;  %556 = vperm.xlu1 %718, %v548_v38   ;;  %v541_v49 = vstv %s529_s7 }
 0x29a   : > { %s534_s13 = ssub.f32 %s532_s9, %s533_s12  ;;  %v552_v42 = vsub.f32 %v258_v40, %v550_v41 }
 0x29c   : > { %s535_s14 = smax.f32 %s754_s24, %s534_s13  ;;  %570 = vperm.xlu1 %718, %v552_v42  }
 0x29d   : > { %s536_s15 = sadd.f32 1e-05, %s535_s14 }
 0x29f   : > { %v537_v43 = vstv %s536_s15 }
 0x2a0   : > { %740 = vrsqrt.f32 %v537_v43 }
 0x2aa   : > { %v741_v44 = vpop.eup %740 }
 0x2ab   : > { %703 = vpush %v741_v44 }
 0x2dc   : > { %s704_s18 = spop %703 }
 0x2dd   : > { %v545_v46 = vstv %s704_s18 }
 0x2de   : > { %v549_v48 = vmul.f32 %v545_v46, %v257_v45 }
 0x2e0   : > { %v551_v54 = vmul.f32 %v549_v48, %v541_v49  ;;  %561 = vperm.xlu0 %719, %v549_v48  }
 0x2e2   : > { %v553_v56 = vsub.f32 %v259_v52, %v551_v54 }
 0x2e4   : > { %575 = vperm.xlu1 %718, %v553_v56  }
 0x317   : > { %v557_v57 = vpop.permute.xlu1 %556 }
 0x318   : > { %v564_v59 = vmul.f32 %v557_v57, %v840_v51  ;;  %v565_v60 = vmul.f32 %v557_v57, %v842_v53 }
 0x31b   : > { %v571_v61 = vpop.permute.xlu1 %570 }
 0x31c   : > { %v578_v62 = vadd.f32 %v571_v61, %v564_v59  ;;  %v579_v63 = vadd.f32 %v571_v61, %v565_v60 }
 0x31e   : > { %v582_v0 = vmul.f32 0.2, %v578_v62  ;;  %v583_v1 = vmul.f32 0.2, %v579_v63 }
 0x320   : > { %v586_v2 = vmax.f32 %v578_v62, %v582_v0  ;;  %v587_v3 = vmax.f32 %v579_v63, %v583_v1 }
 0x322   : > { %v590_v4 = vmul.f32 %v586_v2, %v836_v47  ;;  %v591_v5 = vmul.f32 %v587_v3, %v838_v50 }
 0x324   : > { %v690_v6 = vpack.c.bf16 %v591_v5, %v590_v4 }
 0x326   : > { %606 = vst [vmem:[%s251_s26] sm:$0xff] %v690_v6 }
 0x35f   : > { %v562_v51 = vpop.permute.xlu0 %561 }
 0x360   : > { %v566_v53 = vmul.f32 %v562_v51, %v844_v55  ;;  %v567_v7 = vmul.f32 %v562_v51, %v848_v58 }
 0x363   : > { %v576_v8 = vpop.permute.xlu1 %575 }
 0x364   : > { %v580_v9 = vadd.f32 %v576_v8, %v566_v53  ;;  %v581_v10 = vadd.f32 %v576_v8, %v567_v7 }
 0x366   : > { %v584_v11 = vmul.f32 0.2, %v580_v9  ;;  %v585_v12 = vmul.f32 0.2, %v581_v10 }
 0x368   : > { %v588_v13 = vmax.f32 %v580_v9, %v584_v11  ;;  %v589_v14 = vmax.f32 %v581_v10, %v585_v12 }
 0x36a   : > { %v592_v15 = vmul.f32 %v588_v13, %v836_v47  ;;  %v593_v16 = vmul.f32 %v589_v14, %v838_v50 }
 0x36c   : > { %v691_v17 = vpack.c.bf16 %v593_v16, %v592_v15 }
 0x36e   : > { %607 = vst [vmem:[%s251_s26 + $0x8] sm:$0xff] %v691_v17 }
 0x36f PF: > { %s16_s21 = sadd.s32 1, %s748_s21  }
 0x370   : > { %p13_p4 = scmp.ge.s32.totalorder %s16_s21, 4  }
 0x372   :  { %15 = sbr.rel (!%p13_p4) target bundleno = 1 (0x1), region = 74 }

// kernel: encoder_deep_forward.9
= control target key start
LH: loop header
LB: loop body
LE: loop exit
PB: predicated region body
PF: predicated region fallthrough
CT: control target
= control target key end

     0   :  { %s700_s21 = smov 0   ;;  %s776_s0 = inlined_call_operand.vmem [shape: bf16[2,16,256], index: 0, kind: input, shape index: {}]   ;;  %s777_s1 = inlined_call_operand.vmem [shape: bf16[1,16,144], index: 1, kind: input, shape index: {}]   ;;  %s778_s2 = inlined_call_operand.vmem [shape: f32[16,1], index: 2, kind: input, shape index: {}]   ;;  %s779_s3 = inlined_call_operand.vmem [shape: f32[16,1], index: 3, kind: input, shape index: {}]   ;;  %s780_s4 = inlined_call_operand.vmem [shape: f32[16,1], index: 4, kind: input, shape index: {}]   ;;  %s781_s5 = inlined_call_operand.vmem [shape: f32[1,128], index: 5, kind: input, shape index: {}]   ;;  %s782_s6 = inlined_call_operand.vmem [shape: bf16[2,16,128], index: 6, kind: output, shape index: {}]  }
   0x1 LB: > { %s577_s22 = sadd.s32 4294967295, %s653_s21   ;;  %p581_p0 = scmp.ge.s32.totalorder %s653_s21, 1  ;;  %s653_s21 = sphi %s700_s21, %s16_s21  }
   0x2   : > { %p212_p1 = scmp.lt.s32.totalorder %s653_s21, 3 }
   0x4   : > { %p213_p2 = pnand %p581_p0, %p212_p1 }
   0x5   : > { %p242_p3 = scmp.lt.s32.totalorder (!%p213_p2), %s577_s22, 1  ;;  %v655_v0 = vmov (!%p213_p2), 0   ;;  %s656_s27 = smov (!%p213_p2), 126   ;;  %v642_v3 = vld [vmem:[%s777_s1 + $0x4] ss:$8 sps:$4 sm:$0xff] (!%p213_p2)   ;;  %vm353_vm0 = vcmask (!%p213_p2), 130048  }
   0x6   : > { %216 = sbr.rel (%p213_p2) target bundleno = 876 (0x36c), region = 44  ;;  %357 = vmatprep.subr.bf16.mxu0 (!%p213_p2), %v655_v0  ;;  %635 = vset.pattern.permute.xlu0 (!%p213_p2), %v655_v0  ;;  %s657_s28 = smov (!%p213_p2), 127   ;;  %v254_v4 = vld [vmem:[%s778_s2] sm:$0xff] (!%p213_p2)  ;;  %v255_v5 = vld [vmem:[%s778_s2 + $0x8] sm:$0xff] (!%p213_p2)  ;;  %vm280_vm1 = vcmask (!%p213_p2), 1039360   ;;  %vm287_vm2 = vcmask (!%p213_p2), 1031168  }
   0x7   : > { %636 = vset.pattern.permute.xlu1 (!%p213_p2), %v655_v0  ;;  %s658_s29 = smov (!%p213_p2), 118   ;;  %s659_s30 = smov (!%p213_p2), 117   ;;  %590 = vmatprep.mubr.msk.bf16.mxu0 (!%p213_p2), %vm353_vm0, %v642_v3  ;;  %vm294_vm3 = vcmask (!%p213_p2), 965632   ;;  %vm301_vm4 = vcmask (!%p213_p2), 957440   ;;  %vm308_vm5 = vcmask (!%p213_p2), 949248   ;;  %vm315_vm6 = vcmask (!%p213_p2), 883712  }
   0x8   : > { %s660_s7 = smov (!%p213_p2), 116   ;;  %s661_s8 = smov (!%p213_p2), 108   ;;  %vm322_vm7 = vcmask (!%p213_p2), 875520   ;;  %vm329_vm8 = vcmask (!%p213_p2), 867328   ;;  %v640_v30 = vld [vmem:[%s777_s1] ss:$8 sps:$4 sm:$0xff] (!%p213_p2)  }
   0x9   : > { %s662_s11 = smov (!%p213_p2), 107   ;;  %s663_s12 = smov (!%p213_p2), 106   ;;  %v591_v33 = vld [vmem:[%s781_s5] ss:$0 sm:$0xff] (!%p213_p2) }
   0xd   : > { %s784_s22 = smov (!%p242_p3, %s577_s22), 1 }
   0xe   : > { %s596_s23 = sshll.u32 %s784_s22, 4 }
   0xf   : > { %s246_s26 = scalar_lea.vmem %s776_s0, %s596_s23 }
  0x10   : > { %v637_v1 = vld [vmem:[%s246_s26] ss:$8 sps:$4 sm:$0xff]   ;;  %v639_v2 = vld [vmem:[%s246_s26 + $0x4] ss:$8 sps:$4 sm:$0xff]  }
  0x11   : > { %283 = vrot.lane.b32.xlu1 %v637_v1, %s656_s27  ;;  %276 = vrot.lane.b32.xlu0 %v637_v1, %s657_s28 }
  0x12   : > { %358 = vmatpush1.bf16.msra.mxu0 %v637_v1 }
  0x13   : > { %359 = vmatprep.subr.bf16.mxu0 %v655_v0 }
  0x15   : > { %285 = vrot.lane.b32.xlu1 %v639_v2, %s656_s27  ;;  %278 = vrot.lane.b32.xlu0 %v639_v2, %s657_s28 }
  0x19   : > { %292 = vrot.lane.b32.xlu1 %v639_v2, %s658_s29  ;;  %290 = vrot.lane.b32.xlu0 %v637_v1, %s658_s29  ;;  %s664_s29 = smov 0.0  }
  0x1d   : > { %299 = vrot.lane.b32.xlu1 %v639_v2, %s659_s30  ;;  %297 = vrot.lane.b32.xlu0 %v637_v1, %s659_s30 }
  0x21   : > { %306 = vrot.lane.b32.xlu1 %v639_v2, %s660_s7  ;;  %304 = vrot.lane.b32.xlu0 %v637_v1, %s660_s7 }
  0x25   : > { %313 = vrot.lane.b32.xlu1 %v639_v2, %s661_s8  ;;  %311 = vrot.lane.b32.xlu0 %v637_v1, %s661_s8 }
  0x29   : > { %320 = vrot.lane.b32.xlu1 %v639_v2, %s662_s11  ;;  %318 = vrot.lane.b32.xlu0 %v637_v1, %s662_s11 }
  0x2d   : > { %327 = vrot.lane.b32.xlu1 %v639_v2, %s663_s12  ;;  %325 = vrot.lane.b32.xlu0 %v637_v1, %s663_s12 }
  0x31   : > { %336 = vperm.xlu0 %635, %v254_v4  }
  0x35   : > { %341 = vperm.xlu0 %635, %v255_v5  }
  0x83   : > { %v284_v6 = vpop.permute.xlu1 %283  ;;  %v277_v7 = vpop.permute.xlu0 %276 }
  0x87   : > { %v286_v8 = vpop.permute.xlu1 %285  ;;  %v279_v9 = vpop.permute.xlu0 %278 }
  0x88   : > { %v281_v10 = vsel %vm280_vm1, %v277_v7, %v279_v9  ;;  %v288_v13 = vsel %vm287_vm2, %v284_v6, %v286_v8 }
  0x89   : > { %360 = vmatpush1.bf16.msra.mxu0 %v281_v10  ;;  %v256_v10 = vld [vmem:[%s779_s3] sm:$0xff] }
  0x8a   : > { %361 = vmatprep.subr.bf16.mxu0 %v655_v0 }
  0x8b   : > { %v293_v11 = vpop.permute.xlu1 %292  ;;  %v291_v12 = vpop.permute.xlu0 %290 }
  0x8c   : > { %v295_v14 = vsel %vm294_vm3, %v291_v12, %v293_v11 }
  0x8d   : > { %362 = vmatpush1.bf16.msra.mxu0 %v288_v13 }
  0x8e   : > { %363 = vmatprep.subr.bf16.mxu0 %v655_v0 }
  0x8f   : > { %v300_v15 = vpop.permute.xlu1 %299  ;;  %v298_v16 = vpop.permute.xlu0 %297 }
  0x90   : > { %v302_v17 = vsel %vm301_vm4, %v298_v16, %v300_v15 }
  0x91   : > { %364 = vmatpush1.bf16.msra.mxu0 %v295_v14 }
  0x92   : > { %365 = vmatprep.subr.bf16.mxu0 %v655_v0 }
  0x93   : > { %v307_v18 = vpop.permute.xlu1 %306  ;;  %v305_v19 = vpop.permute.xlu0 %304 }
  0x94   : > { %v309_v20 = vsel %vm308_vm5, %v305_v19, %v307_v18 }
  0x95   : > { %366 = vmatpush1.bf16.msra.mxu0 %v302_v17  ;;  %v257_v17 = vld [vmem:[%s779_s3 + $0x8] sm:$0xff] }
  0x96   : > { %367 = vmatprep.subr.bf16.mxu0 %v655_v0 }
  0x97   : > { %v314_v21 = vpop.permute.xlu1 %313  ;;  %v312_v22 = vpop.permute.xlu0 %311 }
  0x98   : > { %v316_v23 = vsel %vm315_vm6, %v312_v22, %v314_v21  ;;  %v258_v21 = vld [vmem:[%s780_s4] sm:$0xff]  ;;  %v259_v22 = vld [vmem:[%s780_s4 + $0x8] sm:$0xff] }
  0x99   : > { %368 = vmatpush1.bf16.msra.mxu0 %v309_v20 }
  0x9a   : > { %369 = vmatprep.subr.bf16.mxu0 %v655_v0 }
  0x9b   : > { %v321_v24 = vpop.permute.xlu1 %320  ;;  %v319_v25 = vpop.permute.xlu0 %318 }
  0x9c   : > { %v323_v26 = vsel %vm322_vm7, %v319_v25, %v321_v24 }
  0x9d   : > { %370 = vmatpush1.bf16.msra.mxu0 %v316_v23 }
  0x9e   : > { %371 = vmatprep.subr.bf16.mxu0 %v655_v0 }
  0x9f   : > { %v328_v27 = vpop.permute.xlu1 %327  ;;  %v326_v28 = vpop.permute.xlu0 %325 }
  0xa0   : > { %v330_v29 = vsel %vm329_vm8, %v326_v28, %v328_v27 }
  0xa1   : > { %372 = vmatpush1.bf16.msra.mxu0 %v323_v26 }
  0xa2   : > { %373 = vmatprep.subr.bf16.mxu0 %v655_v0 }
  0xa5   : > { %374 = vmatpush1.bf16.msra.mxu0 %v330_v29 }
  0xa8   : > { %390 = vmatmul.mubr.bf16.vlgmr.msra.gmra.mrb[0].mxu0 %v640_v30 }
  0xb0   : > { %v337_v31 = vpop.permute.xlu0 %336 }
  0xb4   : > { %v342_v36 = vpop.permute.xlu0 %341 }
 0x17b   : > { %v391_v32 = vpop.f32.mrb[0].mxu0 }
 0x17c   : > { %v740_v34 = vadd.f32 %v391_v32, %v337_v31  ;;  %v393_v35 = vpop.f32.mrb[1].mxu0 }
 0x17d   : > { %v394_v37 = vpop.f32.mrb[2].mxu0 }
 0x17e   : > { %v742_v38 = vadd.f32 %v394_v37, %v342_v36  ;;  %v396_v39 = vpop.f32.mrb[3].mxu0  ;;  %v404_v40 = vmul.f32 %v591_v33, %v740_v34 }
 0x180   : > { %405 = vadd.xlane.f32.xlu1 %v404_v40  ;;  %v414_v41 = vmul.f32 %v404_v40, %v740_v34  ;;  %v437_v42 = vmul.f32 %v591_v33, %v742_v38 }
 0x182   : > { %415 = vadd.xlane.f32.xlu0 %v414_v41  ;;  %v447_v43 = vmul.f32 %v437_v42, %v742_v38 }
 0x184   : > { %438 = vadd.xlane.f32.xlu1 %v437_v42 }
 0x188   : > { %448 = vadd.xlane.f32.xlu1 %v447_v43 }
 0x20d   : > { %v406_v44 = vpop.xlane.xlu1 %405 }
 0x20e   : > { %v407_v45 = vrot.slane %v406_v44, 4 }
 0x20f   : > { %v416_v46 = vpop.xlane.xlu0 %415 }
 0x210   : > { %v408_v47 = vadd.f32 %v407_v45, %v406_v44  ;;  %v417_v48 = vrot.slane %v416_v46, 4 }
 0x211   : > { %v439_v58 = vpop.xlane.xlu1 %438 }
 0x212   : > { %v409_v49 = vrot.slane %v408_v47, 2  ;;  %v418_v50 = vadd.f32 %v417_v48, %v416_v46  ;;  %v440_v60 = vrot.slane %v439_v58, 4 }
 0x214   : > { %v419_v51 = vrot.slane %v418_v50, 2  ;;  %v410_v52 = vadd.f32 %v409_v49, %v408_v47  ;;  %v441_v62 = vadd.f32 %v440_v60, %v439_v58 }
 0x215   : > { %v449_v59 = vpop.xlane.xlu1 %448 }
 0x216   : > { %v411_v53 = vrot.slane %v410_v52, 1  ;;  %v420_v54 = vadd.f32 %v419_v51, %v418_v50  ;;  %v450_v61 = vrot.slane %v449_v59, 4  ;;  %v442_v0 = vrot.slane %v441_v62, 2 }
 0x218   : > { %v412_v55 = vadd.f32 %v411_v53, %v410_v52  ;;  %v421_v56 = vrot.slane %v420_v54, 1  ;;  %v451_v63 = vadd.f32 %v450_v61, %v449_v59  ;;  %v443_v3 = vadd.f32 %v442_v0, %v441_v62 }
 0x21a   : > { %605 = vpush %v412_v55  ;;  %v422_v57 = vadd.f32 %v421_v56, %v420_v54  ;;  %v452_v1 = vrot.slane %v451_v63, 2  ;;  %v444_v5 = vrot.slane %v443_v3, 1 }
 0x21c   : > { %607 = vpush %v422_v57  ;;  %v453_v4 = vadd.f32 %v452_v1, %v451_v63  ;;  %v445_v8 = vadd.f32 %v444_v5, %v443_v3 }
 0x21e   : > { %v454_v6 = vrot.slane %v453_v4, 1 }
 0x220   : > { %v455_v9 = vadd.f32 %v454_v6, %v453_v4 }
 0x24b   : > { %s606_s23 = spop %605 }
 0x24c   : > { %s748_s24 = smul.f32 0.001953125, %s606_s23 }
 0x24d   : > { %s608_s25 = spop %607 }
 0x24e   : > { %s430_s26 = smul.f32 %s748_s24, %s748_s24  ;;  %v470_v13 = vstv %s748_s24 }
 0x24f   : > { %s429_s27 = smul.f32 0.001953125, %s608_s25 }
 0x251   : > { %s431_s28 = ssub.f32 %s429_s27, %s430_s26 }
 0x253   : > { %s432_s30 = smax.f32 %s664_s29, %s431_s28  ;;  %s597_s28 = sshll.u32 %s784_s22, 3 }
 0x254   : > { %s433_s7 = sadd.f32 1e-05, %s432_s30 }
 0x256   : > { %v434_v2 = vstv %s433_s7  ;;  %s251_s7 = scalar_lea.vmem %s782_s6, %s597_s28 }
 0x257   : > { %643 = vrsqrt.f32 %v434_v2 }
 0x261   : > { %v644_v7 = vpop.eup %643 }
 0x262   : > { %609 = vpush %v644_v7 }
 0x263   : > { %611 = vpush %v445_v8 }
 0x264   : > { %613 = vpush %v455_v9 }
 0x293   : > { %s610_s10 = spop %609 }
 0x294   : > { %v474_v11 = vstv %s610_s10  ;;  %s612_s11 = spop %611 }
 0x295   : > { %v478_v12 = vmul.f32 %v474_v11, %v256_v10  ;;  %s459_s12 = smul.f32 0.001953125, %s612_s11  ;;  %s614_s13 = spop %613 }
 0x296   : > { %s462_s14 = smul.f32 0.001953125, %s614_s13 }
 0x297   : > { %v480_v14 = vmul.f32 %v478_v12, %v470_v13  ;;  %s463_s15 = smul.f32 %s459_s12, %s459_s12  ;;  %486 = vperm.xlu0 %635, %v478_v12   ;;  %v471_v20 = vstv %s459_s12 }
 0x299   : > { %s464_s16 = ssub.f32 %s462_s14, %s463_s15  ;;  %v482_v24 = vsub.f32 %v258_v21, %v480_v14 }
 0x29b   : > { %s465_s17 = smax.f32 %s664_s29, %s464_s16 }
 0x29c   : > { %s466_s18 = sadd.f32 1e-05, %s465_s17 }
 0x29e   : > { %v467_v15 = vstv %s466_s18 }
 0x29f   : > { %645 = vrsqrt.f32 %v467_v15 }
 0x2a9   : > { %v646_v16 = vpop.eup %645 }
 0x2aa   : > { %615 = vpush %v646_v16 }
 0x2db   : > { %s616_s23 = spop %615 }
 0x2dc   : > { %v475_v18 = vstv %s616_s23 }
 0x2dd   : > { %v479_v19 = vmul.f32 %v475_v18, %v257_v17 }
 0x2df   : > { %v481_v23 = vmul.f32 %v479_v19, %v471_v20  ;;  %491 = vperm.xlu1 %636, %v479_v19  }
 0x2e1   : > { %v483_v25 = vsub.f32 %v259_v22, %v481_v23 }
 0x2e3   : > { %498 = vperm.xlu1 %636, %v482_v24   ;;  %503 = vperm.xlu0 %635, %v483_v25  }
 0x316   : > { %v487_v26 = vpop.permute.xlu0 %486 }
 0x317   : > { %v494_v28 = vmul.f32 %v487_v26, %v740_v34 }
 0x35e   : > { %v492_v27 = vpop.permute.xlu1 %491 }
 0x35f   : > { %v495_v29 = vmul.f32 %v492_v27, %v742_v38 }
 0x362   : > { %v499_v30 = vpop.permute.xlu1 %498  ;;  %v504_v31 = vpop.permute.xlu0 %503 }
 0x363   : > { %v506_v32 = vadd.f32 %v499_v30, %v494_v28  ;;  %v507_v33 = vadd.f32 %v504_v31, %v495_v29 }
 0x365   : > { %v508_v35 = vmul.f32 0.2, %v506_v32  ;;  %v509_v36 = vmul.f32 0.2, %v507_v33 }
 0x367   : > { %v510_v37 = vmax.f32 %v506_v32, %v508_v35  ;;  %v511_v39 = vmax.f32 %v507_v33, %v509_v36 }
 0x369   : > { %v603_v40 = vpack.c.bf16 %v511_v39, %v510_v37 }
 0x36b   : > { %604 = vst [vmem:[%s251_s7] sm:$0xff] %v603_v40  }
 0x36c PF: > { %s16_s21 = sadd.s32 1, %s653_s21  }
 0x36d   : > { %p13_p4 = scmp.ge.s32.totalorder %s16_s21, 4  }
 0x36f   :  { %15 = sbr.rel (!%p13_p4) target bundleno = 1 (0x1), region = 74 }

// kernel: encoder_deep_forward.10
= control target key start
LH: loop header
LB: loop body
LE: loop exit
PB: predicated region body
PF: predicated region fallthrough
CT: control target
= control target key end

     0   :  { %s942_s21 = smov 0   ;;  %s1113_s0 = inlined_call_operand.vmem [shape: bf16[2,64,384], index: 0, kind: input, shape index: {}]   ;;  %s1114_s1 = inlined_call_operand.vmem [shape: bf16[1,32,144], index: 1, kind: input, shape index: {}]   ;;  %s1115_s2 = inlined_call_operand.vmem [shape: f32[32,1], index: 2, kind: input, shape index: {}]   ;;  %s1116_s3 = inlined_call_operand.vmem [shape: f32[32,1], index: 3, kind: input, shape index: {}]   ;;  %s1117_s4 = inlined_call_operand.vmem [shape: f32[32,1], index: 4, kind: input, shape index: {}]   ;;  %s1118_s5 = inlined_call_operand.vmem [shape: f32[1,256], index: 5, kind: input, shape index: {}]   ;;  %s1119_s6 = inlined_call_operand.vmem [shape: bf16[2,32,256], index: 6, kind: output, shape index: {}]  }
   0x1 LB: > { %s787_s22 = sadd.s32 4294967295, %s900_s21   ;;  %p791_p0 = scmp.ge.s32.totalorder %s900_s21, 1  ;;  %s900_s21 = sphi %s942_s21, %s16_s21  }
   0x2   : > { %p212_p1 = scmp.lt.s32.totalorder %s900_s21, 3 }
   0x4   : > { %p213_p2 = pnand %p791_p0, %p212_p1 }
   0x5   : > { %p242_p3 = scmp.lt.s32.totalorder (!%p213_p2), %s787_s22, 1  ;;  %s902_s27 = smov (!%p213_p2), 127   ;;  %v886_v9 = vld [vmem:[%s1114_s1 + $0x4] ss:$8 sps:$4 sm:$0xff] (!%p213_p2)   ;;  %vm439_vm0 = vcmask (!%p213_p2), 130048   ;;  %v904_v11 = vmov (!%p213_p2), 0   ;;  %v500_v46 = vlaneseq (!%p213_p2) }
   0x6   : > { %216 = sbr.rel (%p213_p2) target bundleno = 887 (0x377), region = 44  ;;  %s903_s28 = smov (!%p213_p2), 122   ;;  %v889_v10 = vld [vmem:[%s1114_s1 + $0x14] ss:$8 sps:$4 sm:$0xff] (!%p213_p2)   ;;  %810 = vmatprep.mubr.msk.bf16.mxu0 (!%p213_p2), %vm439_vm0, %v886_v9  ;;  %868 = vset.pattern.permute.xlu0 (!%p213_p2), %v904_v11  ;;  %v254_v12 = vld [vmem:[%s1115_s2] sm:$0xff] (!%p213_p2)  ;;  %v255_v13 = vld [vmem:[%s1115_s2 + $0x8] sm:$0xff] (!%p213_p2) }
   0x7   : > { %811 = vmatprep.mubr.msk.bf16.mxu1 (!%p213_p2), %vm439_vm0, %v889_v10  ;;  %867 = vset.pattern.permute.xlu1 (!%p213_p2), %v904_v11  ;;  %s905_s9 = smov (!%p213_p2), 121   ;;  %v256_v14 = vld [vmem:[%s1115_s2 + $0x10] sm:$0xff] (!%p213_p2)  ;;  %v257_v15 = vld [vmem:[%s1115_s2 + $0x18] sm:$0xff] (!%p213_p2)  ;;  %vm320_vm1 = vcmask (!%p213_p2), 1039360   ;;  %vm366_vm2 = vcmask (!%p213_p2), 998400   ;;  %vm392_vm3 = vcmask (!%p213_p2), 990208  }
   0x8   : > { %v884_v43 = vld [vmem:[%s1114_s1] ss:$8 sps:$4 sm:$0xff] (!%p213_p2)   ;;  %v887_v44 = vld [vmem:[%s1114_s1 + $0x10] ss:$8 sps:$4 sm:$0xff] (!%p213_p2)   ;;  %v501_v47 = vshrl.u32 (!%p213_p2), %v500_v46, 7  ;;  %s906_s8 = smov (!%p213_p2), 0.0  }
   0x9   : > { %v253_v50 = vld [vmem:[%s1118_s5] sm:$0x3] (!%p213_p2) }
   0xa   : > { %v502_v49 = vsub.s32 (!%p213_p2), 0, %v501_v47  ;;  %v506_v51 = vsub.s32 (!%p213_p2), 1, %v501_v47 }
   0xc   : > { %v1004_v52 = vrot.slane (!%p213_p2), %v253_v50, %v502_v49  ;;  %v1006_v57 = vrot.slane (!%p213_p2), %v253_v50, %v506_v51 }
   0xd   : > { %s1121_s22 = smov (!%p242_p3, %s787_s22), 1 }
   0xe   : > { %s841_s23 = smul.u32 96, %s1121_s22 }
  0x10   : > { %s956_s26 = scalar_lea.vmem %s1113_s0, %s841_s23 }
  0x11   : > { %v869_v0 = vld [vmem:[%s956_s26 + $0x4] ss:$12 sps:$4 sm:$0xff]   ;;  %v871_v1 = vld [vmem:[%s956_s26] ss:$12 sps:$4 sm:$0xff]   ;;  %v872_v2 = vld [vmem:[%s956_s26 + $0x8] ss:$12 sps:$4 sm:$0xff]  }
  0x12   : > { %316 = vrot.lane.b32.xlu0 %v869_v0, %s902_s27  ;;  %446 = vmatprep.subr.bf16.mxu0 %v869_v0  ;;  %v873_v3 = vld [vmem:[%s956_s26 + $0x34] ss:$12 sps:$4 sm:$0xff]   ;;  %v877_v4 = vld [vmem:[%s956_s26 + $0x1c] ss:$12 sps:$4 sm:$0xff]   ;;  %v875_v5 = vld [vmem:[%s956_s26 + $0x38] ss:$12 sps:$4 sm:$0xff]  }
  0x13   : > { %314 = vrot.lane.b32.xlu1 %v871_v1, %s902_s27  ;;  %823 = vmatprep.subr.bf16.mxu1 %v869_v0  ;;  %v880_v6 = vld [vmem:[%s956_s26 + $0x18] ss:$12 sps:$4 sm:$0xff]   ;;  %v876_v7 = vld [vmem:[%s956_s26 + $0x30] ss:$12 sps:$4 sm:$0xff]   ;;  %v879_v8 = vld [vmem:[%s956_s26 + $0x20] ss:$12 sps:$4 sm:$0xff]  }
  0x14   : > { %447 = vmatpush1.bf16.msra.mxu0 %v871_v1  ;;  %832 = vmatpush1.bf16.msra.mxu1 %v871_v1  ;;  %v881_v23 = vld [vmem:[%s956_s26 + $0x4c] ss:$12 sps:$4 sm:$0xff]   ;;  %v883_v25 = vld [vmem:[%s956_s26 + $0x48] ss:$12 sps:$4 sm:$0xff]  }
  0x15   : > { %448 = vmatprep.subr.bf16.mxu0 %v877_v4  ;;  %824 = vmatprep.subr.bf16.mxu1 %v877_v4 }
  0x16   : > { %318 = vrot.lane.b32.xlu0 %v872_v2, %s902_s27 }
  0x17   : > { %352 = vrot.lane.b32.xlu1 %v873_v3, %s902_s27 }
  0x18   : > { %449 = vmatpush1.bf16.msra.mxu0 %v880_v6  ;;  %833 = vmatpush1.bf16.msra.mxu1 %v880_v6 }
  0x1a   : > { %354 = vrot.lane.b32.xlu0 %v875_v5, %s902_s27 }
  0x1b   : > { %350 = vrot.lane.b32.xlu1 %v876_v7, %s902_s27 }
  0x1e   : > { %362 = vrot.lane.b32.xlu0 %v869_v0, %s903_s28 }
  0x1f   : > { %364 = vrot.lane.b32.xlu1 %v872_v2, %s903_s28 }
  0x22   : > { %360 = vrot.lane.b32.xlu0 %v871_v1, %s903_s28 }
  0x23   : > { %378 = vrot.lane.b32.xlu1 %v877_v4, %s903_s28 }
  0x26   : > { %380 = vrot.lane.b32.xlu0 %v879_v8, %s903_s28 }
  0x27   : > { %376 = vrot.lane.b32.xlu1 %v880_v6, %s903_s28 }
  0x2a   : > { %388 = vrot.lane.b32.xlu0 %v869_v0, %s905_s9 }
  0x2b   : > { %390 = vrot.lane.b32.xlu1 %v872_v2, %s905_s9 }
  0x2e   : > { %386 = vrot.lane.b32.xlu0 %v871_v1, %s905_s9 }
  0x2f   : > { %403 = vperm.xlu1 %867, %v254_v12  }
  0x32   : > { %408 = vperm.xlu0 %868, %v255_v13  }
  0x33   : > { %413 = vperm.xlu1 %867, %v256_v14  }
  0x37   : > { %418 = vperm.xlu1 %867, %v257_v15  }
  0x84   : > { %v317_v16 = vpop.permute.xlu0 %316 }
  0x85   : > { %v315_v17 = vpop.permute.xlu1 %314 }
  0x86   : > { %v321_v21 = vsel %vm320_vm1, %v315_v17, %v317_v16 }
  0x88   : > { %v319_v18 = vpop.permute.xlu0 %318 }
  0x89   : > { %v353_v19 = vpop.permute.xlu1 %352  ;;  %v322_v20 = vsel %vm320_vm1, %v317_v16, %v319_v18 }
  0x8a   : > { %450 = vmatprep.subr.bf16.mxu0 %v322_v20  ;;  %825 = vmatprep.subr.bf16.mxu1 %v322_v20 }
  0x8b   : > { %451 = vmatpush1.bf16.msra.mxu0 %v321_v21  ;;  %834 = vmatpush1.bf16.msra.mxu1 %v321_v21 }
  0x8c   : > { %v355_v22 = vpop.permute.xlu0 %354  ;;  %452 = vmatprep.subr.bf16.mxu0 %v873_v3  ;;  %826 = vmatprep.subr.bf16.mxu1 %v873_v3 }
  0x8d   : > { %v351_v24 = vpop.permute.xlu1 %350  ;;  %v357_v28 = vsel %vm320_vm1, %v353_v19, %v355_v22 }
  0x8e   : > { %v356_v31 = vsel %vm320_vm1, %v351_v24, %v353_v19 }
  0x8f   : > { %453 = vmatpush1.bf16.msra.mxu0 %v876_v7  ;;  %835 = vmatpush1.bf16.msra.mxu1 %v876_v7 }
  0x90   : > { %v363_v26 = vpop.permute.xlu0 %362  ;;  %454 = vmatprep.subr.bf16.mxu0 %v881_v23  ;;  %827 = vmatprep.subr.bf16.mxu1 %v881_v23 }
  0x91   : > { %v365_v27 = vpop.permute.xlu1 %364 }
  0x92   : > { %v368_v32 = vsel %vm366_vm2, %v363_v26, %v365_v27 }
  0x93   : > { %455 = vmatpush1.bf16.msra.mxu0 %v883_v25  ;;  %836 = vmatpush1.bf16.msra.mxu1 %v883_v25 }
  0x94   : > { %v361_v29 = vpop.permute.xlu0 %360  ;;  %456 = vmatprep.subr.bf16.mxu0 %v357_v28  ;;  %828 = vmatprep.subr.bf16.mxu1 %v357_v28 }
  0x95   : > { %v379_v30 = vpop.permute.xlu1 %378  ;;  %v367_v35 = vsel %vm366_vm2, %v361_v29, %v363_v26 }
  0x97   : > { %457 = vmatpush1.bf16.msra.mxu0 %v356_v31  ;;  %837 = vmatpush1.bf16.msra.mxu1 %v356_v31 }
  0x98   : > { %v381_v33 = vpop.permute.xlu0 %380  ;;  %458 = vmatprep.subr.bf16.mxu0 %v368_v32  ;;  %829 = vmatprep.subr.bf16.mxu1 %v368_v32 }
  0x99   : > { %v377_v34 = vpop.permute.xlu1 %376  ;;  %v383_v36 = vsel %vm366_vm2, %v379_v30, %v381_v33 }
  0x9a   : > { %v382_v39 = vsel %vm366_vm2, %v377_v34, %v379_v30 }
  0x9b   : > { %459 = vmatpush1.bf16.msra.mxu0 %v367_v35  ;;  %838 = vmatpush1.bf16.msra.mxu1 %v367_v35 }
  0x9c   : > { %v389_v37 = vpop.permute.xlu0 %388  ;;  %460 = vmatprep.subr.bf16.mxu0 %v383_v36  ;;  %830 = vmatprep.subr.bf16.mxu1 %v383_v36 }
  0x9d   : > { %v391_v38 = vpop.permute.xlu1 %390 }
  0x9e   : > { %v394_v40 = vsel %vm392_vm3, %v389_v37, %v391_v38 }
  0x9f   : > { %461 = vmatpush1.bf16.msra.mxu0 %v382_v39  ;;  %839 = vmatpush1.bf16.msra.mxu1 %v382_v39 }
  0xa0   : > { %v387_v41 = vpop.permute.xlu0 %386  ;;  %462 = vmatprep.subr.bf16.mxu0 %v394_v40  ;;  %831 = vmatprep.subr.bf16.mxu1 %v394_v40 }
  0xa1   : > { %v393_v42 = vsel %vm392_vm3, %v387_v41, %v389_v37 }
  0xa3   : > { %463 = vmatpush1.bf16.msra.mxu0 %v393_v42  ;;  %840 = vmatpush1.bf16.msra.mxu1 %v393_v42 }
  0xa6   : > { %479 = vmatmul.mubr.bf16.vlgmr.msra.gmra.mrb[0].mxu0 %v884_v43  ;;  %489 = vmatmul.mubr.bf16.vlgmr.msra.gmra.mrb[0].mxu1 %v887_v44 }
  0xae   : > { %v404_v45 = vpop.permute.xlu1 %403 }
  0xb1   : > { %v409_v54 = vpop.permute.xlu0 %408 }
  0xb2   : > { %v414_v48 = vpop.permute.xlu1 %413 }
  0xb6   : > { %v419_v53 = vpop.permute.xlu1 %418 }
 0x179   : > { %v480_v55 = vpop.f32.mrb[0].mxu0  ;;  %v490_v56 = vpop.f32.mrb[0].mxu1 }
 0x17a   : > { %v1008_v58 = vadd.f32 %v480_v55, %v404_v45  ;;  %v1010_v59 = vadd.f32 %v490_v56, %v414_v48  ;;  %v482_v60 = vpop.f32.mrb[1].mxu0  ;;  %v492_v61 = vpop.f32.mrb[1].mxu1 }
 0x17b   : > { %v1012_v62 = vadd.f32 %v482_v60, %v404_v45  ;;  %v1014_v63 = vadd.f32 %v492_v61, %v414_v48  ;;  %v484_v0 = vpop.f32.mrb[2].mxu0  ;;  %v494_v1 = vpop.f32.mrb[2].mxu1 }
 0x17c   : > { %v510_v2 = vmul.f32 %v1004_v52, %v1008_v58  ;;  %v555_v3 = vmul.f32 %v1004_v52, %v1010_v59  ;;  %v1020_v4 = vadd.f32 %v484_v0, %v409_v54  ;;  %v1022_v5 = vadd.f32 %v494_v1, %v419_v53  ;;  %v486_v6 = vpop.f32.mrb[3].mxu0  ;;  %v496_v7 = vpop.f32.mrb[3].mxu1 }
 0x17d   : > { %v511_v8 = vmul.f32 %v1006_v57, %v1012_v62  ;;  %v556_v9 = vmul.f32 %v1006_v57, %v1014_v63  ;;  %v1028_v10 = vadd.f32 %v486_v6, %v409_v54  ;;  %v1041_v21 = vadd.f32 %v496_v7, %v419_v53 }
 0x17e   : > { %v526_v11 = vmul.f32 %v510_v2, %v1008_v58  ;;  %v571_v12 = vmul.f32 %v555_v3, %v1010_v59  ;;  %v512_v13 = vmul.f32 %v1004_v52, %v1020_v4  ;;  %v557_v14 = vmul.f32 %v1004_v52, %v1022_v5 }
 0x17f   : > { %v527_v15 = vmul.f32 %v511_v8, %v1012_v62  ;;  %v572_v16 = vmul.f32 %v556_v9, %v1014_v63  ;;  %v513_v17 = vmul.f32 %v1006_v57, %v1028_v10  ;;  %v514_v18 = vadd.f32 %v511_v8, %v510_v2 }
 0x180   : > { %v528_v19 = vmul.f32 %v512_v13, %v1020_v4  ;;  %v559_v20 = vadd.f32 %v556_v9, %v555_v3  ;;  %v573_v24 = vmul.f32 %v557_v14, %v1022_v5  ;;  %v558_v31 = vmul.f32 %v1006_v57, %v1041_v21 }
 0x181   : > { %v515_v22 = vadd.f32 %v514_v18, %v512_v13  ;;  %v530_v23 = vadd.f32 %v527_v15, %v526_v11  ;;  %v529_v25 = vmul.f32 %v513_v17, %v1028_v10  ;;  %v575_v29 = vadd.f32 %v572_v16, %v571_v12  ;;  %v258_v11 = vld [vmem:[%s1116_s3] sm:$0xff]  ;;  %v259_v12 = vld [vmem:[%s1116_s3 + $0x8] sm:$0xff] }
 0x182   : > { %v560_v28 = vadd.f32 %v559_v20, %v557_v14  ;;  %v574_v34 = vmul.f32 %v558_v31, %v1041_v21  ;;  %v262_v18 = vld [vmem:[%s1117_s4] sm:$0xff] }
 0x183   : > { %v516_v26 = vadd.f32 %v515_v22, %v513_v17  ;;  %v531_v27 = vadd.f32 %v530_v23, %v528_v19  ;;  %v576_v33 = vadd.f32 %v575_v29, %v573_v24  ;;  %v263_v17 = vld [vmem:[%s1117_s4 + $0x8] sm:$0xff] }
 0x184   : > { %v561_v32 = vadd.f32 %v560_v28, %v558_v31 }
 0x185   : > { %517 = vadd.xlane.f32.xlu0 %v516_v26  ;;  %v532_v30 = vadd.f32 %v531_v27, %v529_v25  ;;  %v577_v35 = vadd.f32 %v576_v33, %v574_v34  ;;  %v260_v26 = vld [vmem:[%s1116_s3 + $0x10] sm:$0xff]  ;;  %v261_v27 = vld [vmem:[%s1116_s3 + $0x18] sm:$0xff] }
 0x187   : > { %533 = vadd.xlane.f32.xlu1 %v532_v30 }
 0x189   : > { %562 = vadd.xlane.f32.xlu0 %v561_v32  ;;  %v264_v32 = vld [vmem:[%s1117_s4 + $0x10] sm:$0xff] }
 0x18d   : > { %578 = vadd.xlane.f32.xlu0 %v577_v35 }
 0x212   : > { %v518_v36 = vpop.xlane.xlu0 %517 }
 0x213   : > { %v519_v37 = vrot.slane %v518_v36, 4 }
 0x214   : > { %v534_v38 = vpop.xlane.xlu1 %533 }
 0x215   : > { %v520_v39 = vadd.f32 %v519_v37, %v518_v36  ;;  %v535_v40 = vrot.slane %v534_v38, 4  ;;  %v265_v36 = vld [vmem:[%s1117_s4 + $0x18] sm:$0xff] }
 0x216   : > { %v563_v50 = vpop.xlane.xlu0 %562 }
 0x217   : > { %v521_v41 = vrot.slane %v520_v39, 2  ;;  %v536_v42 = vadd.f32 %v535_v40, %v534_v38  ;;  %v564_v53 = vrot.slane %v563_v50, 4 }
 0x219   : > { %v537_v43 = vrot.slane %v536_v42, 2  ;;  %v522_v44 = vadd.f32 %v521_v41, %v520_v39  ;;  %v565_v55 = vadd.f32 %v564_v53, %v563_v50 }
 0x21a   : > { %v579_v51 = vpop.xlane.xlu0 %578 }
 0x21b   : > { %v523_v45 = vrot.slane %v522_v44, 1  ;;  %v538_v46 = vadd.f32 %v537_v43, %v536_v42  ;;  %v580_v54 = vrot.slane %v579_v51, 4  ;;  %v566_v60 = vrot.slane %v565_v55, 2 }
 0x21d   : > { %v524_v47 = vadd.f32 %v523_v45, %v522_v44  ;;  %v539_v48 = vrot.slane %v538_v46, 1  ;;  %v581_v56 = vadd.f32 %v580_v54, %v579_v51  ;;  %v567_v1 = vadd.f32 %v566_v60, %v565_v55 }
 0x21f   : > { %842 = vpush %v524_v47  ;;  %v540_v49 = vadd.f32 %v539_v48, %v538_v46  ;;  %v582_v61 = vrot.slane %v581_v56, 2  ;;  %v568_v3 = vrot.slane %v567_v1, 1 }
 0x221   : > { %844 = vpush %v540_v49  ;;  %v583_v2 = vadd.f32 %v582_v61, %v581_v56  ;;  %v569_v8 = vadd.f32 %v568_v3, %v567_v1 }
 0x223   : > { %v584_v6 = vrot.slane %v583_v2, 1 }
 0x225   : > { %v585_v9 = vadd.f32 %v584_v6, %v583_v2 }
 0x250   : > { %s843_s26 = spop %842 }
 0x251   : > { %s1048_s27 = smul.f32 0.00390625, %s843_s26 }
 0x252   : > { %s845_s28 = spop %844 }
 0x253   : > { %s548_s29 = smul.f32 %s1048_s27, %s1048_s27  ;;  %v600_v16 = vstv %s1048_s27 }
 0x254   : > { %s547_s30 = smul.f32 0.00390625, %s845_s28 }
 0x256   : > { %s549_s7 = ssub.f32 %s547_s30, %s548_s29 }
 0x258   : > { %s550_s9 = smax.f32 %s906_s8, %s549_s7 }
 0x259   : > { %s551_s10 = sadd.f32 1e-05, %s550_s9 }
 0x25b   : > { %v552_v0 = vstv %s551_s10 }
 0x25c   : > { %890 = vrsqrt.f32 %v552_v0 }
 0x266   : > { %v891_v7 = vpop.eup %890 }
 0x267   : > { %846 = vpush %v891_v7 }
 0x268   : > { %848 = vpush %v569_v8 }
 0x269   : > { %850 = vpush %v585_v9 }
 0x298   : > { %s847_s15 = spop %846 }
 0x299   : > { %v606_v13 = vstv %s847_s15  ;;  %s849_s16 = spop %848  ;;  %s818_s15 = sshll.u32 %s1121_s22, 5 }
 0x29a   : > { %v612_v14 = vmul.f32 %v606_v13, %v258_v11  ;;  %v613_v15 = vmul.f32 %v606_v13, %v259_v12  ;;  %s1059_s17 = smul.f32 0.00390625, %s849_s16  ;;  %s851_s18 = spop %850 }
 0x29b   : > { %s592_s19 = smul.f32 0.00390625, %s851_s18  ;;  %s1095_s18 = scalar_lea.vmem %s1119_s6, %s818_s15 }
 0x29c   : > { %v616_v19 = vmul.f32 %v612_v14, %v600_v16  ;;  %v617_v20 = vmul.f32 %v613_v15, %v600_v16  ;;  %s593_s26 = smul.f32 %s1059_s17, %s1059_s17  ;;  %631 = vperm.xlu0 %868, %v613_v15   ;;  %626 = vperm.xlu1 %867, %v612_v14   ;;  %v601_v31 = vstv %s1059_s17 }
 0x29e   : > { %s594_s28 = ssub.f32 %s592_s19, %s593_s26  ;;  %v621_v22 = vsub.f32 %v263_v17, %v617_v20  ;;  %v620_v23 = vsub.f32 %v262_v18, %v616_v19 }
 0x2a0   : > { %s595_s27 = smax.f32 %s906_s8, %s594_s28  ;;  %659 = vperm.xlu1 %867, %v621_v22   ;;  %654 = vperm.xlu0 %868, %v620_v23  }
 0x2a1   : > { %s596_s29 = sadd.f32 1e-05, %s595_s27 }
 0x2a3   : > { %v597_v24 = vstv %s596_s29 }
 0x2a4   : > { %892 = vrsqrt.f32 %v597_v24 }
 0x2ae   : > { %v893_v25 = vpop.eup %892 }
 0x2af   : > { %852 = vpush %v893_v25 }
 0x2e0   : > { %s853_s11 = spop %852 }
 0x2e1   : > { %v607_v28 = vstv %s853_s11 }
 0x2e2   : > { %v614_v29 = vmul.f32 %v607_v28, %v260_v26  ;;  %v615_v30 = vmul.f32 %v607_v28, %v261_v27 }
 0x2e4   : > { %v618_v33 = vmul.f32 %v614_v29, %v601_v31  ;;  %636 = vperm.xlu1 %867, %v614_v29   ;;  %v619_v34 = vmul.f32 %v615_v30, %v601_v31 }
 0x2e6   : > { %v622_v35 = vsub.f32 %v264_v32, %v618_v33  ;;  %v623_v37 = vsub.f32 %v265_v36, %v619_v34 }
 0x2e8   : > { %641 = vperm.xlu1 %867, %v615_v30   ;;  %664 = vperm.xlu0 %868, %v622_v35  }
 0x2ec   : > { %669 = vperm.xlu1 %867, %v623_v37  }
 0x31b   : > { %v627_v38 = vpop.permute.xlu1 %626  ;;  %v632_v39 = vpop.permute.xlu0 %631 }
 0x31c   : > { %v644_v40 = vmul.f32 %v627_v38, %v1008_v58  ;;  %v645_v41 = vmul.f32 %v627_v38, %v1012_v62  ;;  %v646_v42 = vmul.f32 %v632_v39, %v1020_v4  ;;  %v647_v43 = vmul.f32 %v632_v39, %v1028_v10 }
 0x31f   : > { %v660_v44 = vpop.permute.xlu1 %659  ;;  %v655_v45 = vpop.permute.xlu0 %654 }
 0x320   : > { %v674_v46 = vadd.f32 %v660_v44, %v646_v42  ;;  %v675_v47 = vadd.f32 %v660_v44, %v647_v43  ;;  %v672_v48 = vadd.f32 %v655_v45, %v644_v40  ;;  %v673_v49 = vadd.f32 %v655_v45, %v645_v41 }
 0x322   : > { %v682_v50 = vmul.f32 0.2, %v674_v46  ;;  %v683_v51 = vmul.f32 0.2, %v675_v47  ;;  %v680_v53 = vmul.f32 0.2, %v672_v48 }
 0x323   : > { %v681_v54 = vmul.f32 0.2, %v673_v49 }
 0x324   : > { %v690_v55 = vmax.f32 %v674_v46, %v682_v50  ;;  %v691_v56 = vmax.f32 %v675_v47, %v683_v51  ;;  %v688_v58 = vmax.f32 %v672_v48, %v680_v53 }
 0x325   : > { %v689_v60 = vmax.f32 %v673_v49, %v681_v54 }
 0x326   : > { %v698_v62 = vmul.f32 %v690_v55, %v1004_v52  ;;  %v699_v4 = vmul.f32 %v691_v56, %v1006_v57  ;;  %v696_v10 = vmul.f32 %v688_v58, %v1004_v52 }
 0x327   : > { %v697_v61 = vmul.f32 %v689_v60, %v1006_v57 }
 0x328   : > { %v820_v0 = vpack.c.bf16 %v699_v4, %v698_v62 }
 0x329   : > { %v819_v1 = vpack.c.bf16 %v697_v61, %v696_v10 }
 0x32a   : > { %729 = vst [vmem:[%s1095_s18 + $0x8] sm:$0xff] %v820_v0 }
 0x32b   : > { %728 = vst [vmem:[%s1095_s18] sm:$0xff] %v819_v1 }
 0x363   : > { %v637_v2 = vpop.permute.xlu1 %636 }
 0x364   : > { %v648_v3 = vmul.f32 %v637_v2, %v1010_v59  ;;  %v649_v6 = vmul.f32 %v637_v2, %v1014_v63 }
 0x367   : > { %v642_v7 = vpop.permute.xlu1 %641  ;;  %v665_v8 = vpop.permute.xlu0 %664 }
 0x368   : > { %v676_v9 = vadd.f32 %v665_v8, %v648_v3  ;;  %v677_v11 = vadd.f32 %v665_v8, %v649_v6  ;;  %v650_v12 = vmul.f32 %v642_v7, %v1022_v5  ;;  %v651_v13 = vmul.f32 %v642_v7, %v1041_v21 }
 0x36a   : > { %v684_v14 = vmul.f32 0.2, %v676_v9  ;;  %v685_v15 = vmul.f32 0.2, %v677_v11 }
 0x36b   : > { %v670_v16 = vpop.permute.xlu1 %669 }
 0x36c   : > { %v692_v17 = vmax.f32 %v676_v9, %v684_v14  ;;  %v693_v18 = vmax.f32 %v677_v11, %v685_v15  ;;  %v678_v19 = vadd.f32 %v670_v16, %v650_v12  ;;  %v679_v20 = vadd.f32 %v670_v16, %v651_v13 }
 0x36e   : > { %v700_v59 = vmul.f32 %v692_v17, %v1004_v52  ;;  %v701_v63 = vmul.f32 %v693_v18, %v1006_v57  ;;  %v686_v22 = vmul.f32 0.2, %v678_v19  ;;  %v687_v23 = vmul.f32 0.2, %v679_v20 }
 0x370   : > { %v821_v24 = vpack.c.bf16 %v701_v63, %v700_v59  ;;  %v694_v25 = vmax.f32 %v678_v19, %v686_v22  ;;  %v695_v5 = vmax.f32 %v679_v20, %v687_v23 }
 0x372   : > { %730 = vst [vmem:[%s1095_s18 + $0x10] sm:$0xff] %v821_v24  ;;  %v702_v21 = vmul.f32 %v694_v25, %v1004_v52  ;;  %v703_v26 = vmul.f32 %v695_v5, %v1006_v57 }
 0x374   : > { %v822_v27 = vpack.c.bf16 %v703_v26, %v702_v21 }
 0x376   : > { %731 = vst [vmem:[%s1095_s18 + $0x18] sm:$0xff] %v822_v27 }
 0x377 PF: > { %s16_s21 = sadd.s32 1, %s900_s21  }
 0x378   : > { %p13_p4 = scmp.ge.s32.totalorder %s16_s21, 4  }
 0x37a   :  { %15 = sbr.rel (!%p13_p4) target bundleno = 1 (0x1), region = 74 }

// kernel: encoder_deep_forward.11
= control target key start
LH: loop header
LB: loop body
LE: loop exit
PB: predicated region body
PF: predicated region fallthrough
CT: control target
= control target key end

     0   :  { %s987_s21 = smov 0   ;;  %s1123_s0 = inlined_call_operand.vmem [shape: bf16[2,32,256], index: 0, kind: input, shape index: {}]   ;;  %s1124_s1 = inlined_call_operand.vmem [shape: bf16[1,32,288], index: 1, kind: input, shape index: {}]   ;;  %s1125_s2 = inlined_call_operand.vmem [shape: f32[32,1], index: 2, kind: input, shape index: {}]   ;;  %s1126_s3 = inlined_call_operand.vmem [shape: f32[32,1], index: 3, kind: input, shape index: {}]   ;;  %s1127_s4 = inlined_call_operand.vmem [shape: f32[32,1], index: 4, kind: input, shape index: {}]   ;;  %s1128_s5 = inlined_call_operand.vmem [shape: f32[1,128], index: 5, kind: input, shape index: {}]   ;;  %s1129_s6 = inlined_call_operand.vmem [shape: bf16[2,32,128], index: 6, kind: output, shape index: {}]  }
   0x1 LB: > { %s799_s22 = sadd.s32 4294967295, %s940_s21   ;;  %p803_p0 = scmp.ge.s32.totalorder %s940_s21, 1  ;;  %s940_s21 = sphi %s987_s21, %s16_s21  }
   0x2   : > { %p212_p1 = scmp.lt.s32.totalorder %s940_s21, 3 }
   0x4   : > { %p213_p2 = pnand %p803_p0, %p212_p1 }
   0x5   : > { %p242_p3 = scmp.lt.s32.totalorder (!%p213_p2), %s799_s22, 1  ;;  %s942_s27 = smov (!%p213_p2), 121   ;;  %v924_v4 = vld [vmem:[%s1124_s1 + $0x4] ss:$12 sps:$4 sm:$0xff] (!%p213_p2)   ;;  %v925_v5 = vld [vmem:[%s1124_s1 + $0x8] ss:$12 sps:$4 sm:$0xff] (!%p213_p2)  }
   0x6   : > { %216 = sbr.rel (%p213_p2) target bundleno = 910 (0x38e), region = 44  ;;  %s943_s28 = smov (!%p213_p2), 120   ;;  %498 = vmatprep.mubr.bf16.mxu0 (!%p213_p2), %v924_v4  ;;  %vm459_vm0 = vcmask (!%p213_p2), 261120   ;;  %v950_v6 = vmov (!%p213_p2), 0   ;;  %v255_v7 = vld [vmem:[%s1125_s2 + $0x8] sm:$0xff] (!%p213_p2)  ;;  %v254_v8 = vld [vmem:[%s1125_s2] sm:$0xff] (!%p213_p2) }
   0x7   : > { %s944_s29 = smov (!%p213_p2), 127   ;;  %s945_s30 = smov (!%p213_p2), 116   ;;  %880 = vmatprep.mubr.msk.bf16.mxu1 (!%p213_p2), %vm459_vm0, %v925_v5  ;;  %915 = vset.pattern.permute.xlu1 (!%p213_p2), %v950_v6  ;;  %v256_v9 = vld [vmem:[%s1125_s2 + $0x10] sm:$0xff] (!%p213_p2)  ;;  %v257_v10 = vld [vmem:[%s1125_s2 + $0x18] sm:$0xff] (!%p213_p2)  ;;  %vm344_vm1 = vcmask (!%p213_p2), 990208   ;;  %vm357_vm2 = vcmask (!%p213_p2), 982016  }
   0x8   : > { %s946_s7 = smov (!%p213_p2), 126   ;;  %s947_s8 = smov (!%p213_p2), 115   ;;  %914 = vset.pattern.permute.xlu0 (!%p213_p2), %v950_v6  ;;  %vm305_vm3 = vcmask (!%p213_p2), 1039360   ;;  %vm370_vm4 = vcmask (!%p213_p2), 949248   ;;  %vm318_vm5 = vcmask (!%p213_p2), 1031168   ;;  %vm383_vm6 = vcmask (!%p213_p2), 941056  }
   0x9   : > { %s948_s9 = smov (!%p213_p2), 122   ;;  %s949_s14 = smov (!%p213_p2), 114   ;;  %vm331_vm7 = vcmask (!%p213_p2), 998400   ;;  %vm396_vm8 = vcmask (!%p213_p2), 932864   ;;  %v922_v56 = vld [vmem:[%s1124_s1] ss:$12 sps:$4 sm:$0xff] (!%p213_p2)  }
   0xa   : > { %v927_v57 = vld [vmem:[%s1124_s1 + $0x1c] ss:$12 sps:$4 sm:$0xff] (!%p213_p2)   ;;  %v926_v61 = vld [vmem:[%s1124_s1 + $0x20] ss:$12 sps:$4 sm:$0xff] (!%p213_p2)   ;;  %v929_v62 = vld [vmem:[%s1124_s1 + $0x18] ss:$12 sps:$4 sm:$0xff] (!%p213_p2)  }
   0xb   : > { %s951_s17 = smov (!%p213_p2), 0.0  }
   0xd   : > { %s1131_s22 = smov (!%p242_p3, %s799_s22), 1 }
   0xe   : > { %s827_s23 = sshll.u32 %s1131_s22, 5 }
   0xf   : > { %s246_s26 = scalar_lea.vmem %s1123_s0, %s827_s23 }
  0x10   : > { %v1001_v0 = vld [vmem:[%s246_s26 + $0x10] ss:$8 sps:$4 sm:$0xff]   ;;  %v1003_v1 = vld [vmem:[%s246_s26] ss:$8 sps:$4 sm:$0xff]   ;;  %v920_v2 = vld [vmem:[%s246_s26 + $0x14] ss:$8 sps:$4 sm:$0xff]  }
  0x11   : > { %340 = vrot.lane.b32.xlu1 %v1001_v0, %s942_s27  ;;  %336 = vrot.lane.b32.xlu0 %v1003_v1, %s942_s27  ;;  %v921_v3 = vld [vmem:[%s246_s26 + $0x4] ss:$8 sps:$4 sm:$0xff]  }
  0x15   : > { %342 = vrot.lane.b32.xlu1 %v920_v2, %s942_s27  ;;  %338 = vrot.lane.b32.xlu0 %v921_v3, %s942_s27 }
  0x19   : > { %351 = vrot.lane.b32.xlu1 %v921_v3, %s943_s28  ;;  %349 = vrot.lane.b32.xlu0 %v1003_v1, %s943_s28 }
  0x1d   : > { %299 = vrot.lane.b32.xlu1 %v921_v3, %s944_s29  ;;  %297 = vrot.lane.b32.xlu0 %v1003_v1, %s944_s29 }
  0x21   : > { %355 = vrot.lane.b32.xlu1 %v920_v2, %s943_s28  ;;  %353 = vrot.lane.b32.xlu0 %v1001_v0, %s943_s28 }
  0x25   : > { %303 = vrot.lane.b32.xlu1 %v920_v2, %s944_s29  ;;  %301 = vrot.lane.b32.xlu0 %v1001_v0, %s944_s29 }
  0x29   : > { %364 = vrot.lane.b32.xlu1 %v921_v3, %s945_s30  ;;  %362 = vrot.lane.b32.xlu0 %v1003_v1, %s945_s30 }
  0x2d   : > { %312 = vrot.lane.b32.xlu1 %v921_v3, %s946_s7  ;;  %310 = vrot.lane.b32.xlu0 %v1003_v1, %s946_s7 }
  0x31   : > { %368 = vrot.lane.b32.xlu1 %v920_v2, %s945_s30  ;;  %366 = vrot.lane.b32.xlu0 %v1001_v0, %s945_s30 }
  0x35   : > { %316 = vrot.lane.b32.xlu1 %v920_v2, %s946_s7  ;;  %314 = vrot.lane.b32.xlu0 %v1001_v0, %s946_s7 }
  0x39   : > { %377 = vrot.lane.b32.xlu1 %v921_v3, %s947_s8  ;;  %375 = vrot.lane.b32.xlu0 %v1003_v1, %s947_s8 }
  0x3d   : > { %325 = vrot.lane.b32.xlu1 %v921_v3, %s948_s9  ;;  %323 = vrot.lane.b32.xlu0 %v1003_v1, %s948_s9 }
  0x41   : > { %381 = vrot.lane.b32.xlu1 %v920_v2, %s947_s8  ;;  %379 = vrot.lane.b32.xlu0 %v1001_v0, %s947_s8 }
  0x45   : > { %390 = vrot.lane.b32.xlu1 %v921_v3, %s949_s14  ;;  %388 = vrot.lane.b32.xlu0 %v1003_v1, %s949_s14 }
  0x49   : > { %329 = vrot.lane.b32.xlu1 %v920_v2, %s948_s9  ;;  %327 = vrot.lane.b32.xlu0 %v1001_v0, %s948_s9 }
  0x4d   : > { %394 = vrot.lane.b32.xlu1 %v920_v2, %s949_s14  ;;  %392 = vrot.lane.b32.xlu0 %v1001_v0, %s949_s14 }
  0x51   : > { %416 = vperm.xlu1 %915, %v255_v7   ;;  %411 = vperm.xlu0 %914, %v254_v8  }
  0x55   : > { %421 = vperm.xlu1 %915, %v256_v9   ;;  %426 = vperm.xlu0 %914, %v257_v10  }
  0x83   : > { %v341_v11 = vpop.permute.xlu1 %340  ;;  %v337_v12 = vpop.permute.xlu0 %336 }
  0x87   : > { %v343_v13 = vpop.permute.xlu1 %342  ;;  %v339_v14 = vpop.permute.xlu0 %338 }
  0x88   : > { %v345_v15 = vsel %vm344_vm1, %v337_v12, %v339_v14  ;;  %v346_v17 = vsel %vm344_vm1, %v341_v11, %v343_v13  ;;  %v820_v11 = vld [vmem:[%s1128_s5] ss:$0 sm:$0xff] }
  0x89   : > { %844 = vmatprep.subr.bf16.mxu0 %v345_v15 }
  0x8a   : > { %845 = vmatpush3.bf16.msra.mxu0 %v1003_v1 }
  0x8b   : > { %v352_v16 = vpop.permute.xlu1 %351  ;;  %846 = vmatprep.subr.bf16.mxu0 %v346_v17  ;;  %v350_v18 = vpop.permute.xlu0 %349 }
  0x8c   : > { %v358_v20 = vsel %vm357_vm2, %v350_v18, %v352_v16 }
  0x8e   : > { %847 = vmatpush3.bf16.msra.mxu0 %v1001_v0 }
  0x8f   : > { %v300_v19 = vpop.permute.xlu1 %299  ;;  %848 = vmatprep.subr.bf16.mxu0 %v358_v20  ;;  %v298_v21 = vpop.permute.xlu0 %297 }
  0x90   : > { %v306_v22 = vsel %vm305_vm3, %v298_v21, %v300_v19 }
  0x92   : > { %849 = vmatpush3.bf16.msra.mxu0 %v306_v22 }
  0x93   : > { %v356_v23 = vpop.permute.xlu1 %355  ;;  %v354_v24 = vpop.permute.xlu0 %353 }
  0x94   : > { %v359_v25 = vsel %vm357_vm2, %v354_v24, %v356_v23 }
  0x95   : > { %850 = vmatprep.subr.bf16.mxu0 %v359_v25 }
  0x97   : > { %v304_v26 = vpop.permute.xlu1 %303  ;;  %v302_v27 = vpop.permute.xlu0 %301 }
  0x98   : > { %v307_v28 = vsel %vm305_vm3, %v302_v27, %v304_v26 }
  0x99   : > { %851 = vmatpush3.bf16.msra.mxu0 %v307_v28 }
  0x9b   : > { %v365_v29 = vpop.permute.xlu1 %364  ;;  %v363_v30 = vpop.permute.xlu0 %362 }
  0x9c   : > { %v371_v31 = vsel %vm370_vm4, %v363_v30, %v365_v29 }
  0x9d   : > { %852 = vmatprep.subr.bf16.mxu0 %v371_v31 }
  0x9f   : > { %v313_v32 = vpop.permute.xlu1 %312  ;;  %v311_v33 = vpop.permute.xlu0 %310 }
  0xa0   : > { %v319_v34 = vsel %vm318_vm5, %v311_v33, %v313_v32 }
  0xa1   : > { %853 = vmatpush3.bf16.msra.mxu0 %v319_v34 }
  0xa3   : > { %v369_v35 = vpop.permute.xlu1 %368  ;;  %v367_v36 = vpop.permute.xlu0 %366 }
  0xa4   : > { %v372_v37 = vsel %vm370_vm4, %v367_v36, %v369_v35 }
  0xa5   : > { %854 = vmatprep.subr.bf16.mxu0 %v372_v37 }
  0xa7   : > { %v317_v38 = vpop.permute.xlu1 %316  ;;  %v315_v39 = vpop.permute.xlu0 %314 }
  0xa8   : > { %v320_v40 = vsel %vm318_vm5, %v315_v39, %v317_v38 }
  0xa9   : > { %855 = vmatpush3.bf16.msra.mxu0 %v320_v40 }
  0xab   : > { %v378_v41 = vpop.permute.xlu1 %377  ;;  %v376_v42 = vpop.permute.xlu0 %375 }
  0xac   : > { %v384_v43 = vsel %vm383_vm6, %v376_v42, %v378_v41 }
  0xad   : > { %856 = vmatprep.subr.bf16.mxu0 %v384_v43 }
  0xaf   : > { %v326_v44 = vpop.permute.xlu1 %325  ;;  %v324_v45 = vpop.permute.xlu0 %323 }
  0xb0   : > { %v332_v46 = vsel %vm331_vm7, %v324_v45, %v326_v44 }
  0xb1   : > { %857 = vmatpush3.bf16.msra.mxu0 %v332_v46 }
  0xb3   : > { %v382_v47 = vpop.permute.xlu1 %381  ;;  %v380_v48 = vpop.permute.xlu0 %379 }
  0xb4   : > { %v385_v49 = vsel %vm383_vm6, %v380_v48, %v382_v47 }
  0xb5   : > { %858 = vmatprep.subr.bf16.mxu0 %v385_v49 }
  0xb7   : > { %v391_v50 = vpop.permute.xlu1 %390  ;;  %v389_v51 = vpop.permute.xlu0 %388 }
  0xb8   : > { %v397_v52 = vsel %vm396_vm8, %v389_v51, %v391_v50 }
  0xb9   : > { %876 = vmatprep.subr.bf16.mxu1 %v397_v52 }
  0xba   : > { %877 = vmatpush3.bf16.msra.mxu1 %v397_v52 }
  0xbb   : > { %v330_v53 = vpop.permute.xlu1 %329  ;;  %v328_v54 = vpop.permute.xlu0 %327 }
  0xbc   : > { %v333_v55 = vsel %vm331_vm7, %v328_v54, %v330_v53 }
  0xbd   : > { %859 = vmatpush3.bf16.msra.mxu0 %v333_v55 }
  0xbf   : > { %v395_v58 = vpop.permute.xlu1 %394  ;;  %v393_v59 = vpop.permute.xlu0 %392 }
  0xc0   : > { %499 = vmatmul.mubr.bf16.vlgmr.msra.gmra.mrb[0].mxu0 %v922_v56  ;;  %v398_v60 = vsel %vm396_vm8, %v393_v59, %v395_v58 }
  0xc1   : > { %878 = vmatprep.subr.bf16.mxu1 %v398_v60  ;;  %506 = vmatprep.mubr.bf16.mxu0 %v927_v57 }
  0xc2   : > { %879 = vmatpush3.bf16.msra.mxu1 %v398_v60 }
  0xc5   : > { %881 = vmatmul.mubr.msk.bf16.vlgmr.msra.gmra.mrb[0].mxu1 %vm459_vm0, %v926_v61 }
  0xc8   : > { %507 = vmatmul.mubr.bf16.gmra.mrb[4].mxu0 %v929_v62 }
  0xd0   : > { %v412_v1 = vpop.permute.xlu0 %411  ;;  %v417_v7 = vpop.permute.xlu1 %416 }
  0xd4   : > { %v422_v21 = vpop.permute.xlu1 %421  ;;  %v427_v26 = vpop.permute.xlu0 %426 }
 0x193   : > { %v860_v63 = vpop.f32.mrb[0].mxu0 }
 0x194   : > { %v861_v0 = vpop.f32.mrb[1].mxu0 }
 0x195   : > { %v862_v2 = vadd.f32 %v861_v0, %v860_v63  ;;  %v863_v3 = vpop.f32.mrb[2].mxu0 }
 0x196   : > { %v864_v4 = vpop.f32.mrb[3].mxu0 }
 0x197   : > { %v501_v5 = vadd.f32 %v862_v2, %v412_v1  ;;  %v865_v6 = vadd.f32 %v864_v4, %v863_v3 }
 0x198   : > { %v882_v8 = vpop.f32.mrb[0].mxu1 }
 0x199   : > { %v549_v9 = vpop.f32.mrb[1].mxu1  ;;  %v504_v10 = vadd.f32 %v865_v6, %v417_v7  ;;  %v258_v6 = vld [vmem:[%s1126_s3] sm:$0xff]  ;;  %v259_v7 = vld [vmem:[%s1126_s3 + $0x8] sm:$0xff] }
 0x19a   : > { %v1060_v12 = vadd.f32 %v549_v9, %v501_v5  ;;  %v883_v13 = vpop.f32.mrb[2].mxu1 }
 0x19b   : > { %v866_v14 = vpop.f32.mrb[4].mxu0  ;;  %v552_v15 = vpop.f32.mrb[3].mxu1 }
 0x19c   : > { %v1062_v16 = vadd.f32 %v552_v15, %v504_v10  ;;  %v867_v17 = vpop.f32.mrb[5].mxu0  ;;  %v570_v18 = vmul.f32 %v820_v11, %v1060_v12 }
 0x19d   : > { %v868_v19 = vadd.f32 %v867_v17, %v866_v14  ;;  %v869_v20 = vpop.f32.mrb[6].mxu0  ;;  %v262_v14 = vld [vmem:[%s1127_s4] sm:$0xff] }
 0x19e   : > { %v870_v22 = vpop.f32.mrb[7].mxu0  ;;  %v571_v23 = vmul.f32 %v820_v11, %v1062_v16  ;;  %v582_v28 = vmul.f32 %v570_v18, %v1060_v12 }
 0x19f   : > { %v509_v24 = vadd.f32 %v868_v19, %v422_v21  ;;  %v871_v25 = vadd.f32 %v870_v22, %v869_v20  ;;  %v260_v22 = vld [vmem:[%s1126_s3 + $0x10] sm:$0xff] }
 0x1a0   : > { %v572_v27 = vadd.f32 %v571_v23, %v570_v18  ;;  %v583_v29 = vmul.f32 %v571_v23, %v1062_v16  ;;  %v261_v23 = vld [vmem:[%s1126_s3 + $0x18] sm:$0xff] }
 0x1a1   : > { %v1068_v30 = vadd.f32 %v882_v8, %v509_v24  ;;  %v512_v31 = vadd.f32 %v871_v25, %v427_v26 }
 0x1a2   : > { %573 = vadd.xlane.f32.xlu1 %v572_v27  ;;  %v584_v32 = vadd.f32 %v583_v29, %v582_v28  ;;  %v265_v28 = vld [vmem:[%s1127_s4 + $0x18] sm:$0xff]  ;;  %v264_v29 = vld [vmem:[%s1127_s4 + $0x10] sm:$0xff] }
 0x1a3   : > { %v1070_v33 = vadd.f32 %v883_v13, %v512_v31  ;;  %v607_v34 = vmul.f32 %v820_v11, %v1068_v30  ;;  %v263_v13 = vld [vmem:[%s1127_s4 + $0x8] sm:$0xff] }
 0x1a4   : > { %585 = vadd.xlane.f32.xlu0 %v584_v32 }
 0x1a5   : > { %v608_v35 = vmul.f32 %v820_v11, %v1070_v33  ;;  %v619_v37 = vmul.f32 %v607_v34, %v1068_v30 }
 0x1a7   : > { %v609_v36 = vadd.f32 %v608_v35, %v607_v34  ;;  %v620_v38 = vmul.f32 %v608_v35, %v1070_v33 }
 0x1a9   : > { %610 = vadd.xlane.f32.xlu0 %v609_v36  ;;  %v621_v39 = vadd.f32 %v620_v38, %v619_v37 }
 0x1ab   : > { %622 = vadd.xlane.f32.xlu1 %v621_v39 }
 0x22f   : > { %v574_v40 = vpop.xlane.xlu1 %573 }
 0x230   : > { %v575_v41 = vrot.slane %v574_v40, 4 }
 0x231   : > { %v586_v42 = vpop.xlane.xlu0 %585 }
 0x232   : > { %v576_v43 = vadd.f32 %v575_v41, %v574_v40  ;;  %v587_v44 = vrot.slane %v586_v42, 4 }
 0x234   : > { %v577_v45 = vrot.slane %v576_v43, 2  ;;  %v588_v46 = vadd.f32 %v587_v44, %v586_v42 }
 0x236   : > { %v589_v47 = vrot.slane %v588_v46, 2  ;;  %v578_v48 = vadd.f32 %v577_v45, %v576_v43  ;;  %v611_v54 = vpop.xlane.xlu0 %610 }
 0x237   : > { %v612_v56 = vrot.slane %v611_v54, 4 }
 0x238   : > { %v579_v49 = vrot.slane %v578_v48, 1  ;;  %v590_v50 = vadd.f32 %v589_v47, %v588_v46  ;;  %v623_v55 = vpop.xlane.xlu1 %622 }
 0x239   : > { %v624_v57 = vrot.slane %v623_v55, 4  ;;  %v613_v58 = vadd.f32 %v612_v56, %v611_v54 }
 0x23a   : > { %v580_v51 = vadd.f32 %v579_v49, %v578_v48  ;;  %v591_v52 = vrot.slane %v590_v50, 1 }
 0x23b   : > { %v625_v59 = vadd.f32 %v624_v57, %v623_v55  ;;  %v614_v60 = vrot.slane %v613_v58, 2 }
 0x23c   : > { %884 = vpush %v580_v51  ;;  %v592_v53 = vadd.f32 %v591_v52, %v590_v50 }
 0x23d   : > { %v626_v61 = vrot.slane %v625_v59, 2  ;;  %v615_v63 = vadd.f32 %v614_v60, %v613_v58 }
 0x23e   : > { %886 = vpush %v592_v53 }
 0x23f   : > { %v627_v0 = vadd.f32 %v626_v61, %v625_v59  ;;  %v616_v1 = vrot.slane %v615_v63, 1 }
 0x241   : > { %v628_v2 = vrot.slane %v627_v0, 1  ;;  %v617_v4 = vadd.f32 %v616_v1, %v615_v63 }
 0x243   : > { %v629_v5 = vadd.f32 %v628_v2, %v627_v0 }
 0x26d   : > { %s885_s11 = spop %884 }
 0x26e   : > { %s1076_s12 = smul.f32 0.00390625, %s885_s11 }
 0x26f   : > { %s887_s13 = spop %886 }
 0x270   : > { %s600_s14 = smul.f32 %s1076_s12, %s1076_s12  ;;  %v644_v11 = vstv %s1076_s12 }
 0x271   : > { %s599_s15 = smul.f32 0.00390625, %s887_s13 }
 0x273   : > { %s601_s16 = ssub.f32 %s599_s15, %s600_s14 }
 0x275   : > { %s602_s18 = smax.f32 %s951_s17, %s601_s16 }
 0x276   : > { %s603_s19 = sadd.f32 1e-05, %s602_s18 }
 0x278   : > { %v604_v62 = vstv %s603_s19 }
 0x279   : > { %930 = vrsqrt.f32 %v604_v62 }
 0x283   : > { %v931_v3 = vpop.eup %930 }
 0x284   : > { %888 = vpush %v931_v3 }
 0x285   : > { %890 = vpush %v617_v4 }
 0x286   : > { %892 = vpush %v629_v5 }
 0x2b5   : > { %s889_s26 = spop %888 }
 0x2b6   : > { %v650_v8 = vstv %s889_s26  ;;  %s891_s27 = spop %890  ;;  %s828_s26 = sshll.u32 %s1131_s22, 4 }
 0x2b7   : > { %v656_v9 = vmul.f32 %v650_v8, %v258_v6  ;;  %v657_v10 = vmul.f32 %v650_v8, %v259_v7  ;;  %s1087_s28 = smul.f32 0.00390625, %s891_s27  ;;  %s893_s29 = spop %892 }
 0x2b8   : > { %s636_s30 = smul.f32 0.00390625, %s893_s29  ;;  %s251_s29 = scalar_lea.vmem %s1129_s6, %s828_s26 }
 0x2b9   : > { %v660_v15 = vmul.f32 %v656_v9, %v644_v11  ;;  %v661_v17 = vmul.f32 %v657_v10, %v644_v11  ;;  %s637_s11 = smul.f32 %s1087_s28, %s1087_s28  ;;  %675 = vperm.xlu1 %915, %v657_v10   ;;  %670 = vperm.xlu0 %914, %v656_v9   ;;  %v645_v27 = vstv %s1087_s28 }
 0x2bb   : > { %s638_s13 = ssub.f32 %s636_s30, %s637_s11  ;;  %v665_v18 = vsub.f32 %v263_v13, %v661_v17  ;;  %v664_v19 = vsub.f32 %v262_v14, %v660_v15 }
 0x2bd   : > { %s639_s12 = smax.f32 %s951_s17, %s638_s13  ;;  %699 = vperm.xlu0 %914, %v665_v18   ;;  %694 = vperm.xlu1 %915, %v664_v19  }
 0x2be   : > { %s640_s14 = sadd.f32 1e-05, %s639_s12 }
 0x2c0   : > { %v641_v20 = vstv %s640_s14 }
 0x2c1   : > { %932 = vrsqrt.f32 %v641_v20 }
 0x2cb   : > { %v933_v21 = vpop.eup %932 }
 0x2cc   : > { %894 = vpush %v933_v21 }
 0x2fd   : > { %s895_s20 = spop %894 }
 0x2fe   : > { %v651_v24 = vstv %s895_s20 }
 0x2ff   : > { %v658_v25 = vmul.f32 %v651_v24, %v260_v22  ;;  %v659_v26 = vmul.f32 %v651_v24, %v261_v23 }
 0x301   : > { %v662_v31 = vmul.f32 %v658_v25, %v645_v27  ;;  %v663_v32 = vmul.f32 %v659_v26, %v645_v27  ;;  %685 = vperm.xlu0 %914, %v659_v26   ;;  %680 = vperm.xlu1 %915, %v658_v25  }
 0x303   : > { %v667_v34 = vsub.f32 %v265_v28, %v663_v32  ;;  %v666_v35 = vsub.f32 %v264_v29, %v662_v31 }
 0x305   : > { %709 = vperm.xlu0 %914, %v667_v34   ;;  %704 = vperm.xlu1 %915, %v666_v35  }
 0x338   : > { %v676_v36 = vpop.permute.xlu1 %675  ;;  %v671_v37 = vpop.permute.xlu0 %670 }
 0x339   : > { %v689_v38 = vmul.f32 %v676_v36, %v1062_v16  ;;  %v688_v39 = vmul.f32 %v671_v37, %v1060_v12 }
 0x33c   : > { %v695_v40 = vpop.permute.xlu1 %694  ;;  %v700_v41 = vpop.permute.xlu0 %699 }
 0x33d   : > { %v712_v42 = vadd.f32 %v695_v40, %v688_v39  ;;  %v713_v43 = vadd.f32 %v700_v41, %v689_v38 }
 0x33f   : > { %v716_v44 = vmul.f32 0.2, %v712_v42  ;;  %v717_v45 = vmul.f32 0.2, %v713_v43 }
 0x341   : > { %v720_v46 = vmax.f32 %v712_v42, %v716_v44  ;;  %v721_v47 = vmax.f32 %v713_v43, %v717_v45 }
 0x343   : > { %v836_v48 = vpack.c.bf16 %v721_v47, %v720_v46 }
 0x345   : > { %837 = vst [vmem:[%s251_s29] sm:$0xff] %v836_v48  }
 0x380   : > { %v681_v49 = vpop.permute.xlu1 %680  ;;  %v686_v50 = vpop.permute.xlu0 %685 }
 0x381   : > { %v690_v16 = vmul.f32 %v681_v49, %v1068_v30  ;;  %v691_v12 = vmul.f32 %v686_v50, %v1070_v33 }
 0x384   : > { %v705_v51 = vpop.permute.xlu1 %704  ;;  %v710_v52 = vpop.permute.xlu0 %709 }
 0x385   : > { %v714_v53 = vadd.f32 %v705_v51, %v690_v16  ;;  %v715_v54 = vadd.f32 %v710_v52, %v691_v12 }
 0x387   : > { %v718_v55 = vmul.f32 0.2, %v714_v53  ;;  %v719_v56 = vmul.f32 0.2, %v715_v54 }
 0x389   : > { %v722_v57 = vmax.f32 %v714_v53, %v718_v55  ;;  %v723_v58 = vmax.f32 %v715_v54, %v719_v56 }
 0x38b   : > { %v841_v59 = vpack.c.bf16 %v723_v58, %v722_v57 }
 0x38d   : > { %843 = vst [vmem:[%s251_s29 + $0x8] sm:$0xff] %v841_v59  }
 0x38e PF: > { %s16_s21 = sadd.s32 1, %s940_s21  }
 0x38f   : > { %p13_p4 = scmp.ge.s32.totalorder %s16_s21, 4  }
 0x391   :  { %15 = sbr.rel (!%p13_p4) target bundleno = 1 (0x1), region = 74 }

</bundles_post_ra>
